<compile_context>
chip_gen: v5e
topology: v5e:2x2
jax: 0.10.0
libtpu: 0.0.40
codegen_flags: <defaults>
</compile_context>

<pallas_src>
import functools

import jax
import jax.numpy as jnp
from jax.experimental import pallas as pl
from jax.experimental.pallas import tpu as pltpu

KSIZE = 7
PAD = 3  # padding = 3 for kernel_size 7


def _round_up(v, m):
    return -(-v // m) * m


# --------------------------------------------------------------------------
# Shared helper: 2->1 7x7 conv + sigmoid on a zero-padded (2, Hp, Wp) f32
# scratch.  Returns a (height, width) f32 value.
# 14 lane-shifted views are reused across all ky taps; the ky offsets are
# cheap sublane slices -> ~21 relayout ops total (vs 98 unaligned slices).
# --------------------------------------------------------------------------
def _conv7x7_sigmoid(w_ref, pad_sc, height, width):
    hp = height + 2 * PAD
    # Hoist all 98 SMEM scalar weight reads above the tap loops.
    wts = [w_ref[i] for i in range(2 * KSIZE * KSIZE)]

    # 14 lane-shifted (Hp, width) views (per channel, per kx).
    shifted = []
    for c in range(2):
        p = pad_sc[c]                                        # (Hp, Wp) f32
        shifted.append([jax.lax.slice(p, (0, kx), (hp, kx + width))
                        for kx in range(KSIZE)])

    acc = None
    for ky in range(KSIZE):
        s_ky = None                                          # (Hp, width) partial
        for c in range(2):
            base = c * KSIZE * KSIZE + ky * KSIZE
            for kx in range(KSIZE):
                term = wts[base + kx] * shifted[c][kx]
                s_ky = term if s_ky is None else s_ky + term
        rows = jax.lax.slice(s_ky, (ky, 0), (ky + height, width))
        acc = rows if acc is None else acc + rows
    return jax.nn.sigmoid(acc)                               # (height, width) f32


# --------------------------------------------------------------------------
# Fused single-pass kernel: reduce + conv + apply on a resident (C, HW) slab.
# --------------------------------------------------------------------------
def _fused_kernel(w_ref, x_ref, o_ref, sum_sc, max_sc, pad_sc, attn_sc, *,
                  n_channels, height, width, c_chunk):
    # ---- channel mean / max over the resident slab (chunked, f32 accum) ----
    sum_sc[...] = jnp.zeros(sum_sc.shape, sum_sc.dtype)
    max_sc[...] = jnp.full(max_sc.shape, -jnp.inf, max_sc.dtype)
    for lo in range(0, n_channels, c_chunk):
        hi = min(n_channels, lo + c_chunk)
        xc = x_ref[lo:hi, :].astype(jnp.float32)
        sum_sc[...] += jnp.sum(xc, axis=0, keepdims=True)
        max_sc[...] = jnp.maximum(max_sc[...],
                                  jnp.max(xc, axis=0, keepdims=True))

    # ---- lay the two (H, W) maps into the zero-padded conv scratch ---------
    inv_c = 1.0 / n_channels
    pad_sc[...] = jnp.zeros(pad_sc.shape, pad_sc.dtype)
    for h in range(height):
        lo = h * width
        pad_sc[0, PAD + h:PAD + h + 1, PAD:PAD + width] = (
            sum_sc[:, lo:lo + width] * inv_c)
        pad_sc[1, PAD + h:PAD + h + 1, PAD:PAD + width] = max_sc[:, lo:lo + width]

    # ---- 7x7 conv + sigmoid, then flatten back to lane-dense (1, HW) -------
    attn_hw = _conv7x7_sigmoid(w_ref, pad_sc, height, width)
    for h in range(height):
        attn_sc[:, h * width:(h + 1) * width] = attn_hw[h:h + 1, :]

    # ---- apply: y = x * attn (broadcast over channels), chunked ------------
    attn = attn_sc[...].astype(o_ref.dtype)
    for lo in range(0, n_channels, c_chunk):
        hi = min(n_channels, lo + c_chunk)
        o_ref[lo:hi, :] = x_ref[lo:hi, :] * attn


# --------------------------------------------------------------------------
# Fallback pass 1: channel mean / max with the conv + sigmoid fused into the
# finalize step (writes attn directly, no maps HBM roundtrip).
# --------------------------------------------------------------------------
def _reduce_conv_kernel(w_ref, x_ref, attn_ref, sum_sc, max_sc, pad_sc, *,
                        n_channels, c_tile, height, width):
    ci = pl.program_id(1)
    nc = pl.num_programs(1)

    @pl.when(ci == 0)
    def _():
        sum_sc[...] = jnp.zeros(sum_sc.shape, sum_sc.dtype)
        max_sc[...] = jnp.full(max_sc.shape, -jnp.inf, max_sc.dtype)

    xf = x_ref[...].astype(jnp.float32)                      # (c_tile, HW)
    rem = n_channels % c_tile
    if rem == 0:
        sum_sc[...] += jnp.sum(xf, axis=0, keepdims=True)
        max_sc[...] = jnp.maximum(max_sc[...],
                                  jnp.max(xf, axis=0, keepdims=True))
    else:
        # Hot path: full tiles need no masking.
        @pl.when(ci < nc - 1)
        def _():
            sum_sc[...] += jnp.sum(xf, axis=0, keepdims=True)
            max_sc[...] = jnp.maximum(max_sc[...],
                                      jnp.max(xf, axis=0, keepdims=True))

        # Ragged last tile only: mask out-of-range channels (sum->0, max->-inf).
        @pl.when(ci == nc - 1)
        def _():
            ch = jax.lax.broadcasted_iota(jnp.int32, xf.shape, 0)
            valid = ch < rem
            sum_sc[...] += jnp.sum(jnp.where(valid, xf, 0.0),
                                   axis=0, keepdims=True)
            max_sc[...] = jnp.maximum(
                max_sc[...],
                jnp.max(jnp.where(valid, xf, -jnp.inf), axis=0, keepdims=True))

    @pl.when(ci == nc - 1)
    def _():
        inv_c = 1.0 / n_channels
        pad_sc[...] = jnp.zeros(pad_sc.shape, pad_sc.dtype)
        for h in range(height):
            lo = h * width
            pad_sc[0, PAD + h:PAD + h + 1, PAD:PAD + width] = (
                sum_sc[:, lo:lo + width] * inv_c)
            pad_sc[1, PAD + h:PAD + h + 1, PAD:PAD + width] = (
                max_sc[:, lo:lo + width])
        attn_hw = _conv7x7_sigmoid(w_ref, pad_sc, height, width)
        for h in range(height):
            attn_ref[:, h * width:(h + 1) * width] = (
                attn_hw[h:h + 1, :].astype(attn_ref.dtype))


# --------------------------------------------------------------------------
# Fallback pass 2: lane-dense broadcast multiply in native dtype.
# --------------------------------------------------------------------------
def _apply_kernel(x_ref, attn_ref, o_ref):
    o_ref[...] = x_ref[...] * attn_ref[...]                  # (c_tile,HW)*(1,HW)


# --------------------------------------------------------------------------
# Wrapper
# --------------------------------------------------------------------------
def _vmem_budget_bytes():
    try:
        cap = int(pltpu.get_tpu_info().vmem_capacity_bytes)
    except Exception:
        cap = 64 * 1024 * 1024        # conservative default (v7x per-core VMEM)
    # ~45 MiB on v7x (64 MiB), ~90 MiB on v5e/v6e (128 MiB).
    return min(int(cap * 0.7), 96 * 1024 * 1024)


def spatial_attention(x, weight):
    """x: (B, C, H, W); weight: (1, 2, KSIZE, KSIZE) conv kernel (no bias)."""
    B, C, H, W = x.shape
    HW = H * W
    itemsize = jnp.dtype(x.dtype).itemsize

    x_flat = x.reshape(B, C, HW)                 # lane-dense view (free reshape)
    w_flat = weight.reshape(-1).astype(jnp.float32)

    vmem_budget = _vmem_budget_bytes()
    hp = H + 2 * PAD
    wp = _round_up(W + 2 * PAD, 128)             # lane-aligned conv scratch width
    conv_scratch_bytes = (2 * hp * wp + 3 * HW) * 4

    smem_spec = pl.BlockSpec(memory_space=pltpu.MemorySpace.SMEM)

    # Fused path keeps ~2x input + 2x output slabs live (double buffering).
    slab_bytes = C * HW * itemsize
    fused_ok = 4 * slab_bytes + conv_scratch_bytes <= int(0.9 * vmem_budget)

    if fused_ok:
        # In-kernel channel chunking: multiple of 8 rows, bounded unroll.
        c_chunk = min(C, max(8, _round_up(pl.cdiv(C, 16), 8)))
        slab_spec = pl.BlockSpec((pl.Squeezed(), C, HW), lambda b: (b, 0, 0))
        y_flat = pl.pallas_call(
            functools.partial(_fused_kernel, n_channels=C, height=H, width=W,
                              c_chunk=c_chunk),
            out_shape=jax.ShapeDtypeStruct((B, C, HW), x.dtype),
            grid=(B,),
            in_specs=[smem_spec, slab_spec],
            out_specs=slab_spec,
            scratch_shapes=[pltpu.VMEM((1, HW), jnp.float32),   # sum
                            pltpu.VMEM((1, HW), jnp.float32),   # max
                            pltpu.VMEM((2, hp, wp), jnp.float32),
                            pltpu.VMEM((1, HW), jnp.float32)],  # attn flat
            compiler_params=pltpu.CompilerParams(
                dimension_semantics=("parallel",),
                vmem_limit_bytes=vmem_budget),
            cost_estimate=pl.CostEstimate(
                flops=4 * B * C * HW + 2 * 2 * KSIZE * KSIZE * B * HW,
                transcendentals=B * HW,
                bytes_accessed=2 * B * C * HW * itemsize),
        )(w_flat, x_flat)
        return y_flat.reshape(B, C, H, W)

    # ---- fallback: two passes for very large per-batch slabs ---------------
    # Channel tile targeting ~8 MiB per x block, bounded by the VMEM budget.
    target = min(8 * 1024 * 1024, vmem_budget // 6)
    c_tile = max(8, (target // (HW * itemsize)) // 8 * 8)
    c_tile = int(min(c_tile, C))
    n_ct = pl.cdiv(C, c_tile)

    x_spec = pl.BlockSpec((pl.Squeezed(), c_tile, HW), lambda b, c: (b, c, 0))
    attn_spec = pl.BlockSpec((pl.Squeezed(), 1, HW), lambda b, c: (b, 0, 0))

    # Pass 1: channel mean/max + fused 7x7 conv + sigmoid in the finalize.
    attn = pl.pallas_call(
        functools.partial(_reduce_conv_kernel, n_channels=C, c_tile=c_tile,
                          height=H, width=W),
        out_shape=jax.ShapeDtypeStruct((B, 1, HW), x.dtype),
        grid=(B, n_ct),
        in_specs=[smem_spec, x_spec],
        out_specs=attn_spec,
        scratch_shapes=[pltpu.VMEM((1, HW), jnp.float32),
                        pltpu.VMEM((1, HW), jnp.float32),
                        pltpu.VMEM((2, hp, wp), jnp.float32)],
        compiler_params=pltpu.CompilerParams(
            dimension_semantics=("parallel", "arbitrary"),
            vmem_limit_bytes=vmem_budget),
        cost_estimate=pl.CostEstimate(
            flops=3 * B * C * HW + 2 * 2 * KSIZE * KSIZE * B * HW,
            transcendentals=B * HW,
            bytes_accessed=B * C * HW * itemsize + B * HW * itemsize),
    )(w_flat, x_flat)

    # Pass 2: y = x * attn (lane-dense, native dtype, no per-step cast).
    y_flat = pl.pallas_call(
        _apply_kernel,
        out_shape=jax.ShapeDtypeStruct((B, C, HW), x.dtype),
        grid=(B, n_ct),
        in_specs=[x_spec, attn_spec],
        out_specs=x_spec,
        compiler_params=pltpu.CompilerParams(
            dimension_semantics=("parallel", "parallel"),
            vmem_limit_bytes=vmem_budget),
        cost_estimate=pl.CostEstimate(
            flops=B * C * HW, transcendentals=0,
            bytes_accessed=2 * B * C * HW * itemsize + B * HW * itemsize),
    )(x_flat, attn)

    return y_flat.reshape(B, C, H, W)


def spatial_attention_reference(x, weight):
    mean_out = jnp.mean(x, axis=1, keepdims=True)
    max_out = jnp.max(x, axis=1, keepdims=True)
    out = jnp.concatenate([mean_out, max_out], axis=1)       # (B, 2, H, W)
    conv = jax.lax.conv_general_dilated(
        out, weight, window_strides=(1, 1),
        padding=[(PAD, PAD), (PAD, PAD)],
        dimension_numbers=("NCHW", "OIHW", "NCHW"))
    return x * jax.nn.sigmoid(conv)


if __name__ == "__main__":
    key = jax.random.PRNGKey(0)
    kx, kw = jax.random.split(key)

    B, C, H, W = 2, 4, 16, 16
    x = jax.random.normal(kx, (B, C, H, W), dtype=jnp.float32)

    # Deterministic conv1 weights: (out=1, in=2, 7, 7), Kaiming-uniform-like bound
    fan_in = 2 * KSIZE * KSIZE
    bound = 1.0 / (fan_in ** 0.5)
    weight = jax.random.uniform(kw, (1, 2, KSIZE, KSIZE),
                                minval=-bound, maxval=bound, dtype=jnp.float32)

    y = spatial_attention(x, weight)
    y = jax.block_until_ready(y)

    y_ref = spatial_attention_reference(x, weight)
    assert y.shape == (B, C, H, W)
    assert jnp.allclose(y, y_ref, atol=1e-5, rtol=1e-5), "mismatch vs reference"

    print("KERNEL_OK")
</pallas_src>

<mosaic_0001>
module attributes {stable_mosaic.version = 11 : i64} {
  func.func @_fused_kernel(%arg0: i32, %arg1: memref<98xf32, #tpu.memory_space<smem>>, %arg2: memref<1x4x256xf32, #tpu.memory_space<vmem>>, %arg3: memref<1x4x256xf32, #tpu.memory_space<vmem>>, %arg4: memref<1x256xf32, #tpu.memory_space<vmem>>, %arg5: memref<1x256xf32, #tpu.memory_space<vmem>>, %arg6: memref<2x22x128xf32, #tpu.memory_space<vmem>>, %arg7: memref<1x256xf32, #tpu.memory_space<vmem>>) attributes {dimension_semantics = [#tpu.dimension_semantics<parallel>], iteration_bounds = array<i64: 2>, scalar_prefetch = 0 : i64, scratch_operands = 4 : i64, tpu.core_type = #tpu.core_type<tc>, window_params = [{transform_indices = @transform_0, window_bounds = array<i64: 98>}, {transform_indices = @transform_1, window_bounds = array<i64: 1, 4, 256>}, {transform_indices = @transform_2, window_bounds = array<i64: 1, 4, 256>}]} {
    %cst = arith.constant 0.000000e+00 : f32
    %0 = vector.broadcast %cst : f32 to vector<1x256xf32>
    %c0 = arith.constant 0 : index
    %c0_0 = arith.constant 0 : index
    %1 = vector.load %arg4[%c0, %c0_0] : memref<1x256xf32, #tpu.memory_space<vmem>>, vector<1x256xf32>
    tpu.vector_store %arg4[%c0, %c0_0], %0 {strides = array<i32>} : memref<1x256xf32, #tpu.memory_space<vmem>>, vector<1x256xf32>,
    %cst_1 = arith.constant 0xFF800000 : f32
    %2 = vector.broadcast %cst_1 : f32 to vector<1x256xf32>
    %c0_2 = arith.constant 0 : index
    %c0_3 = arith.constant 0 : index
    %3 = vector.load %arg5[%c0_2, %c0_3] : memref<1x256xf32, #tpu.memory_space<vmem>>, vector<1x256xf32>
    tpu.vector_store %arg5[%c0_2, %c0_3], %2 {strides = array<i32>} : memref<1x256xf32, #tpu.memory_space<vmem>>, vector<1x256xf32>,
    %c0_4 = arith.constant 0 : index
    %c0_5 = arith.constant 0 : index
    %c0_6 = arith.constant 0 : index
    %4 = vector.load %arg2[%c0_4, %c0_5, %c0_6] : memref<1x4x256xf32, #tpu.memory_space<vmem>>, vector<1x4x256xf32>
    %5 = vector.shape_cast %4 : vector<1x4x256xf32> to vector<4x256xf32>
    %c0_7 = arith.constant 0 : index
    %c0_8 = arith.constant 0 : index
    %6 = vector.load %arg4[%c0_7, %c0_8] : memref<1x256xf32, #tpu.memory_space<vmem>>, vector<1x256xf32>
    %cst_9 = arith.constant dense<0.000000e+00> : vector<256xf32>
    %7 = vector.multi_reduction <add>, %5, %cst_9 [0] : vector<4x256xf32> to vector<256xf32>
    %8 = vector.shape_cast %7 : vector<256xf32> to vector<1x256xf32>
    %9 = arith.addf %6, %8 : vector<1x256xf32>
    %c0_10 = arith.constant 0 : index
    %c0_11 = arith.constant 0 : index
    %10 = vector.load %arg4[%c0_10, %c0_11] : memref<1x256xf32, #tpu.memory_space<vmem>>, vector<1x256xf32>
    tpu.vector_store %arg4[%c0_10, %c0_11], %9 {strides = array<i32>} : memref<1x256xf32, #tpu.memory_space<vmem>>, vector<1x256xf32>,
    %c0_12 = arith.constant 0 : index
    %c0_13 = arith.constant 0 : index
    %11 = vector.load %arg5[%c0_12, %c0_13] : memref<1x256xf32, #tpu.memory_space<vmem>>, vector<1x256xf32>
    %cst_14 = arith.constant dense<0xFF800000> : vector<256xf32>
    %12 = vector.multi_reduction <maximumf>, %5, %cst_14 [0] : vector<4x256xf32> to vector<256xf32>
    %13 = vector.shape_cast %12 : vector<256xf32> to vector<1x256xf32>
    %14 = arith.maximumf %11, %13 : vector<1x256xf32>
    %c0_15 = arith.constant 0 : index
    %c0_16 = arith.constant 0 : index
    %15 = vector.load %arg5[%c0_15, %c0_16] : memref<1x256xf32, #tpu.memory_space<vmem>>, vector<1x256xf32>
    tpu.vector_store %arg5[%c0_15, %c0_16], %14 {strides = array<i32>} : memref<1x256xf32, #tpu.memory_space<vmem>>, vector<1x256xf32>,
    %cst_17 = arith.constant 0.000000e+00 : f32
    %16 = vector.broadcast %cst_17 : f32 to vector<2x22x128xf32>
    %c0_18 = arith.constant 0 : index
    %c0_19 = arith.constant 0 : index
    %c0_20 = arith.constant 0 : index
    %17 = vector.load %arg6[%c0_18, %c0_19, %c0_20] : memref<2x22x128xf32, #tpu.memory_space<vmem>>, vector<2x22x128xf32>
    tpu.vector_store %arg6[%c0_18, %c0_19, %c0_20], %16 {strides = array<i32>} : memref<2x22x128xf32, #tpu.memory_space<vmem>>, vector<2x22x128xf32>,
    %c0_21 = arith.constant 0 : index
    %c0_22 = arith.constant 0 : index
    %18 = vector.load %arg4[%c0_21, %c0_22] : memref<1x256xf32, #tpu.memory_space<vmem>>, vector<1x16xf32>
    %cst_23 = arith.constant 2.500000e-01 : f32
    %19 = vector.broadcast %cst_23 : f32 to vector<1x16xf32>
    %20 = arith.mulf %18, %19 : vector<1x16xf32>
    %c0_24 = arith.constant 0 : index
    %c3 = arith.constant 3 : index
    %c3_25 = arith.constant 3 : index
    %21 = vector.load %arg6[%c0_24, %c3, %c3_25] : memref<2x22x128xf32, #tpu.memory_space<vmem>>, vector<1x1x16xf32>
    %22 = vector.shape_cast %21 : vector<1x1x16xf32> to vector<1x16xf32>
    %23 = vector.shape_cast %20 : vector<1x16xf32> to vector<1x1x16xf32>
    tpu.vector_store %arg6[%c0_24, %c3, %c3_25], %23 {strides = array<i32>} : memref<2x22x128xf32, #tpu.memory_space<vmem>>, vector<1x1x16xf32>,
    %c0_26 = arith.constant 0 : index
    %c0_27 = arith.constant 0 : index
    %24 = vector.load %arg5[%c0_26, %c0_27] : memref<1x256xf32, #tpu.memory_space<vmem>>, vector<1x16xf32>
    %c1 = arith.constant 1 : index
    %c3_28 = arith.constant 3 : index
    %c3_29 = arith.constant 3 : index
    %25 = vector.load %arg6[%c1, %c3_28, %c3_29] : memref<2x22x128xf32, #tpu.memory_space<vmem>>, vector<1x1x16xf32>
    %26 = vector.shape_cast %25 : vector<1x1x16xf32> to vector<1x16xf32>
    %27 = vector.shape_cast %24 : vector<1x16xf32> to vector<1x1x16xf32>
    tpu.vector_store %arg6[%c1, %c3_28, %c3_29], %27 {strides = array<i32>} : memref<2x22x128xf32, #tpu.memory_space<vmem>>, vector<1x1x16xf32>,
    %c0_30 = arith.constant 0 : index
    %c16 = arith.constant 16 : index
    %28 = vector.load %arg4[%c0_30, %c16] : memref<1x256xf32, #tpu.memory_space<vmem>>, vector<1x16xf32>
    %cst_31 = arith.constant 2.500000e-01 : f32
    %29 = vector.broadcast %cst_31 : f32 to vector<1x16xf32>
    %30 = arith.mulf %28, %29 : vector<1x16xf32>
    %c0_32 = arith.constant 0 : index
    %c4 = arith.constant 4 : index
    %c3_33 = arith.constant 3 : index
    %31 = vector.load %arg6[%c0_32, %c4, %c3_33] : memref<2x22x128xf32, #tpu.memory_space<vmem>>, vector<1x1x16xf32>
    %32 = vector.shape_cast %31 : vector<1x1x16xf32> to vector<1x16xf32>
    %33 = vector.shape_cast %30 : vector<1x16xf32> to vector<1x1x16xf32>
    tpu.vector_store %arg6[%c0_32, %c4, %c3_33], %33 {strides = array<i32>} : memref<2x22x128xf32, #tpu.memory_space<vmem>>, vector<1x1x16xf32>,
    %c0_34 = arith.constant 0 : index
    %c16_35 = arith.constant 16 : index
    %34 = vector.load %arg5[%c0_34, %c16_35] : memref<1x256xf32, #tpu.memory_space<vmem>>, vector<1x16xf32>
    %c1_36 = arith.constant 1 : index
    %c4_37 = arith.constant 4 : index
    %c3_38 = arith.constant 3 : index
    %35 = vector.load %arg6[%c1_36, %c4_37, %c3_38] : memref<2x22x128xf32, #tpu.memory_space<vmem>>, vector<1x1x16xf32>
    %36 = vector.shape_cast %35 : vector<1x1x16xf32> to vector<1x16xf32>
    %37 = vector.shape_cast %34 : vector<1x16xf32> to vector<1x1x16xf32>
    tpu.vector_store %arg6[%c1_36, %c4_37, %c3_38], %37 {strides = array<i32>} : memref<2x22x128xf32, #tpu.memory_space<vmem>>, vector<1x1x16xf32>,
    %c0_39 = arith.constant 0 : index
    %c32 = arith.constant 32 : index
    %38 = vector.load %arg4[%c0_39, %c32] : memref<1x256xf32, #tpu.memory_space<vmem>>, vector<1x16xf32>
    %cst_40 = arith.constant 2.500000e-01 : f32
    %39 = vector.broadcast %cst_40 : f32 to vector<1x16xf32>
    %40 = arith.mulf %38, %39 : vector<1x16xf32>
    %c0_41 = arith.constant 0 : index
    %c5 = arith.constant 5 : index
    %c3_42 = arith.constant 3 : index
    %41 = vector.load %arg6[%c0_41, %c5, %c3_42] : memref<2x22x128xf32, #tpu.memory_space<vmem>>, vector<1x1x16xf32>
    %42 = vector.shape_cast %41 : vector<1x1x16xf32> to vector<1x16xf32>
    %43 = vector.shape_cast %40 : vector<1x16xf32> to vector<1x1x16xf32>
    tpu.vector_store %arg6[%c0_41, %c5, %c3_42], %43 {strides = array<i32>} : memref<2x22x128xf32, #tpu.memory_space<vmem>>, vector<1x1x16xf32>,
    %c0_43 = arith.constant 0 : index
    %c32_44 = arith.constant 32 : index
    %44 = vector.load %arg5[%c0_43, %c32_44] : memref<1x256xf32, #tpu.memory_space<vmem>>, vector<1x16xf32>
    %c1_45 = arith.constant 1 : index
    %c5_46 = arith.constant 5 : index
    %c3_47 = arith.constant 3 : index
    %45 = vector.load %arg6[%c1_45, %c5_46, %c3_47] : memref<2x22x128xf32, #tpu.memory_space<vmem>>, vector<1x1x16xf32>
    %46 = vector.shape_cast %45 : vector<1x1x16xf32> to vector<1x16xf32>
    %47 = vector.shape_cast %44 : vector<1x16xf32> to vector<1x1x16xf32>
    tpu.vector_store %arg6[%c1_45, %c5_46, %c3_47], %47 {strides = array<i32>} : memref<2x22x128xf32, #tpu.memory_space<vmem>>, vector<1x1x16xf32>,
    %c0_48 = arith.constant 0 : index
    %c48 = arith.constant 48 : index
    %48 = vector.load %arg4[%c0_48, %c48] : memref<1x256xf32, #tpu.memory_space<vmem>>, vector<1x16xf32>
    %cst_49 = arith.constant 2.500000e-01 : f32
    %49 = vector.broadcast %cst_49 : f32 to vector<1x16xf32>
    %50 = arith.mulf %48, %49 : vector<1x16xf32>
    %c0_50 = arith.constant 0 : index
    %c6 = arith.constant 6 : index
    %c3_51 = arith.constant 3 : index
    %51 = vector.load %arg6[%c0_50, %c6, %c3_51] : memref<2x22x128xf32, #tpu.memory_space<vmem>>, vector<1x1x16xf32>
    %52 = vector.shape_cast %51 : vector<1x1x16xf32> to vector<1x16xf32>
    %53 = vector.shape_cast %50 : vector<1x16xf32> to vector<1x1x16xf32>
    tpu.vector_store %arg6[%c0_50, %c6, %c3_51], %53 {strides = array<i32>} : memref<2x22x128xf32, #tpu.memory_space<vmem>>, vector<1x1x16xf32>,
    %c0_52 = arith.constant 0 : index
    %c48_53 = arith.constant 48 : index
    %54 = vector.load %arg5[%c0_52, %c48_53] : memref<1x256xf32, #tpu.memory_space<vmem>>, vector<1x16xf32>
    %c1_54 = arith.constant 1 : index
    %c6_55 = arith.constant 6 : index
    %c3_56 = arith.constant 3 : index
    %55 = vector.load %arg6[%c1_54, %c6_55, %c3_56] : memref<2x22x128xf32, #tpu.memory_space<vmem>>, vector<1x1x16xf32>
    %56 = vector.shape_cast %55 : vector<1x1x16xf32> to vector<1x16xf32>
    %57 = vector.shape_cast %54 : vector<1x16xf32> to vector<1x1x16xf32>
    tpu.vector_store %arg6[%c1_54, %c6_55, %c3_56], %57 {strides = array<i32>} : memref<2x22x128xf32, #tpu.memory_space<vmem>>, vector<1x1x16xf32>,
    %c0_57 = arith.constant 0 : index
    %c64 = arith.constant 64 : index
    %58 = vector.load %arg4[%c0_57, %c64] : memref<1x256xf32, #tpu.memory_space<vmem>>, vector<1x16xf32>
    %cst_58 = arith.constant 2.500000e-01 : f32
    %59 = vector.broadcast %cst_58 : f32 to vector<1x16xf32>
    %60 = arith.mulf %58, %59 : vector<1x16xf32>
    %c0_59 = arith.constant 0 : index
    %c7 = arith.constant 7 : index
    %c3_60 = arith.constant 3 : index
    %61 = vector.load %arg6[%c0_59, %c7, %c3_60] : memref<2x22x128xf32, #tpu.memory_space<vmem>>, vector<1x1x16xf32>
    %62 = vector.shape_cast %61 : vector<1x1x16xf32> to vector<1x16xf32>
    %63 = vector.shape_cast %60 : vector<1x16xf32> to vector<1x1x16xf32>
    tpu.vector_store %arg6[%c0_59, %c7, %c3_60], %63 {strides = array<i32>} : memref<2x22x128xf32, #tpu.memory_space<vmem>>, vector<1x1x16xf32>,
    %c0_61 = arith.constant 0 : index
    %c64_62 = arith.constant 64 : index
    %64 = vector.load %arg5[%c0_61, %c64_62] : memref<1x256xf32, #tpu.memory_space<vmem>>, vector<1x16xf32>
    %c1_63 = arith.constant 1 : index
    %c7_64 = arith.constant 7 : index
    %c3_65 = arith.constant 3 : index
    %65 = vector.load %arg6[%c1_63, %c7_64, %c3_65] : memref<2x22x128xf32, #tpu.memory_space<vmem>>, vector<1x1x16xf32>
    %66 = vector.shape_cast %65 : vector<1x1x16xf32> to vector<1x16xf32>
    %67 = vector.shape_cast %64 : vector<1x16xf32> to vector<1x1x16xf32>
    tpu.vector_store %arg6[%c1_63, %c7_64, %c3_65], %67 {strides = array<i32>} : memref<2x22x128xf32, #tpu.memory_space<vmem>>, vector<1x1x16xf32>,
    %c0_66 = arith.constant 0 : index
    %c80 = arith.constant 80 : index
    %68 = vector.load %arg4[%c0_66, %c80] : memref<1x256xf32, #tpu.memory_space<vmem>>, vector<1x16xf32>
    %cst_67 = arith.constant 2.500000e-01 : f32
    %69 = vector.broadcast %cst_67 : f32 to vector<1x16xf32>
    %70 = arith.mulf %68, %69 : vector<1x16xf32>
    %c0_68 = arith.constant 0 : index
    %c8 = arith.constant 8 : index
    %c3_69 = arith.constant 3 : index
    %71 = vector.load %arg6[%c0_68, %c8, %c3_69] : memref<2x22x128xf32, #tpu.memory_space<vmem>>, vector<1x1x16xf32>
    %72 = vector.shape_cast %71 : vector<1x1x16xf32> to vector<1x16xf32>
    %73 = vector.shape_cast %70 : vector<1x16xf32> to vector<1x1x16xf32>
    tpu.vector_store %arg6[%c0_68, %c8, %c3_69], %73 {strides = array<i32>} : memref<2x22x128xf32, #tpu.memory_space<vmem>>, vector<1x1x16xf32>,
    %c0_70 = arith.constant 0 : index
    %c80_71 = arith.constant 80 : index
    %74 = vector.load %arg5[%c0_70, %c80_71] : memref<1x256xf32, #tpu.memory_space<vmem>>, vector<1x16xf32>
    %c1_72 = arith.constant 1 : index
    %c8_73 = arith.constant 8 : index
    %c3_74 = arith.constant 3 : index
    %75 = vector.load %arg6[%c1_72, %c8_73, %c3_74] : memref<2x22x128xf32, #tpu.memory_space<vmem>>, vector<1x1x16xf32>
    %76 = vector.shape_cast %75 : vector<1x1x16xf32> to vector<1x16xf32>
    %77 = vector.shape_cast %74 : vector<1x16xf32> to vector<1x1x16xf32>
    tpu.vector_store %arg6[%c1_72, %c8_73, %c3_74], %77 {strides = array<i32>} : memref<2x22x128xf32, #tpu.memory_space<vmem>>, vector<1x1x16xf32>,
    %c0_75 = arith.constant 0 : index
    %c96 = arith.constant 96 : index
    %78 = vector.load %arg4[%c0_75, %c96] : memref<1x256xf32, #tpu.memory_space<vmem>>, vector<1x16xf32>
    %cst_76 = arith.constant 2.500000e-01 : f32
    %79 = vector.broadcast %cst_76 : f32 to vector<1x16xf32>
    %80 = arith.mulf %78, %79 : vector<1x16xf32>
    %c0_77 = arith.constant 0 : index
    %c9 = arith.constant 9 : index
    %c3_78 = arith.constant 3 : index
    %81 = vector.load %arg6[%c0_77, %c9, %c3_78] : memref<2x22x128xf32, #tpu.memory_space<vmem>>, vector<1x1x16xf32>
    %82 = vector.shape_cast %81 : vector<1x1x16xf32> to vector<1x16xf32>
    %83 = vector.shape_cast %80 : vector<1x16xf32> to vector<1x1x16xf32>
    tpu.vector_store %arg6[%c0_77, %c9, %c3_78], %83 {strides = array<i32>} : memref<2x22x128xf32, #tpu.memory_space<vmem>>, vector<1x1x16xf32>,
    %c0_79 = arith.constant 0 : index
    %c96_80 = arith.constant 96 : index
    %84 = vector.load %arg5[%c0_79, %c96_80] : memref<1x256xf32, #tpu.memory_space<vmem>>, vector<1x16xf32>
    %c1_81 = arith.constant 1 : index
    %c9_82 = arith.constant 9 : index
    %c3_83 = arith.constant 3 : index
    %85 = vector.load %arg6[%c1_81, %c9_82, %c3_83] : memref<2x22x128xf32, #tpu.memory_space<vmem>>, vector<1x1x16xf32>
    %86 = vector.shape_cast %85 : vector<1x1x16xf32> to vector<1x16xf32>
    %87 = vector.shape_cast %84 : vector<1x16xf32> to vector<1x1x16xf32>
    tpu.vector_store %arg6[%c1_81, %c9_82, %c3_83], %87 {strides = array<i32>} : memref<2x22x128xf32, #tpu.memory_space<vmem>>, vector<1x1x16xf32>,
    %c0_84 = arith.constant 0 : index
    %c112 = arith.constant 112 : index
    %88 = vector.load %arg4[%c0_84, %c112] : memref<1x256xf32, #tpu.memory_space<vmem>>, vector<1x16xf32>
    %cst_85 = arith.constant 2.500000e-01 : f32
    %89 = vector.broadcast %cst_85 : f32 to vector<1x16xf32>
    %90 = arith.mulf %88, %89 : vector<1x16xf32>
    %c0_86 = arith.constant 0 : index
    %c10 = arith.constant 10 : index
    %c3_87 = arith.constant 3 : index
    %91 = vector.load %arg6[%c0_86, %c10, %c3_87] : memref<2x22x128xf32, #tpu.memory_space<vmem>>, vector<1x1x16xf32>
    %92 = vector.shape_cast %91 : vector<1x1x16xf32> to vector<1x16xf32>
    %93 = vector.shape_cast %90 : vector<1x16xf32> to vector<1x1x16xf32>
    tpu.vector_store %arg6[%c0_86, %c10, %c3_87], %93 {strides = array<i32>} : memref<2x22x128xf32, #tpu.memory_space<vmem>>, vector<1x1x16xf32>,
    %c0_88 = arith.constant 0 : index
    %c112_89 = arith.constant 112 : index
    %94 = vector.load %arg5[%c0_88, %c112_89] : memref<1x256xf32, #tpu.memory_space<vmem>>, vector<1x16xf32>
    %c1_90 = arith.constant 1 : index
    %c10_91 = arith.constant 10 : index
    %c3_92 = arith.constant 3 : index
    %95 = vector.load %arg6[%c1_90, %c10_91, %c3_92] : memref<2x22x128xf32, #tpu.memory_space<vmem>>, vector<1x1x16xf32>
    %96 = vector.shape_cast %95 : vector<1x1x16xf32> to vector<1x16xf32>
    %97 = vector.shape_cast %94 : vector<1x16xf32> to vector<1x1x16xf32>
    tpu.vector_store %arg6[%c1_90, %c10_91, %c3_92], %97 {strides = array<i32>} : memref<2x22x128xf32, #tpu.memory_space<vmem>>, vector<1x1x16xf32>,
    %c0_93 = arith.constant 0 : index
    %c128 = arith.constant 128 : index
    %98 = vector.load %arg4[%c0_93, %c128] : memref<1x256xf32, #tpu.memory_space<vmem>>, vector<1x16xf32>
    %cst_94 = arith.constant 2.500000e-01 : f32
    %99 = vector.broadcast %cst_94 : f32 to vector<1x16xf32>
    %100 = arith.mulf %98, %99 : vector<1x16xf32>
    %c0_95 = arith.constant 0 : index
    %c11 = arith.constant 11 : index
    %c3_96 = arith.constant 3 : index
    %101 = vector.load %arg6[%c0_95, %c11, %c3_96] : memref<2x22x128xf32, #tpu.memory_space<vmem>>, vector<1x1x16xf32>
    %102 = vector.shape_cast %101 : vector<1x1x16xf32> to vector<1x16xf32>
    %103 = vector.shape_cast %100 : vector<1x16xf32> to vector<1x1x16xf32>
    tpu.vector_store %arg6[%c0_95, %c11, %c3_96], %103 {strides = array<i32>} : memref<2x22x128xf32, #tpu.memory_space<vmem>>, vector<1x1x16xf32>,
    %c0_97 = arith.constant 0 : index
    %c128_98 = arith.constant 128 : index
    %104 = vector.load %arg5[%c0_97, %c128_98] : memref<1x256xf32, #tpu.memory_space<vmem>>, vector<1x16xf32>
    %c1_99 = arith.constant 1 : index
    %c11_100 = arith.constant 11 : index
    %c3_101 = arith.constant 3 : index
    %105 = vector.load %arg6[%c1_99, %c11_100, %c3_101] : memref<2x22x128xf32, #tpu.memory_space<vmem>>, vector<1x1x16xf32>
    %106 = vector.shape_cast %105 : vector<1x1x16xf32> to vector<1x16xf32>
    %107 = vector.shape_cast %104 : vector<1x16xf32> to vector<1x1x16xf32>
    tpu.vector_store %arg6[%c1_99, %c11_100, %c3_101], %107 {strides = array<i32>} : memref<2x22x128xf32, #tpu.memory_space<vmem>>, vector<1x1x16xf32>,
    %c0_102 = arith.constant 0 : index
    %c144 = arith.constant 144 : index
    %108 = vector.load %arg4[%c0_102, %c144] : memref<1x256xf32, #tpu.memory_space<vmem>>, vector<1x16xf32>
    %cst_103 = arith.constant 2.500000e-01 : f32
    %109 = vector.broadcast %cst_103 : f32 to vector<1x16xf32>
    %110 = arith.mulf %108, %109 : vector<1x16xf32>
    %c0_104 = arith.constant 0 : index
    %c12 = arith.constant 12 : index
    %c3_105 = arith.constant 3 : index
    %111 = vector.load %arg6[%c0_104, %c12, %c3_105] : memref<2x22x128xf32, #tpu.memory_space<vmem>>, vector<1x1x16xf32>
    %112 = vector.shape_cast %111 : vector<1x1x16xf32> to vector<1x16xf32>
    %113 = vector.shape_cast %110 : vector<1x16xf32> to vector<1x1x16xf32>
    tpu.vector_store %arg6[%c0_104, %c12, %c3_105], %113 {strides = array<i32>} : memref<2x22x128xf32, #tpu.memory_space<vmem>>, vector<1x1x16xf32>,
    %c0_106 = arith.constant 0 : index
    %c144_107 = arith.constant 144 : index
    %114 = vector.load %arg5[%c0_106, %c144_107] : memref<1x256xf32, #tpu.memory_space<vmem>>, vector<1x16xf32>
    %c1_108 = arith.constant 1 : index
    %c12_109 = arith.constant 12 : index
    %c3_110 = arith.constant 3 : index
    %115 = vector.load %arg6[%c1_108, %c12_109, %c3_110] : memref<2x22x128xf32, #tpu.memory_space<vmem>>, vector<1x1x16xf32>
    %116 = vector.shape_cast %115 : vector<1x1x16xf32> to vector<1x16xf32>
    %117 = vector.shape_cast %114 : vector<1x16xf32> to vector<1x1x16xf32>
    tpu.vector_store %arg6[%c1_108, %c12_109, %c3_110], %117 {strides = array<i32>} : memref<2x22x128xf32, #tpu.memory_space<vmem>>, vector<1x1x16xf32>,
    %c0_111 = arith.constant 0 : index
    %c160 = arith.constant 160 : index
    %118 = vector.load %arg4[%c0_111, %c160] : memref<1x256xf32, #tpu.memory_space<vmem>>, vector<1x16xf32>
    %cst_112 = arith.constant 2.500000e-01 : f32
    %119 = vector.broadcast %cst_112 : f32 to vector<1x16xf32>
    %120 = arith.mulf %118, %119 : vector<1x16xf32>
    %c0_113 = arith.constant 0 : index
    %c13 = arith.constant 13 : index
    %c3_114 = arith.constant 3 : index
    %121 = vector.load %arg6[%c0_113, %c13, %c3_114] : memref<2x22x128xf32, #tpu.memory_space<vmem>>, vector<1x1x16xf32>
    %122 = vector.shape_cast %121 : vector<1x1x16xf32> to vector<1x16xf32>
    %123 = vector.shape_cast %120 : vector<1x16xf32> to vector<1x1x16xf32>
    tpu.vector_store %arg6[%c0_113, %c13, %c3_114], %123 {strides = array<i32>} : memref<2x22x128xf32, #tpu.memory_space<vmem>>, vector<1x1x16xf32>,
    %c0_115 = arith.constant 0 : index
    %c160_116 = arith.constant 160 : index
    %124 = vector.load %arg5[%c0_115, %c160_116] : memref<1x256xf32, #tpu.memory_space<vmem>>, vector<1x16xf32>
    %c1_117 = arith.constant 1 : index
    %c13_118 = arith.constant 13 : index
    %c3_119 = arith.constant 3 : index
    %125 = vector.load %arg6[%c1_117, %c13_118, %c3_119] : memref<2x22x128xf32, #tpu.memory_space<vmem>>, vector<1x1x16xf32>
    %126 = vector.shape_cast %125 : vector<1x1x16xf32> to vector<1x16xf32>
    %127 = vector.shape_cast %124 : vector<1x16xf32> to vector<1x1x16xf32>
    tpu.vector_store %arg6[%c1_117, %c13_118, %c3_119], %127 {strides = array<i32>} : memref<2x22x128xf32, #tpu.memory_space<vmem>>, vector<1x1x16xf32>,
    %c0_120 = arith.constant 0 : index
    %c176 = arith.constant 176 : index
    %128 = vector.load %arg4[%c0_120, %c176] : memref<1x256xf32, #tpu.memory_space<vmem>>, vector<1x16xf32>
    %cst_121 = arith.constant 2.500000e-01 : f32
    %129 = vector.broadcast %cst_121 : f32 to vector<1x16xf32>
    %130 = arith.mulf %128, %129 : vector<1x16xf32>
    %c0_122 = arith.constant 0 : index
    %c14 = arith.constant 14 : index
    %c3_123 = arith.constant 3 : index
    %131 = vector.load %arg6[%c0_122, %c14, %c3_123] : memref<2x22x128xf32, #tpu.memory_space<vmem>>, vector<1x1x16xf32>
    %132 = vector.shape_cast %131 : vector<1x1x16xf32> to vector<1x16xf32>
    %133 = vector.shape_cast %130 : vector<1x16xf32> to vector<1x1x16xf32>
    tpu.vector_store %arg6[%c0_122, %c14, %c3_123], %133 {strides = array<i32>} : memref<2x22x128xf32, #tpu.memory_space<vmem>>, vector<1x1x16xf32>,
    %c0_124 = arith.constant 0 : index
    %c176_125 = arith.constant 176 : index
    %134 = vector.load %arg5[%c0_124, %c176_125] : memref<1x256xf32, #tpu.memory_space<vmem>>, vector<1x16xf32>
    %c1_126 = arith.constant 1 : index
    %c14_127 = arith.constant 14 : index
    %c3_128 = arith.constant 3 : index
    %135 = vector.load %arg6[%c1_126, %c14_127, %c3_128] : memref<2x22x128xf32, #tpu.memory_space<vmem>>, vector<1x1x16xf32>
    %136 = vector.shape_cast %135 : vector<1x1x16xf32> to vector<1x16xf32>
    %137 = vector.shape_cast %134 : vector<1x16xf32> to vector<1x1x16xf32>
    tpu.vector_store %arg6[%c1_126, %c14_127, %c3_128], %137 {strides = array<i32>} : memref<2x22x128xf32, #tpu.memory_space<vmem>>, vector<1x1x16xf32>,
    %c0_129 = arith.constant 0 : index
    %c192 = arith.constant 192 : index
    %138 = vector.load %arg4[%c0_129, %c192] : memref<1x256xf32, #tpu.memory_space<vmem>>, vector<1x16xf32>
    %cst_130 = arith.constant 2.500000e-01 : f32
    %139 = vector.broadcast %cst_130 : f32 to vector<1x16xf32>
    %140 = arith.mulf %138, %139 : vector<1x16xf32>
    %c0_131 = arith.constant 0 : index
    %c15 = arith.constant 15 : index
    %c3_132 = arith.constant 3 : index
    %141 = vector.load %arg6[%c0_131, %c15, %c3_132] : memref<2x22x128xf32, #tpu.memory_space<vmem>>, vector<1x1x16xf32>
    %142 = vector.shape_cast %141 : vector<1x1x16xf32> to vector<1x16xf32>
    %143 = vector.shape_cast %140 : vector<1x16xf32> to vector<1x1x16xf32>
    tpu.vector_store %arg6[%c0_131, %c15, %c3_132], %143 {strides = array<i32>} : memref<2x22x128xf32, #tpu.memory_space<vmem>>, vector<1x1x16xf32>,
    %c0_133 = arith.constant 0 : index
    %c192_134 = arith.constant 192 : index
    %144 = vector.load %arg5[%c0_133, %c192_134] : memref<1x256xf32, #tpu.memory_space<vmem>>, vector<1x16xf32>
    %c1_135 = arith.constant 1 : index
    %c15_136 = arith.constant 15 : index
    %c3_137 = arith.constant 3 : index
    %145 = vector.load %arg6[%c1_135, %c15_136, %c3_137] : memref<2x22x128xf32, #tpu.memory_space<vmem>>, vector<1x1x16xf32>
    %146 = vector.shape_cast %145 : vector<1x1x16xf32> to vector<1x16xf32>
    %147 = vector.shape_cast %144 : vector<1x16xf32> to vector<1x1x16xf32>
    tpu.vector_store %arg6[%c1_135, %c15_136, %c3_137], %147 {strides = array<i32>} : memref<2x22x128xf32, #tpu.memory_space<vmem>>, vector<1x1x16xf32>,
    %c0_138 = arith.constant 0 : index
    %c208 = arith.constant 208 : index
    %148 = vector.load %arg4[%c0_138, %c208] : memref<1x256xf32, #tpu.memory_space<vmem>>, vector<1x16xf32>
    %cst_139 = arith.constant 2.500000e-01 : f32
    %149 = vector.broadcast %cst_139 : f32 to vector<1x16xf32>
    %150 = arith.mulf %148, %149 : vector<1x16xf32>
    %c0_140 = arith.constant 0 : index
    %c16_141 = arith.constant 16 : index
    %c3_142 = arith.constant 3 : index
    %151 = vector.load %arg6[%c0_140, %c16_141, %c3_142] : memref<2x22x128xf32, #tpu.memory_space<vmem>>, vector<1x1x16xf32>
    %152 = vector.shape_cast %151 : vector<1x1x16xf32> to vector<1x16xf32>
    %153 = vector.shape_cast %150 : vector<1x16xf32> to vector<1x1x16xf32>
    tpu.vector_store %arg6[%c0_140, %c16_141, %c3_142], %153 {strides = array<i32>} : memref<2x22x128xf32, #tpu.memory_space<vmem>>, vector<1x1x16xf32>,
    %c0_143 = arith.constant 0 : index
    %c208_144 = arith.constant 208 : index
    %154 = vector.load %arg5[%c0_143, %c208_144] : memref<1x256xf32, #tpu.memory_space<vmem>>, vector<1x16xf32>
    %c1_145 = arith.constant 1 : index
    %c16_146 = arith.constant 16 : index
    %c3_147 = arith.constant 3 : index
    %155 = vector.load %arg6[%c1_145, %c16_146, %c3_147] : memref<2x22x128xf32, #tpu.memory_space<vmem>>, vector<1x1x16xf32>
    %156 = vector.shape_cast %155 : vector<1x1x16xf32> to vector<1x16xf32>
    %157 = vector.shape_cast %154 : vector<1x16xf32> to vector<1x1x16xf32>
    tpu.vector_store %arg6[%c1_145, %c16_146, %c3_147], %157 {strides = array<i32>} : memref<2x22x128xf32, #tpu.memory_space<vmem>>, vector<1x1x16xf32>,
    %c0_148 = arith.constant 0 : index
    %c224 = arith.constant 224 : index
    %158 = vector.load %arg4[%c0_148, %c224] : memref<1x256xf32, #tpu.memory_space<vmem>>, vector<1x16xf32>
    %cst_149 = arith.constant 2.500000e-01 : f32
    %159 = vector.broadcast %cst_149 : f32 to vector<1x16xf32>
    %160 = arith.mulf %158, %159 : vector<1x16xf32>
    %c0_150 = arith.constant 0 : index
    %c17 = arith.constant 17 : index
    %c3_151 = arith.constant 3 : index
    %161 = vector.load %arg6[%c0_150, %c17, %c3_151] : memref<2x22x128xf32, #tpu.memory_space<vmem>>, vector<1x1x16xf32>
    %162 = vector.shape_cast %161 : vector<1x1x16xf32> to vector<1x16xf32>
    %163 = vector.shape_cast %160 : vector<1x16xf32> to vector<1x1x16xf32>
    tpu.vector_store %arg6[%c0_150, %c17, %c3_151], %163 {strides = array<i32>} : memref<2x22x128xf32, #tpu.memory_space<vmem>>, vector<1x1x16xf32>,
    %c0_152 = arith.constant 0 : index
    %c224_153 = arith.constant 224 : index
    %164 = vector.load %arg5[%c0_152, %c224_153] : memref<1x256xf32, #tpu.memory_space<vmem>>, vector<1x16xf32>
    %c1_154 = arith.constant 1 : index
    %c17_155 = arith.constant 17 : index
    %c3_156 = arith.constant 3 : index
    %165 = vector.load %arg6[%c1_154, %c17_155, %c3_156] : memref<2x22x128xf32, #tpu.memory_space<vmem>>, vector<1x1x16xf32>
    %166 = vector.shape_cast %165 : vector<1x1x16xf32> to vector<1x16xf32>
    %167 = vector.shape_cast %164 : vector<1x16xf32> to vector<1x1x16xf32>
    tpu.vector_store %arg6[%c1_154, %c17_155, %c3_156], %167 {strides = array<i32>} : memref<2x22x128xf32, #tpu.memory_space<vmem>>, vector<1x1x16xf32>,
    %c0_157 = arith.constant 0 : index
    %c240 = arith.constant 240 : index
    %168 = vector.load %arg4[%c0_157, %c240] : memref<1x256xf32, #tpu.memory_space<vmem>>, vector<1x16xf32>
    %cst_158 = arith.constant 2.500000e-01 : f32
    %169 = vector.broadcast %cst_158 : f32 to vector<1x16xf32>
    %170 = arith.mulf %168, %169 : vector<1x16xf32>
    %c0_159 = arith.constant 0 : index
    %c18 = arith.constant 18 : index
    %c3_160 = arith.constant 3 : index
    %171 = vector.load %arg6[%c0_159, %c18, %c3_160] : memref<2x22x128xf32, #tpu.memory_space<vmem>>, vector<1x1x16xf32>
    %172 = vector.shape_cast %171 : vector<1x1x16xf32> to vector<1x16xf32>
    %173 = vector.shape_cast %170 : vector<1x16xf32> to vector<1x1x16xf32>
    tpu.vector_store %arg6[%c0_159, %c18, %c3_160], %173 {strides = array<i32>} : memref<2x22x128xf32, #tpu.memory_space<vmem>>, vector<1x1x16xf32>,
    %c0_161 = arith.constant 0 : index
    %c240_162 = arith.constant 240 : index
    %174 = vector.load %arg5[%c0_161, %c240_162] : memref<1x256xf32, #tpu.memory_space<vmem>>, vector<1x16xf32>
    %c1_163 = arith.constant 1 : index
    %c18_164 = arith.constant 18 : index
    %c3_165 = arith.constant 3 : index
    %175 = vector.load %arg6[%c1_163, %c18_164, %c3_165] : memref<2x22x128xf32, #tpu.memory_space<vmem>>, vector<1x1x16xf32>
    %176 = vector.shape_cast %175 : vector<1x1x16xf32> to vector<1x16xf32>
    %177 = vector.shape_cast %174 : vector<1x16xf32> to vector<1x1x16xf32>
    tpu.vector_store %arg6[%c1_163, %c18_164, %c3_165], %177 {strides = array<i32>} : memref<2x22x128xf32, #tpu.memory_space<vmem>>, vector<1x1x16xf32>,
    %c0_166 = arith.constant 0 : index
    %178 = memref.load %arg1[%c0_166] : memref<98xf32, #tpu.memory_space<smem>>
    %c1_167 = arith.constant 1 : index
    %179 = memref.load %arg1[%c1_167] : memref<98xf32, #tpu.memory_space<smem>>
    %c2 = arith.constant 2 : index
    %180 = memref.load %arg1[%c2] : memref<98xf32, #tpu.memory_space<smem>>
    %c3_168 = arith.constant 3 : index
    %181 = memref.load %arg1[%c3_168] : memref<98xf32, #tpu.memory_space<smem>>
    %c4_169 = arith.constant 4 : index
    %182 = memref.load %arg1[%c4_169] : memref<98xf32, #tpu.memory_space<smem>>
    %c5_170 = arith.constant 5 : index
    %183 = memref.load %arg1[%c5_170] : memref<98xf32, #tpu.memory_space<smem>>
    %c6_171 = arith.constant 6 : index
    %184 = memref.load %arg1[%c6_171] : memref<98xf32, #tpu.memory_space<smem>>
    %c7_172 = arith.constant 7 : index
    %185 = memref.load %arg1[%c7_172] : memref<98xf32, #tpu.memory_space<smem>>
    %c8_173 = arith.constant 8 : index
    %186 = memref.load %arg1[%c8_173] : memref<98xf32, #tpu.memory_space<smem>>
    %c9_174 = arith.constant 9 : index
    %187 = memref.load %arg1[%c9_174] : memref<98xf32, #tpu.memory_space<smem>>
    %c10_175 = arith.constant 10 : index
    %188 = memref.load %arg1[%c10_175] : memref<98xf32, #tpu.memory_space<smem>>
    %c11_176 = arith.constant 11 : index
    %189 = memref.load %arg1[%c11_176] : memref<98xf32, #tpu.memory_space<smem>>
    %c12_177 = arith.constant 12 : index
    %190 = memref.load %arg1[%c12_177] : memref<98xf32, #tpu.memory_space<smem>>
    %c13_178 = arith.constant 13 : index
    %191 = memref.load %arg1[%c13_178] : memref<98xf32, #tpu.memory_space<smem>>
    %c14_179 = arith.constant 14 : index
    %192 = memref.load %arg1[%c14_179] : memref<98xf32, #tpu.memory_space<smem>>
    %c15_180 = arith.constant 15 : index
    %193 = memref.load %arg1[%c15_180] : memref<98xf32, #tpu.memory_space<smem>>
    %c16_181 = arith.constant 16 : index
    %194 = memref.load %arg1[%c16_181] : memref<98xf32, #tpu.memory_space<smem>>
    %c17_182 = arith.constant 17 : index
    %195 = memref.load %arg1[%c17_182] : memref<98xf32, #tpu.memory_space<smem>>
    %c18_183 = arith.constant 18 : index
    %196 = memref.load %arg1[%c18_183] : memref<98xf32, #tpu.memory_space<smem>>
    %c19 = arith.constant 19 : index
    %197 = memref.load %arg1[%c19] : memref<98xf32, #tpu.memory_space<smem>>
    %c20 = arith.constant 20 : index
    %198 = memref.load %arg1[%c20] : memref<98xf32, #tpu.memory_space<smem>>
    %c21 = arith.constant 21 : index
    %199 = memref.load %arg1[%c21] : memref<98xf32, #tpu.memory_space<smem>>
    %c22 = arith.constant 22 : index
    %200 = memref.load %arg1[%c22] : memref<98xf32, #tpu.memory_space<smem>>
    %c23 = arith.constant 23 : index
    %201 = memref.load %arg1[%c23] : memref<98xf32, #tpu.memory_space<smem>>
    %c24 = arith.constant 24 : index
    %202 = memref.load %arg1[%c24] : memref<98xf32, #tpu.memory_space<smem>>
    %c25 = arith.constant 25 : index
    %203 = memref.load %arg1[%c25] : memref<98xf32, #tpu.memory_space<smem>>
    %c26 = arith.constant 26 : index
    %204 = memref.load %arg1[%c26] : memref<98xf32, #tpu.memory_space<smem>>
    %c27 = arith.constant 27 : index
    %205 = memref.load %arg1[%c27] : memref<98xf32, #tpu.memory_space<smem>>
    %c28 = arith.constant 28 : index
    %206 = memref.load %arg1[%c28] : memref<98xf32, #tpu.memory_space<smem>>
    %c29 = arith.constant 29 : index
    %207 = memref.load %arg1[%c29] : memref<98xf32, #tpu.memory_space<smem>>
    %c30 = arith.constant 30 : index
    %208 = memref.load %arg1[%c30] : memref<98xf32, #tpu.memory_space<smem>>
    %c31 = arith.constant 31 : index
    %209 = memref.load %arg1[%c31] : memref<98xf32, #tpu.memory_space<smem>>
    %c32_184 = arith.constant 32 : index
    %210 = memref.load %arg1[%c32_184] : memref<98xf32, #tpu.memory_space<smem>>
    %c33 = arith.constant 33 : index
    %211 = memref.load %arg1[%c33] : memref<98xf32, #tpu.memory_space<smem>>
    %c34 = arith.constant 34 : index
    %212 = memref.load %arg1[%c34] : memref<98xf32, #tpu.memory_space<smem>>
    %c35 = arith.constant 35 : index
    %213 = memref.load %arg1[%c35] : memref<98xf32, #tpu.memory_space<smem>>
    %c36 = arith.constant 36 : index
    %214 = memref.load %arg1[%c36] : memref<98xf32, #tpu.memory_space<smem>>
    %c37 = arith.constant 37 : index
    %215 = memref.load %arg1[%c37] : memref<98xf32, #tpu.memory_space<smem>>
    %c38 = arith.constant 38 : index
    %216 = memref.load %arg1[%c38] : memref<98xf32, #tpu.memory_space<smem>>
    %c39 = arith.constant 39 : index
    %217 = memref.load %arg1[%c39] : memref<98xf32, #tpu.memory_space<smem>>
    %c40 = arith.constant 40 : index
    %218 = memref.load %arg1[%c40] : memref<98xf32, #tpu.memory_space<smem>>
    %c41 = arith.constant 41 : index
    %219 = memref.load %arg1[%c41] : memref<98xf32, #tpu.memory_space<smem>>
    %c42 = arith.constant 42 : index
    %220 = memref.load %arg1[%c42] : memref<98xf32, #tpu.memory_space<smem>>
    %c43 = arith.constant 43 : index
    %221 = memref.load %arg1[%c43] : memref<98xf32, #tpu.memory_space<smem>>
    %c44 = arith.constant 44 : index
    %222 = memref.load %arg1[%c44] : memref<98xf32, #tpu.memory_space<smem>>
    %c45 = arith.constant 45 : index
    %223 = memref.load %arg1[%c45] : memref<98xf32, #tpu.memory_space<smem>>
    %c46 = arith.constant 46 : index
    %224 = memref.load %arg1[%c46] : memref<98xf32, #tpu.memory_space<smem>>
    %c47 = arith.constant 47 : index
    %225 = memref.load %arg1[%c47] : memref<98xf32, #tpu.memory_space<smem>>
    %c48_185 = arith.constant 48 : index
    %226 = memref.load %arg1[%c48_185] : memref<98xf32, #tpu.memory_space<smem>>
    %c49 = arith.constant 49 : index
    %227 = memref.load %arg1[%c49] : memref<98xf32, #tpu.memory_space<smem>>
    %c50 = arith.constant 50 : index
    %228 = memref.load %arg1[%c50] : memref<98xf32, #tpu.memory_space<smem>>
    %c51 = arith.constant 51 : index
    %229 = memref.load %arg1[%c51] : memref<98xf32, #tpu.memory_space<smem>>
    %c52 = arith.constant 52 : index
    %230 = memref.load %arg1[%c52] : memref<98xf32, #tpu.memory_space<smem>>
    %c53 = arith.constant 53 : index
    %231 = memref.load %arg1[%c53] : memref<98xf32, #tpu.memory_space<smem>>
    %c54 = arith.constant 54 : index
    %232 = memref.load %arg1[%c54] : memref<98xf32, #tpu.memory_space<smem>>
    %c55 = arith.constant 55 : index
    %233 = memref.load %arg1[%c55] : memref<98xf32, #tpu.memory_space<smem>>
    %c56 = arith.constant 56 : index
    %234 = memref.load %arg1[%c56] : memref<98xf32, #tpu.memory_space<smem>>
    %c57 = arith.constant 57 : index
    %235 = memref.load %arg1[%c57] : memref<98xf32, #tpu.memory_space<smem>>
    %c58 = arith.constant 58 : index
    %236 = memref.load %arg1[%c58] : memref<98xf32, #tpu.memory_space<smem>>
    %c59 = arith.constant 59 : index
    %237 = memref.load %arg1[%c59] : memref<98xf32, #tpu.memory_space<smem>>
    %c60 = arith.constant 60 : index
    %238 = memref.load %arg1[%c60] : memref<98xf32, #tpu.memory_space<smem>>
    %c61 = arith.constant 61 : index
    %239 = memref.load %arg1[%c61] : memref<98xf32, #tpu.memory_space<smem>>
    %c62 = arith.constant 62 : index
    %240 = memref.load %arg1[%c62] : memref<98xf32, #tpu.memory_space<smem>>
    %c63 = arith.constant 63 : index
    %241 = memref.load %arg1[%c63] : memref<98xf32, #tpu.memory_space<smem>>
    %c64_186 = arith.constant 64 : index
    %242 = memref.load %arg1[%c64_186] : memref<98xf32, #tpu.memory_space<smem>>
    %c65 = arith.constant 65 : index
    %243 = memref.load %arg1[%c65] : memref<98xf32, #tpu.memory_space<smem>>
    %c66 = arith.constant 66 : index
    %244 = memref.load %arg1[%c66] : memref<98xf32, #tpu.memory_space<smem>>
    %c67 = arith.constant 67 : index
    %245 = memref.load %arg1[%c67] : memref<98xf32, #tpu.memory_space<smem>>
    %c68 = arith.constant 68 : index
    %246 = memref.load %arg1[%c68] : memref<98xf32, #tpu.memory_space<smem>>
    %c69 = arith.constant 69 : index
    %247 = memref.load %arg1[%c69] : memref<98xf32, #tpu.memory_space<smem>>
    %c70 = arith.constant 70 : index
    %248 = memref.load %arg1[%c70] : memref<98xf32, #tpu.memory_space<smem>>
    %c71 = arith.constant 71 : index
    %249 = memref.load %arg1[%c71] : memref<98xf32, #tpu.memory_space<smem>>
    %c72 = arith.constant 72 : index
    %250 = memref.load %arg1[%c72] : memref<98xf32, #tpu.memory_space<smem>>
    %c73 = arith.constant 73 : index
    %251 = memref.load %arg1[%c73] : memref<98xf32, #tpu.memory_space<smem>>
    %c74 = arith.constant 74 : index
    %252 = memref.load %arg1[%c74] : memref<98xf32, #tpu.memory_space<smem>>
    %c75 = arith.constant 75 : index
    %253 = memref.load %arg1[%c75] : memref<98xf32, #tpu.memory_space<smem>>
    %c76 = arith.constant 76 : index
    %254 = memref.load %arg1[%c76] : memref<98xf32, #tpu.memory_space<smem>>
    %c77 = arith.constant 77 : index
    %255 = memref.load %arg1[%c77] : memref<98xf32, #tpu.memory_space<smem>>
    %c78 = arith.constant 78 : index
    %256 = memref.load %arg1[%c78] : memref<98xf32, #tpu.memory_space<smem>>
    %c79 = arith.constant 79 : index
    %257 = memref.load %arg1[%c79] : memref<98xf32, #tpu.memory_space<smem>>
    %c80_187 = arith.constant 80 : index
    %258 = memref.load %arg1[%c80_187] : memref<98xf32, #tpu.memory_space<smem>>
    %c81 = arith.constant 81 : index
    %259 = memref.load %arg1[%c81] : memref<98xf32, #tpu.memory_space<smem>>
    %c82 = arith.constant 82 : index
    %260 = memref.load %arg1[%c82] : memref<98xf32, #tpu.memory_space<smem>>
    %c83 = arith.constant 83 : index
    %261 = memref.load %arg1[%c83] : memref<98xf32, #tpu.memory_space<smem>>
    %c84 = arith.constant 84 : index
    %262 = memref.load %arg1[%c84] : memref<98xf32, #tpu.memory_space<smem>>
    %c85 = arith.constant 85 : index
    %263 = memref.load %arg1[%c85] : memref<98xf32, #tpu.memory_space<smem>>
    %c86 = arith.constant 86 : index
    %264 = memref.load %arg1[%c86] : memref<98xf32, #tpu.memory_space<smem>>
    %c87 = arith.constant 87 : index
    %265 = memref.load %arg1[%c87] : memref<98xf32, #tpu.memory_space<smem>>
    %c88 = arith.constant 88 : index
    %266 = memref.load %arg1[%c88] : memref<98xf32, #tpu.memory_space<smem>>
    %c89 = arith.constant 89 : index
    %267 = memref.load %arg1[%c89] : memref<98xf32, #tpu.memory_space<smem>>
    %c90 = arith.constant 90 : index
    %268 = memref.load %arg1[%c90] : memref<98xf32, #tpu.memory_space<smem>>
    %c91 = arith.constant 91 : index
    %269 = memref.load %arg1[%c91] : memref<98xf32, #tpu.memory_space<smem>>
    %c92 = arith.constant 92 : index
    %270 = memref.load %arg1[%c92] : memref<98xf32, #tpu.memory_space<smem>>
    %c93 = arith.constant 93 : index
    %271 = memref.load %arg1[%c93] : memref<98xf32, #tpu.memory_space<smem>>
    %c94 = arith.constant 94 : index
    %272 = memref.load %arg1[%c94] : memref<98xf32, #tpu.memory_space<smem>>
    %c95 = arith.constant 95 : index
    %273 = memref.load %arg1[%c95] : memref<98xf32, #tpu.memory_space<smem>>
    %c96_188 = arith.constant 96 : index
    %274 = memref.load %arg1[%c96_188] : memref<98xf32, #tpu.memory_space<smem>>
    %c97 = arith.constant 97 : index
    %275 = memref.load %arg1[%c97] : memref<98xf32, #tpu.memory_space<smem>>
    %c0_189 = arith.constant 0 : index
    %c0_190 = arith.constant 0 : index
    %c0_191 = arith.constant 0 : index
    %276 = vector.load %arg6[%c0_189, %c0_190, %c0_191] : memref<2x22x128xf32, #tpu.memory_space<vmem>>, vector<1x22x128xf32>
    %277 = vector.shape_cast %276 : vector<1x22x128xf32> to vector<22x128xf32>
    %278 = vector.extract_strided_slice %277 {offsets = [0, 0], sizes = [22, 16], strides = [1, 1]} : vector<22x128xf32> to vector<22x16xf32>
    %279 = vector.extract_strided_slice %277 {offsets = [0, 1], sizes = [22, 16], strides = [1, 1]} : vector<22x128xf32> to vector<22x16xf32>
    %280 = vector.extract_strided_slice %277 {offsets = [0, 2], sizes = [22, 16], strides = [1, 1]} : vector<22x128xf32> to vector<22x16xf32>
    %281 = vector.extract_strided_slice %277 {offsets = [0, 3], sizes = [22, 16], strides = [1, 1]} : vector<22x128xf32> to vector<22x16xf32>
    %282 = vector.extract_strided_slice %277 {offsets = [0, 4], sizes = [22, 16], strides = [1, 1]} : vector<22x128xf32> to vector<22x16xf32>
    %283 = vector.extract_strided_slice %277 {offsets = [0, 5], sizes = [22, 16], strides = [1, 1]} : vector<22x128xf32> to vector<22x16xf32>
    %284 = vector.extract_strided_slice %277 {offsets = [0, 6], sizes = [22, 16], strides = [1, 1]} : vector<22x128xf32> to vector<22x16xf32>
    %c1_192 = arith.constant 1 : index
    %c0_193 = arith.constant 0 : index
    %c0_194 = arith.constant 0 : index
    %285 = vector.load %arg6[%c1_192, %c0_193, %c0_194] : memref<2x22x128xf32, #tpu.memory_space<vmem>>, vector<1x22x128xf32>
    %286 = vector.shape_cast %285 : vector<1x22x128xf32> to vector<22x128xf32>
    %287 = vector.extract_strided_slice %286 {offsets = [0, 0], sizes = [22, 16], strides = [1, 1]} : vector<22x128xf32> to vector<22x16xf32>
    %288 = vector.extract_strided_slice %286 {offsets = [0, 1], sizes = [22, 16], strides = [1, 1]} : vector<22x128xf32> to vector<22x16xf32>
    %289 = vector.extract_strided_slice %286 {offsets = [0, 2], sizes = [22, 16], strides = [1, 1]} : vector<22x128xf32> to vector<22x16xf32>
    %290 = vector.extract_strided_slice %286 {offsets = [0, 3], sizes = [22, 16], strides = [1, 1]} : vector<22x128xf32> to vector<22x16xf32>
    %291 = vector.extract_strided_slice %286 {offsets = [0, 4], sizes = [22, 16], strides = [1, 1]} : vector<22x128xf32> to vector<22x16xf32>
    %292 = vector.extract_strided_slice %286 {offsets = [0, 5], sizes = [22, 16], strides = [1, 1]} : vector<22x128xf32> to vector<22x16xf32>
    %293 = vector.extract_strided_slice %286 {offsets = [0, 6], sizes = [22, 16], strides = [1, 1]} : vector<22x128xf32> to vector<22x16xf32>
    %294 = vector.broadcast %178 : f32 to vector<22x16xf32>
    %295 = arith.mulf %294, %278 : vector<22x16xf32>
    %296 = vector.broadcast %179 : f32 to vector<22x16xf32>
    %297 = arith.mulf %296, %279 : vector<22x16xf32>
    %298 = arith.addf %295, %297 : vector<22x16xf32>
    %299 = vector.broadcast %180 : f32 to vector<22x16xf32>
    %300 = arith.mulf %299, %280 : vector<22x16xf32>
    %301 = arith.addf %298, %300 : vector<22x16xf32>
    %302 = vector.broadcast %181 : f32 to vector<22x16xf32>
    %303 = arith.mulf %302, %281 : vector<22x16xf32>
    %304 = arith.addf %301, %303 : vector<22x16xf32>
    %305 = vector.broadcast %182 : f32 to vector<22x16xf32>
    %306 = arith.mulf %305, %282 : vector<22x16xf32>
    %307 = arith.addf %304, %306 : vector<22x16xf32>
    %308 = vector.broadcast %183 : f32 to vector<22x16xf32>
    %309 = arith.mulf %308, %283 : vector<22x16xf32>
    %310 = arith.addf %307, %309 : vector<22x16xf32>
    %311 = vector.broadcast %184 : f32 to vector<22x16xf32>
    %312 = arith.mulf %311, %284 : vector<22x16xf32>
    %313 = arith.addf %310, %312 : vector<22x16xf32>
    %314 = vector.broadcast %227 : f32 to vector<22x16xf32>
    %315 = arith.mulf %314, %287 : vector<22x16xf32>
    %316 = arith.addf %313, %315 : vector<22x16xf32>
    %317 = vector.broadcast %228 : f32 to vector<22x16xf32>
    %318 = arith.mulf %317, %288 : vector<22x16xf32>
    %319 = arith.addf %316, %318 : vector<22x16xf32>
    %320 = vector.broadcast %229 : f32 to vector<22x16xf32>
    %321 = arith.mulf %320, %289 : vector<22x16xf32>
    %322 = arith.addf %319, %321 : vector<22x16xf32>
    %323 = vector.broadcast %230 : f32 to vector<22x16xf32>
    %324 = arith.mulf %323, %290 : vector<22x16xf32>
    %325 = arith.addf %322, %324 : vector<22x16xf32>
    %326 = vector.broadcast %231 : f32 to vector<22x16xf32>
    %327 = arith.mulf %326, %291 : vector<22x16xf32>
    %328 = arith.addf %325, %327 : vector<22x16xf32>
    %329 = vector.broadcast %232 : f32 to vector<22x16xf32>
    %330 = arith.mulf %329, %292 : vector<22x16xf32>
    %331 = arith.addf %328, %330 : vector<22x16xf32>
    %332 = vector.broadcast %233 : f32 to vector<22x16xf32>
    %333 = arith.mulf %332, %293 : vector<22x16xf32>
    %334 = arith.addf %331, %333 : vector<22x16xf32>
    %335 = vector.extract_strided_slice %334 {offsets = [0, 0], sizes = [16, 16], strides = [1, 1]} : vector<22x16xf32> to vector<16x16xf32>
    %336 = vector.broadcast %185 : f32 to vector<22x16xf32>
    %337 = arith.mulf %336, %278 : vector<22x16xf32>
    %338 = vector.broadcast %186 : f32 to vector<22x16xf32>
    %339 = arith.mulf %338, %279 : vector<22x16xf32>
    %340 = arith.addf %337, %339 : vector<22x16xf32>
    %341 = vector.broadcast %187 : f32 to vector<22x16xf32>
    %342 = arith.mulf %341, %280 : vector<22x16xf32>
    %343 = arith.addf %340, %342 : vector<22x16xf32>
    %344 = vector.broadcast %188 : f32 to vector<22x16xf32>
    %345 = arith.mulf %344, %281 : vector<22x16xf32>
    %346 = arith.addf %343, %345 : vector<22x16xf32>
    %347 = vector.broadcast %189 : f32 to vector<22x16xf32>
    %348 = arith.mulf %347, %282 : vector<22x16xf32>
    %349 = arith.addf %346, %348 : vector<22x16xf32>
    %350 = vector.broadcast %190 : f32 to vector<22x16xf32>
    %351 = arith.mulf %350, %283 : vector<22x16xf32>
    %352 = arith.addf %349, %351 : vector<22x16xf32>
    %353 = vector.broadcast %191 : f32 to vector<22x16xf32>
    %354 = arith.mulf %353, %284 : vector<22x16xf32>
    %355 = arith.addf %352, %354 : vector<22x16xf32>
    %356 = vector.broadcast %234 : f32 to vector<22x16xf32>
    %357 = arith.mulf %356, %287 : vector<22x16xf32>
    %358 = arith.addf %355, %357 : vector<22x16xf32>
    %359 = vector.broadcast %235 : f32 to vector<22x16xf32>
    %360 = arith.mulf %359, %288 : vector<22x16xf32>
    %361 = arith.addf %358, %360 : vector<22x16xf32>
    %362 = vector.broadcast %236 : f32 to vector<22x16xf32>
    %363 = arith.mulf %362, %289 : vector<22x16xf32>
    %364 = arith.addf %361, %363 : vector<22x16xf32>
    %365 = vector.broadcast %237 : f32 to vector<22x16xf32>
    %366 = arith.mulf %365, %290 : vector<22x16xf32>
    %367 = arith.addf %364, %366 : vector<22x16xf32>
    %368 = vector.broadcast %238 : f32 to vector<22x16xf32>
    %369 = arith.mulf %368, %291 : vector<22x16xf32>
    %370 = arith.addf %367, %369 : vector<22x16xf32>
    %371 = vector.broadcast %239 : f32 to vector<22x16xf32>
    %372 = arith.mulf %371, %292 : vector<22x16xf32>
    %373 = arith.addf %370, %372 : vector<22x16xf32>
    %374 = vector.broadcast %240 : f32 to vector<22x16xf32>
    %375 = arith.mulf %374, %293 : vector<22x16xf32>
    %376 = arith.addf %373, %375 : vector<22x16xf32>
    %377 = vector.extract_strided_slice %376 {offsets = [1, 0], sizes = [16, 16], strides = [1, 1]} : vector<22x16xf32> to vector<16x16xf32>
    %378 = arith.addf %335, %377 : vector<16x16xf32>
    %379 = vector.broadcast %192 : f32 to vector<22x16xf32>
    %380 = arith.mulf %379, %278 : vector<22x16xf32>
    %381 = vector.broadcast %193 : f32 to vector<22x16xf32>
    %382 = arith.mulf %381, %279 : vector<22x16xf32>
    %383 = arith.addf %380, %382 : vector<22x16xf32>
    %384 = vector.broadcast %194 : f32 to vector<22x16xf32>
    %385 = arith.mulf %384, %280 : vector<22x16xf32>
    %386 = arith.addf %383, %385 : vector<22x16xf32>
    %387 = vector.broadcast %195 : f32 to vector<22x16xf32>
    %388 = arith.mulf %387, %281 : vector<22x16xf32>
    %389 = arith.addf %386, %388 : vector<22x16xf32>
    %390 = vector.broadcast %196 : f32 to vector<22x16xf32>
    %391 = arith.mulf %390, %282 : vector<22x16xf32>
    %392 = arith.addf %389, %391 : vector<22x16xf32>
    %393 = vector.broadcast %197 : f32 to vector<22x16xf32>
    %394 = arith.mulf %393, %283 : vector<22x16xf32>
    %395 = arith.addf %392, %394 : vector<22x16xf32>
    %396 = vector.broadcast %198 : f32 to vector<22x16xf32>
    %397 = arith.mulf %396, %284 : vector<22x16xf32>
    %398 = arith.addf %395, %397 : vector<22x16xf32>
    %399 = vector.broadcast %241 : f32 to vector<22x16xf32>
    %400 = arith.mulf %399, %287 : vector<22x16xf32>
    %401 = arith.addf %398, %400 : vector<22x16xf32>
    %402 = vector.broadcast %242 : f32 to vector<22x16xf32>
    %403 = arith.mulf %402, %288 : vector<22x16xf32>
    %404 = arith.addf %401, %403 : vector<22x16xf32>
    %405 = vector.broadcast %243 : f32 to vector<22x16xf32>
    %406 = arith.mulf %405, %289 : vector<22x16xf32>
    %407 = arith.addf %404, %406 : vector<22x16xf32>
    %408 = vector.broadcast %244 : f32 to vector<22x16xf32>
    %409 = arith.mulf %408, %290 : vector<22x16xf32>
    %410 = arith.addf %407, %409 : vector<22x16xf32>
    %411 = vector.broadcast %245 : f32 to vector<22x16xf32>
    %412 = arith.mulf %411, %291 : vector<22x16xf32>
    %413 = arith.addf %410, %412 : vector<22x16xf32>
    %414 = vector.broadcast %246 : f32 to vector<22x16xf32>
    %415 = arith.mulf %414, %292 : vector<22x16xf32>
    %416 = arith.addf %413, %415 : vector<22x16xf32>
    %417 = vector.broadcast %247 : f32 to vector<22x16xf32>
    %418 = arith.mulf %417, %293 : vector<22x16xf32>
    %419 = arith.addf %416, %418 : vector<22x16xf32>
    %420 = vector.extract_strided_slice %419 {offsets = [2, 0], sizes = [16, 16], strides = [1, 1]} : vector<22x16xf32> to vector<16x16xf32>
    %421 = arith.addf %378, %420 : vector<16x16xf32>
    %422 = vector.broadcast %199 : f32 to vector<22x16xf32>
    %423 = arith.mulf %422, %278 : vector<22x16xf32>
    %424 = vector.broadcast %200 : f32 to vector<22x16xf32>
    %425 = arith.mulf %424, %279 : vector<22x16xf32>
    %426 = arith.addf %423, %425 : vector<22x16xf32>
    %427 = vector.broadcast %201 : f32 to vector<22x16xf32>
    %428 = arith.mulf %427, %280 : vector<22x16xf32>
    %429 = arith.addf %426, %428 : vector<22x16xf32>
    %430 = vector.broadcast %202 : f32 to vector<22x16xf32>
    %431 = arith.mulf %430, %281 : vector<22x16xf32>
    %432 = arith.addf %429, %431 : vector<22x16xf32>
    %433 = vector.broadcast %203 : f32 to vector<22x16xf32>
    %434 = arith.mulf %433, %282 : vector<22x16xf32>
    %435 = arith.addf %432, %434 : vector<22x16xf32>
    %436 = vector.broadcast %204 : f32 to vector<22x16xf32>
    %437 = arith.mulf %436, %283 : vector<22x16xf32>
    %438 = arith.addf %435, %437 : vector<22x16xf32>
    %439 = vector.broadcast %205 : f32 to vector<22x16xf32>
    %440 = arith.mulf %439, %284 : vector<22x16xf32>
    %441 = arith.addf %438, %440 : vector<22x16xf32>
    %442 = vector.broadcast %248 : f32 to vector<22x16xf32>
    %443 = arith.mulf %442, %287 : vector<22x16xf32>
    %444 = arith.addf %441, %443 : vector<22x16xf32>
    %445 = vector.broadcast %249 : f32 to vector<22x16xf32>
    %446 = arith.mulf %445, %288 : vector<22x16xf32>
    %447 = arith.addf %444, %446 : vector<22x16xf32>
    %448 = vector.broadcast %250 : f32 to vector<22x16xf32>
    %449 = arith.mulf %448, %289 : vector<22x16xf32>
    %450 = arith.addf %447, %449 : vector<22x16xf32>
    %451 = vector.broadcast %251 : f32 to vector<22x16xf32>
    %452 = arith.mulf %451, %290 : vector<22x16xf32>
    %453 = arith.addf %450, %452 : vector<22x16xf32>
    %454 = vector.broadcast %252 : f32 to vector<22x16xf32>
    %455 = arith.mulf %454, %291 : vector<22x16xf32>
    %456 = arith.addf %453, %455 : vector<22x16xf32>
    %457 = vector.broadcast %253 : f32 to vector<22x16xf32>
    %458 = arith.mulf %457, %292 : vector<22x16xf32>
    %459 = arith.addf %456, %458 : vector<22x16xf32>
    %460 = vector.broadcast %254 : f32 to vector<22x16xf32>
    %461 = arith.mulf %460, %293 : vector<22x16xf32>
    %462 = arith.addf %459, %461 : vector<22x16xf32>
    %463 = vector.extract_strided_slice %462 {offsets = [3, 0], sizes = [16, 16], strides = [1, 1]} : vector<22x16xf32> to vector<16x16xf32>
    %464 = arith.addf %421, %463 : vector<16x16xf32>
    %465 = vector.broadcast %206 : f32 to vector<22x16xf32>
    %466 = arith.mulf %465, %278 : vector<22x16xf32>
    %467 = vector.broadcast %207 : f32 to vector<22x16xf32>
    %468 = arith.mulf %467, %279 : vector<22x16xf32>
    %469 = arith.addf %466, %468 : vector<22x16xf32>
    %470 = vector.broadcast %208 : f32 to vector<22x16xf32>
    %471 = arith.mulf %470, %280 : vector<22x16xf32>
    %472 = arith.addf %469, %471 : vector<22x16xf32>
    %473 = vector.broadcast %209 : f32 to vector<22x16xf32>
    %474 = arith.mulf %473, %281 : vector<22x16xf32>
    %475 = arith.addf %472, %474 : vector<22x16xf32>
    %476 = vector.broadcast %210 : f32 to vector<22x16xf32>
    %477 = arith.mulf %476, %282 : vector<22x16xf32>
    %478 = arith.addf %475, %477 : vector<22x16xf32>
    %479 = vector.broadcast %211 : f32 to vector<22x16xf32>
    %480 = arith.mulf %479, %283 : vector<22x16xf32>
    %481 = arith.addf %478, %480 : vector<22x16xf32>
    %482 = vector.broadcast %212 : f32 to vector<22x16xf32>
    %483 = arith.mulf %482, %284 : vector<22x16xf32>
    %484 = arith.addf %481, %483 : vector<22x16xf32>
    %485 = vector.broadcast %255 : f32 to vector<22x16xf32>
    %486 = arith.mulf %485, %287 : vector<22x16xf32>
    %487 = arith.addf %484, %486 : vector<22x16xf32>
    %488 = vector.broadcast %256 : f32 to vector<22x16xf32>
    %489 = arith.mulf %488, %288 : vector<22x16xf32>
    %490 = arith.addf %487, %489 : vector<22x16xf32>
    %491 = vector.broadcast %257 : f32 to vector<22x16xf32>
    %492 = arith.mulf %491, %289 : vector<22x16xf32>
    %493 = arith.addf %490, %492 : vector<22x16xf32>
    %494 = vector.broadcast %258 : f32 to vector<22x16xf32>
    %495 = arith.mulf %494, %290 : vector<22x16xf32>
    %496 = arith.addf %493, %495 : vector<22x16xf32>
    %497 = vector.broadcast %259 : f32 to vector<22x16xf32>
    %498 = arith.mulf %497, %291 : vector<22x16xf32>
    %499 = arith.addf %496, %498 : vector<22x16xf32>
    %500 = vector.broadcast %260 : f32 to vector<22x16xf32>
    %501 = arith.mulf %500, %292 : vector<22x16xf32>
    %502 = arith.addf %499, %501 : vector<22x16xf32>
    %503 = vector.broadcast %261 : f32 to vector<22x16xf32>
    %504 = arith.mulf %503, %293 : vector<22x16xf32>
    %505 = arith.addf %502, %504 : vector<22x16xf32>
    %506 = vector.extract_strided_slice %505 {offsets = [4, 0], sizes = [16, 16], strides = [1, 1]} : vector<22x16xf32> to vector<16x16xf32>
    %507 = arith.addf %464, %506 : vector<16x16xf32>
    %508 = vector.broadcast %213 : f32 to vector<22x16xf32>
    %509 = arith.mulf %508, %278 : vector<22x16xf32>
    %510 = vector.broadcast %214 : f32 to vector<22x16xf32>
    %511 = arith.mulf %510, %279 : vector<22x16xf32>
    %512 = arith.addf %509, %511 : vector<22x16xf32>
    %513 = vector.broadcast %215 : f32 to vector<22x16xf32>
    %514 = arith.mulf %513, %280 : vector<22x16xf32>
    %515 = arith.addf %512, %514 : vector<22x16xf32>
    %516 = vector.broadcast %216 : f32 to vector<22x16xf32>
    %517 = arith.mulf %516, %281 : vector<22x16xf32>
    %518 = arith.addf %515, %517 : vector<22x16xf32>
    %519 = vector.broadcast %217 : f32 to vector<22x16xf32>
    %520 = arith.mulf %519, %282 : vector<22x16xf32>
    %521 = arith.addf %518, %520 : vector<22x16xf32>
    %522 = vector.broadcast %218 : f32 to vector<22x16xf32>
    %523 = arith.mulf %522, %283 : vector<22x16xf32>
    %524 = arith.addf %521, %523 : vector<22x16xf32>
    %525 = vector.broadcast %219 : f32 to vector<22x16xf32>
    %526 = arith.mulf %525, %284 : vector<22x16xf32>
    %527 = arith.addf %524, %526 : vector<22x16xf32>
    %528 = vector.broadcast %262 : f32 to vector<22x16xf32>
    %529 = arith.mulf %528, %287 : vector<22x16xf32>
    %530 = arith.addf %527, %529 : vector<22x16xf32>
    %531 = vector.broadcast %263 : f32 to vector<22x16xf32>
    %532 = arith.mulf %531, %288 : vector<22x16xf32>
    %533 = arith.addf %530, %532 : vector<22x16xf32>
    %534 = vector.broadcast %264 : f32 to vector<22x16xf32>
    %535 = arith.mulf %534, %289 : vector<22x16xf32>
    %536 = arith.addf %533, %535 : vector<22x16xf32>
    %537 = vector.broadcast %265 : f32 to vector<22x16xf32>
    %538 = arith.mulf %537, %290 : vector<22x16xf32>
    %539 = arith.addf %536, %538 : vector<22x16xf32>
    %540 = vector.broadcast %266 : f32 to vector<22x16xf32>
    %541 = arith.mulf %540, %291 : vector<22x16xf32>
    %542 = arith.addf %539, %541 : vector<22x16xf32>
    %543 = vector.broadcast %267 : f32 to vector<22x16xf32>
    %544 = arith.mulf %543, %292 : vector<22x16xf32>
    %545 = arith.addf %542, %544 : vector<22x16xf32>
    %546 = vector.broadcast %268 : f32 to vector<22x16xf32>
    %547 = arith.mulf %546, %293 : vector<22x16xf32>
    %548 = arith.addf %545, %547 : vector<22x16xf32>
    %549 = vector.extract_strided_slice %548 {offsets = [5, 0], sizes = [16, 16], strides = [1, 1]} : vector<22x16xf32> to vector<16x16xf32>
    %550 = arith.addf %507, %549 : vector<16x16xf32>
    %551 = vector.broadcast %220 : f32 to vector<22x16xf32>
    %552 = arith.mulf %551, %278 : vector<22x16xf32>
    %553 = vector.broadcast %221 : f32 to vector<22x16xf32>
    %554 = arith.mulf %553, %279 : vector<22x16xf32>
    %555 = arith.addf %552, %554 : vector<22x16xf32>
    %556 = vector.broadcast %222 : f32 to vector<22x16xf32>
    %557 = arith.mulf %556, %280 : vector<22x16xf32>
    %558 = arith.addf %555, %557 : vector<22x16xf32>
    %559 = vector.broadcast %223 : f32 to vector<22x16xf32>
    %560 = arith.mulf %559, %281 : vector<22x16xf32>
    %561 = arith.addf %558, %560 : vector<22x16xf32>
    %562 = vector.broadcast %224 : f32 to vector<22x16xf32>
    %563 = arith.mulf %562, %282 : vector<22x16xf32>
    %564 = arith.addf %561, %563 : vector<22x16xf32>
    %565 = vector.broadcast %225 : f32 to vector<22x16xf32>
    %566 = arith.mulf %565, %283 : vector<22x16xf32>
    %567 = arith.addf %564, %566 : vector<22x16xf32>
    %568 = vector.broadcast %226 : f32 to vector<22x16xf32>
    %569 = arith.mulf %568, %284 : vector<22x16xf32>
    %570 = arith.addf %567, %569 : vector<22x16xf32>
    %571 = vector.broadcast %269 : f32 to vector<22x16xf32>
    %572 = arith.mulf %571, %287 : vector<22x16xf32>
    %573 = arith.addf %570, %572 : vector<22x16xf32>
    %574 = vector.broadcast %270 : f32 to vector<22x16xf32>
    %575 = arith.mulf %574, %288 : vector<22x16xf32>
    %576 = arith.addf %573, %575 : vector<22x16xf32>
    %577 = vector.broadcast %271 : f32 to vector<22x16xf32>
    %578 = arith.mulf %577, %289 : vector<22x16xf32>
    %579 = arith.addf %576, %578 : vector<22x16xf32>
    %580 = vector.broadcast %272 : f32 to vector<22x16xf32>
    %581 = arith.mulf %580, %290 : vector<22x16xf32>
    %582 = arith.addf %579, %581 : vector<22x16xf32>
    %583 = vector.broadcast %273 : f32 to vector<22x16xf32>
    %584 = arith.mulf %583, %291 : vector<22x16xf32>
    %585 = arith.addf %582, %584 : vector<22x16xf32>
    %586 = vector.broadcast %274 : f32 to vector<22x16xf32>
    %587 = arith.mulf %586, %292 : vector<22x16xf32>
    %588 = arith.addf %585, %587 : vector<22x16xf32>
    %589 = vector.broadcast %275 : f32 to vector<22x16xf32>
    %590 = arith.mulf %589, %293 : vector<22x16xf32>
    %591 = arith.addf %588, %590 : vector<22x16xf32>
    %592 = vector.extract_strided_slice %591 {offsets = [6, 0], sizes = [16, 16], strides = [1, 1]} : vector<22x16xf32> to vector<16x16xf32>
    %593 = arith.addf %550, %592 : vector<16x16xf32>
    %594 = arith.negf %593 : vector<16x16xf32>
    %595 = math.exp %594 : vector<16x16xf32>
    %cst_195 = arith.constant 1.000000e+00 : f32
    %596 = vector.broadcast %cst_195 : f32 to vector<16x16xf32>
    %597 = arith.addf %596, %595 : vector<16x16xf32>
    %598 = arith.divf %596, %597 : vector<16x16xf32>
    %599 = vector.extract_strided_slice %598 {offsets = [0, 0], sizes = [1, 16], strides = [1, 1]} : vector<16x16xf32> to vector<1x16xf32>
    %c0_196 = arith.constant 0 : index
    %c0_197 = arith.constant 0 : index
    %600 = vector.load %arg7[%c0_196, %c0_197] : memref<1x256xf32, #tpu.memory_space<vmem>>, vector<1x16xf32>
    tpu.vector_store %arg7[%c0_196, %c0_197], %599 {strides = array<i32>} : memref<1x256xf32, #tpu.memory_space<vmem>>, vector<1x16xf32>,
    %601 = vector.extract_strided_slice %598 {offsets = [1, 0], sizes = [1, 16], strides = [1, 1]} : vector<16x16xf32> to vector<1x16xf32>
    %c0_198 = arith.constant 0 : index
    %c16_199 = arith.constant 16 : index
    %602 = vector.load %arg7[%c0_198, %c16_199] : memref<1x256xf32, #tpu.memory_space<vmem>>, vector<1x16xf32>
    tpu.vector_store %arg7[%c0_198, %c16_199], %601 {strides = array<i32>} : memref<1x256xf32, #tpu.memory_space<vmem>>, vector<1x16xf32>,
    %603 = vector.extract_strided_slice %598 {offsets = [2, 0], sizes = [1, 16], strides = [1, 1]} : vector<16x16xf32> to vector<1x16xf32>
    %c0_200 = arith.constant 0 : index
    %c32_201 = arith.constant 32 : index
    %604 = vector.load %arg7[%c0_200, %c32_201] : memref<1x256xf32, #tpu.memory_space<vmem>>, vector<1x16xf32>
    tpu.vector_store %arg7[%c0_200, %c32_201], %603 {strides = array<i32>} : memref<1x256xf32, #tpu.memory_space<vmem>>, vector<1x16xf32>,
    %605 = vector.extract_strided_slice %598 {offsets = [3, 0], sizes = [1, 16], strides = [1, 1]} : vector<16x16xf32> to vector<1x16xf32>
    %c0_202 = arith.constant 0 : index
    %c48_203 = arith.constant 48 : index
    %606 = vector.load %arg7[%c0_202, %c48_203] : memref<1x256xf32, #tpu.memory_space<vmem>>, vector<1x16xf32>
    tpu.vector_store %arg7[%c0_202, %c48_203], %605 {strides = array<i32>} : memref<1x256xf32, #tpu.memory_space<vmem>>, vector<1x16xf32>,
    %607 = vector.extract_strided_slice %598 {offsets = [4, 0], sizes = [1, 16], strides = [1, 1]} : vector<16x16xf32> to vector<1x16xf32>
    %c0_204 = arith.constant 0 : index
    %c64_205 = arith.constant 64 : index
    %608 = vector.load %arg7[%c0_204, %c64_205] : memref<1x256xf32, #tpu.memory_space<vmem>>, vector<1x16xf32>
    tpu.vector_store %arg7[%c0_204, %c64_205], %607 {strides = array<i32>} : memref<1x256xf32, #tpu.memory_space<vmem>>, vector<1x16xf32>,
    %609 = vector.extract_strided_slice %598 {offsets = [5, 0], sizes = [1, 16], strides = [1, 1]} : vector<16x16xf32> to vector<1x16xf32>
    %c0_206 = arith.constant 0 : index
    %c80_207 = arith.constant 80 : index
    %610 = vector.load %arg7[%c0_206, %c80_207] : memref<1x256xf32, #tpu.memory_space<vmem>>, vector<1x16xf32>
    tpu.vector_store %arg7[%c0_206, %c80_207], %609 {strides = array<i32>} : memref<1x256xf32, #tpu.memory_space<vmem>>, vector<1x16xf32>,
    %611 = vector.extract_strided_slice %598 {offsets = [6, 0], sizes = [1, 16], strides = [1, 1]} : vector<16x16xf32> to vector<1x16xf32>
    %c0_208 = arith.constant 0 : index
    %c96_209 = arith.constant 96 : index
    %612 = vector.load %arg7[%c0_208, %c96_209] : memref<1x256xf32, #tpu.memory_space<vmem>>, vector<1x16xf32>
    tpu.vector_store %arg7[%c0_208, %c96_209], %611 {strides = array<i32>} : memref<1x256xf32, #tpu.memory_space<vmem>>, vector<1x16xf32>,
    %613 = vector.extract_strided_slice %598 {offsets = [7, 0], sizes = [1, 16], strides = [1, 1]} : vector<16x16xf32> to vector<1x16xf32>
    %c0_210 = arith.constant 0 : index
    %c112_211 = arith.constant 112 : index
    %614 = vector.load %arg7[%c0_210, %c112_211] : memref<1x256xf32, #tpu.memory_space<vmem>>, vector<1x16xf32>
    tpu.vector_store %arg7[%c0_210, %c112_211], %613 {strides = array<i32>} : memref<1x256xf32, #tpu.memory_space<vmem>>, vector<1x16xf32>,
    %615 = vector.extract_strided_slice %598 {offsets = [8, 0], sizes = [1, 16], strides = [1, 1]} : vector<16x16xf32> to vector<1x16xf32>
    %c0_212 = arith.constant 0 : index
    %c128_213 = arith.constant 128 : index
    %616 = vector.load %arg7[%c0_212, %c128_213] : memref<1x256xf32, #tpu.memory_space<vmem>>, vector<1x16xf32>
    tpu.vector_store %arg7[%c0_212, %c128_213], %615 {strides = array<i32>} : memref<1x256xf32, #tpu.memory_space<vmem>>, vector<1x16xf32>,
    %617 = vector.extract_strided_slice %598 {offsets = [9, 0], sizes = [1, 16], strides = [1, 1]} : vector<16x16xf32> to vector<1x16xf32>
    %c0_214 = arith.constant 0 : index
    %c144_215 = arith.constant 144 : index
    %618 = vector.load %arg7[%c0_214, %c144_215] : memref<1x256xf32, #tpu.memory_space<vmem>>, vector<1x16xf32>
    tpu.vector_store %arg7[%c0_214, %c144_215], %617 {strides = array<i32>} : memref<1x256xf32, #tpu.memory_space<vmem>>, vector<1x16xf32>,
    %619 = vector.extract_strided_slice %598 {offsets = [10, 0], sizes = [1, 16], strides = [1, 1]} : vector<16x16xf32> to vector<1x16xf32>
    %c0_216 = arith.constant 0 : index
    %c160_217 = arith.constant 160 : index
    %620 = vector.load %arg7[%c0_216, %c160_217] : memref<1x256xf32, #tpu.memory_space<vmem>>, vector<1x16xf32>
    tpu.vector_store %arg7[%c0_216, %c160_217], %619 {strides = array<i32>} : memref<1x256xf32, #tpu.memory_space<vmem>>, vector<1x16xf32>,
    %621 = vector.extract_strided_slice %598 {offsets = [11, 0], sizes = [1, 16], strides = [1, 1]} : vector<16x16xf32> to vector<1x16xf32>
    %c0_218 = arith.constant 0 : index
    %c176_219 = arith.constant 176 : index
    %622 = vector.load %arg7[%c0_218, %c176_219] : memref<1x256xf32, #tpu.memory_space<vmem>>, vector<1x16xf32>
    tpu.vector_store %arg7[%c0_218, %c176_219], %621 {strides = array<i32>} : memref<1x256xf32, #tpu.memory_space<vmem>>, vector<1x16xf32>,
    %623 = vector.extract_strided_slice %598 {offsets = [12, 0], sizes = [1, 16], strides = [1, 1]} : vector<16x16xf32> to vector<1x16xf32>
    %c0_220 = arith.constant 0 : index
    %c192_221 = arith.constant 192 : index
    %624 = vector.load %arg7[%c0_220, %c192_221] : memref<1x256xf32, #tpu.memory_space<vmem>>, vector<1x16xf32>
    tpu.vector_store %arg7[%c0_220, %c192_221], %623 {strides = array<i32>} : memref<1x256xf32, #tpu.memory_space<vmem>>, vector<1x16xf32>,
    %625 = vector.extract_strided_slice %598 {offsets = [13, 0], sizes = [1, 16], strides = [1, 1]} : vector<16x16xf32> to vector<1x16xf32>
    %c0_222 = arith.constant 0 : index
    %c208_223 = arith.constant 208 : index
    %626 = vector.load %arg7[%c0_222, %c208_223] : memref<1x256xf32, #tpu.memory_space<vmem>>, vector<1x16xf32>
    tpu.vector_store %arg7[%c0_222, %c208_223], %625 {strides = array<i32>} : memref<1x256xf32, #tpu.memory_space<vmem>>, vector<1x16xf32>,
    %627 = vector.extract_strided_slice %598 {offsets = [14, 0], sizes = [1, 16], strides = [1, 1]} : vector<16x16xf32> to vector<1x16xf32>
    %c0_224 = arith.constant 0 : index
    %c224_225 = arith.constant 224 : index
    %628 = vector.load %arg7[%c0_224, %c224_225] : memref<1x256xf32, #tpu.memory_space<vmem>>, vector<1x16xf32>
    tpu.vector_store %arg7[%c0_224, %c224_225], %627 {strides = array<i32>} : memref<1x256xf32, #tpu.memory_space<vmem>>, vector<1x16xf32>,
    %629 = vector.extract_strided_slice %598 {offsets = [15, 0], sizes = [1, 16], strides = [1, 1]} : vector<16x16xf32> to vector<1x16xf32>
    %c0_226 = arith.constant 0 : index
    %c240_227 = arith.constant 240 : index
    %630 = vector.load %arg7[%c0_226, %c240_227] : memref<1x256xf32, #tpu.memory_space<vmem>>, vector<1x16xf32>
    tpu.vector_store %arg7[%c0_226, %c240_227], %629 {strides = array<i32>} : memref<1x256xf32, #tpu.memory_space<vmem>>, vector<1x16xf32>,
    %c0_228 = arith.constant 0 : index
    %c0_229 = arith.constant 0 : index
    %631 = vector.load %arg7[%c0_228, %c0_229] : memref<1x256xf32, #tpu.memory_space<vmem>>, vector<1x256xf32>
    %c0_230 = arith.constant 0 : index
    %c0_231 = arith.constant 0 : index
    %c0_232 = arith.constant 0 : index
    %632 = vector.load %arg2[%c0_230, %c0_231, %c0_232] : memref<1x4x256xf32, #tpu.memory_space<vmem>>, vector<1x4x256xf32>
    %633 = vector.shape_cast %632 : vector<1x4x256xf32> to vector<4x256xf32>
    %634 = vector.broadcast %631 : vector<1x256xf32> to vector<4x256xf32>
    %635 = arith.mulf %633, %634 : vector<4x256xf32>
    %c0_233 = arith.constant 0 : index
    %c0_234 = arith.constant 0 : index
    %c0_235 = arith.constant 0 : index
    %636 = vector.load %arg3[%c0_233, %c0_234, %c0_235] : memref<1x4x256xf32, #tpu.memory_space<vmem>>, vector<1x4x256xf32>
    %637 = vector.shape_cast %636 : vector<1x4x256xf32> to vector<4x256xf32>
    %638 = vector.shape_cast %635 : vector<4x256xf32> to vector<1x4x256xf32>
    tpu.vector_store %arg3[%c0_233, %c0_234, %c0_235], %638 {strides = array<i32>} : memref<1x4x256xf32, #tpu.memory_space<vmem>>, vector<1x4x256xf32>,
    return
  }
  func.func @transform_0(%arg0: i32) -> i32 {
    %c0_i32 = arith.constant 0 : i32
    %c0_i32_0 = arith.constant 0 : i32
    return %c0_i32 : i32
  }
  func.func @transform_1(%arg0: i32) -> (i32, i32, i32) {
    %c0_i32 = arith.constant 0 : i32
    %c0_i32_0 = arith.constant 0 : i32
    %c0_i32_1 = arith.constant 0 : i32
    return %arg0, %c0_i32, %c0_i32_0 : i32, i32, i32
  }
  func.func @transform_2(%arg0: i32) -> (i32, i32, i32) {
    %c0_i32 = arith.constant 0 : i32
    %c0_i32_0 = arith.constant 0 : i32
    %c0_i32_1 = arith.constant 0 : i32
    return %arg0, %c0_i32, %c0_i32_0 : i32, i32, i32
  }
}

</mosaic_0001>

<bundles_post_ra>
// kernel: tpu_custom_call.1
= control target key start
LH: loop header
LB: loop body
LE: loop exit
PB: predicated region body
PF: predicated region fallthrough
CT: control target
= control target key end

     0   :  { %s4277_s0 = inlined_call_operand.hbm [shape: f32[98], index: 0, kind: input, shape index: {}]   ;;  %s4278_s1 = inlined_call_operand.hbm [shape: f32[2,4,256], index: 1, kind: input, shape index: {}]   ;;  %s4279_s2 = inlined_call_operand.hbm [shape: f32[2,4,256], index: 2, kind: output, shape index: {}]  }
   0x1   :  { %4311 = sst [smem:[#allocation39_spill]] %s4277_s0 }
   0x2   :  { %4312 = sst [smem:[#allocation40_spill]] %s4278_s1 }
   0x3   :  { %7 = vsyncpa [#allocation9], 0 }
   0x4   :  { %8 = vsyncpa [#allocation7], 0 }
   0x5   :  { %10 = vsyncpa [#allocation7 + $0x1], 0 }
   0x6   :  { %11 = vsyncpa [#allocation8], 0 }
   0x7   :  { %13 = vsyncpa [#allocation8 + $0x1], 0  ;;  %s2926_s9 = smov 0   ;;  %s2928_s10 = smov 0  }
   0x8   :  { %s2930_s11 = smov 0   ;;  %s2932_s12 = smov 0  }
   0x9 LB: > { %4313 = sst [smem:[#allocation15_spill]] %s2877_s10  ;;  %s2947_s13 = sadd.s32 4294967295, %s2885_s12   ;;  %s2885_s12 = sphi %s2932_s12, %s4391_s12   ;;  %s2881_s11 = sphi %s2930_s11, %s4390_s11   ;;  %s2877_s10 = sphi %s2928_s10, %s4389_s10   ;;  %s2873_s9 = sphi %s2926_s9, %s4388_s9  }
   0xa   : > { %4314 = sst [smem:[#allocation16_spill]] %s2881_s11  ;;  %s2539_s14 = sadd.s32 4294967294, %s2885_s12  }
   0xb   : > { %p60_p0 = scmp.ne.s32.totalorder %s2877_s10, %s2873_s9  ;;  %p61_p1 = scmp.eq.s32.totalorder %s2947_s13, 0 }
   0xc   : > { %p84_p2 = scmp.eq.s32.totalorder %s2947_s13, 1  ;;  %p90_p3 = scmp.eq.s32.totalorder %s2539_s14, 1 }
   0xd   : > { %p2956_p4 = por %p61_p1, %p60_p0  ;;  %p2540_p5 = scmp.ge.s32.totalorder %s2885_s12, 1 }
   0xe   : > { %p2961_p6 = por %p90_p3, %p60_p0  ;;  %p97_p7 = scmp.lt.s32.totalorder %s2885_s12, 3 }
   0xf   : > { %s4317_s0 = sld [smem:[#allocation39_spill]]  ;;  %s2977_s21 = sadd.s32 1, %s2885_s12  }
  0x10   : > { %p2969_p8 = pnand %p2540_p5, %p97_p7  ;;  %s44_s22 = ssub.s32 %s2885_s12, %s2977_s21 }
  0x11   : > { %p45_p12 = scmp.eq.s32.totalorder %s44_s22, 0  ;;  %s47_s23 = sadd.s32 1, %s2881_s11 }
  0x12   : > { %p2664_p10 = pneg %p2969_p8  ;;  %p54_p13 = scmp.ne.s32.totalorder %s2881_s11, %s2877_s10 }
  0x13   : > { %s2887_s24 = smov [#allocation6]   ;;  %p55_p0 = scmp.eq.s32.totalorder %s2885_s12, 0 }
  0x14   : > { %p2665_p11 = pnand %p2664_p10, %p61_p1  ;;  %p2992_p3 = por %p84_p2, %p54_p13 }
  0x15   : > { %s109_s19 = sshll.u32 %s4317_s0, 4  ;;  %s120_s27 = sand.u32 1, %s2881_s11   ;;  %s110_s19 = int_to_ptr.hbm [resolvable:$true] %s109_s19 }
  0x16   : > { %2667 = dma.hbm_to_smem (!%p2665_p11), %s110_s19, 16, %s2887_s24, [#allocation9]  }
  0x17   : > { %s2987_s25 = scalar_select %p45_p12, %s2881_s11, %s47_s23  }
  0x18   : > { %p56_p5 = por %p55_p0, %p54_p13  ;;  %p2677_p7 = scmp.lt.s32.totalorder %s2885_s12, 2 }
  0x19   : > { %4319 = sst [smem:[#allocation17_spill]] %s2987_s25  ;;  %s2543_s28 = sshll.u32 %s120_s27, 3 }
  0x1a   : > { %s2654_s29 = sshll.u32 %s2885_s12, 3  ;;  %s4321_s1 = sld [smem:[#allocation40_spill]] }
  0x1b   : > { %s124_s6 = scalar_lea.vmem [#allocation10], %s2543_s28  ;;  %p3002_p10 = pnand %p2677_p7, %p56_p5 }
  0x1c   : > { %s133_s7 = sshll.u32 %s124_s6, 4  ;;  %s121_s14 = scalar_lea.sflag [#allocation7], %s120_s27  ;;  %s134_s7 = int_to_ptr.vmem [resolvable:$true] %s133_s7 }
  0x1d   : > { %p2789_p11 = pneg %p3002_p10 }
  0x20   : > { %s129_s4 = scalar_lea.hbm %s4321_s1, %s2654_s29  ;;  %s2792_s23 = scalar_lea.hbm %s4321_s1, 16 }
  0x21   : > { %s131_s5 = sshll.u32 %s129_s4, 4  ;;  %s132_s5 = int_to_ptr.hbm [resolvable:$true] %s131_s5 }
  0x22   : > { %s2785_s17 = sshra.s32 %s132_s5, 4  ;;  %s2786_s17 = int_to_ptr.hbm [resolvable:$true] %s2785_s17 }
  0x23   : > { %s2787_s18 = scalar_lea.hbm %s2786_s17, 8  ;;  %p2793_p0 = scmp.lt.s32.totalorder %s2786_s17, %s4321_s1 }
  0x24   : > { %p2788_p2 = scmp.ne.s32.totalorder %s2786_s17, %s2787_s18  ;;  %p2794_p5 = scmp.lt.s32.totalorder %s2792_s23, %s2787_s18 }
  0x26   : > { %p2790_p12 = pnand %p2789_p11, %p2788_p2  ;;  %p2795_p7 = por %p2794_p5, %p2793_p0 }
  0x28   : > { %p2791_p13 = pneg %p2790_p12 }
  0x2a   : > { %p2796_p9 = pnand %p2795_p7, %p2791_p13 }
  0x2c   : > { %2799 = shalt.err (!%p2796_p9)
}
  0x2d   : > { %2671 = dma.hbm_to_vmem [thread:$0]  (!%p3002_p10), %s132_s5, 128, %s134_s7, %s121_s14  }
  0x2e   : > { %142 = sbr.rel (%p2969_p8) target bundleno = 1261 (0x4ed), region = 28 }
  0x33   : > { %2860 = dma.done.wait (%p61_p1), [#allocation9], 16  }
  0x34   : > { %2862 = vsyncadd (%p61_p1), [#allocation9], 4294967280  ;;  %s3023_s27 = sand.u32 1, %s2877_s10  }
  0x35   : > { %s4280_s29 = sshll.u32 %s3023_s27, 3  ;;  %s150_s30 = scalar_lea.sflag [#allocation7], %s3023_s27 }
  0x36   : > { %s3029_s3 = scalar_lea.vmem [#allocation10], %s4280_s29 }
  0x37   : > { %2864 = dma.done.wait (%p2956_p4), %s150_s30, 128  }
  0x38   : > { %2866 = vsyncadd (%p2956_p4), %s150_s30, 4294967168 }
  0x39   : > { %159 = sfence }
  0x3a   : > { %v4295_v0 = vlaneseq  ;;  %v182_v1 = vld [vmem:[%s3029_s3] sm:$0xff]  ;;  %v2888_v3 = vmov 0.0   ;;  %vm190_vm1 = vcmask 1043456   ;;  %v2889_v12 = vmov -inf   ;;  %s2890_s15 = smov 115   ;;  %s2891_s20 = smov 3  }
  0x3b   : > { %185 = vst [vmem:[#allocation1] ss:$2 sm:$0xff] %v182_v1  ;;  %vm208_vm2 = vcmask 1040384   ;;  %s2892_s4 = smov 99   ;;  %s2893_s5 = smov 51   ;;  %vm253_vm3 = vcmask 147480  }
  0x3c   : > { %vm3037_vm0 = vcmp.lt.s32.totalorder %v4295_v0, 256  ;;  %240 = vst [vmem:[#allocation4] sm:$0xff] %v2888_v3  ;;  %s2894_s6 = smov 83   ;;  %s2895_s7 = smov 67   ;;  %vm998_vm4 = vcmask 1046528   ;;  %vm1250_vm5 = vcmask 1045504  }
  0x3d   : > { %180 = vst.msk [vmem:[#allocation2] sm:$0x3] %vm3037_vm0, %v2888_v3  ;;  %s2896_s8 = smov 35   ;;  %s2897_s14 = smov 19   ;;  %vm1502_vm6 = vcmask 1044480   ;;  %vm2005_vm7 = vcmask 1042432  }
  0x3e   : > { %241 = vst [vmem:[#allocation4 + $0x8] sm:$0xff] %v2888_v3  ;;  %s3093_s17 = sld [smem:[#allocation6 + $0x2]]  ;;  %s4287_s19 = smov 126   ;;  %vm2257_vm8 = vcmask 1041408  }
  0x3f   : > { %242 = vst [vmem:[#allocation4 + $0x10] sm:$0x3f] %v2888_v3  ;;  %s3095_s18 = sld [smem:[#allocation6 + $0x1]]  ;;  %s4289_s22 = smov 127  }
  0x40   : > { %243 = vst [vmem:[#allocation4 + $0x18] sm:$0xff] %v2888_v3  ;;  %s3126_s23 = sld [smem:[#allocation6 + $0x3]]  ;;  %s4325_s0 = smov 126  }
  0x41   : > { %244 = vst [vmem:[#allocation4 + $0x20] sm:$0xff] %v2888_v3  ;;  %s3129_s24 = sld [smem:[#allocation6 + $0x5]]  ;;  %s4326_s25 = smov 127  }
  0x42   : > { %v186_v4 = vld.sshfl [vmem:[#allocation1] sm:$0xff pattern:$0x75316420]  ;;  %v187_v5 = vld.sshfl [vmem:[#allocation1 + $0x8] sm:$0xff pattern:$0x75316420] }
  0x43   : > { %v191_v6 = vsel %vm190_vm1, %v186_v4, 0.0  ;;  %v198_v7 = vsel %vm190_vm1, %v187_v5, 0.0  ;;  %214 = vst [vmem:[#allocation1] ss:$2 sm:$0xff] %v182_v1  ;;  %s3131_s28 = sld [smem:[#allocation6]] }
  0x44   : > { %v192_v8 = vrot.slane %v191_v6, 4  ;;  %v199_v9 = vrot.slane %v198_v7, 4  ;;  %245 = vst [vmem:[#allocation4 + $0x28] sm:$0x3f] %v2888_v3  ;;  %v183_v29 = vld [vmem:[#allocation2] sm:$0x3] }
  0x45   : > { %181 = vst.msk [vmem:[#allocation3] sm:$0x3] %vm3037_vm0, %v2889_v12  ;;  %s3133_s30 = sld [smem:[#allocation6 + $0x4]] }
  0x46   : > { %v193_v10 = vadd.f32 %v192_v8, %v191_v6  ;;  %v200_v11 = vadd.f32 %v199_v9, %v198_v7  ;;  %s3196_s29 = sld [smem:[#allocation6 + $0x55]] }
  0x47   : > { %s2646_s1 = sld [smem:[#allocation6 + $0x61]] }
  0x48   : > { %v194_v13 = vrot.slane %v193_v10, 2  ;;  %v201_v14 = vrot.slane %v200_v11, 2  ;;  %s3247_s11 = sld [smem:[#allocation6 + $0x54]] }
  0x49   : > { %s3252_s10 = sld [smem:[#allocation6 + $0x33]] }
  0x4a   : > { %v195_v15 = vadd.f32 %v194_v13, %v193_v10  ;;  %v202_v16 = vadd.f32 %v201_v14, %v200_v11  ;;  %v215_v17 = vld.sshfl [vmem:[#allocation1] sm:$0xff pattern:$0x75316420]  ;;  %v216_v18 = vld.sshfl [vmem:[#allocation1 + $0x8] sm:$0xff pattern:$0x75316420] }
  0x4b   : > { %v219_v19 = vsel %vm190_vm1, %v215_v17, -inf  ;;  %v226_v20 = vsel %vm190_vm1, %v216_v18, -inf }
  0x4c   : > { %v196_v21 = vrot.slane %v195_v15, 1  ;;  %v203_v22 = vrot.slane %v202_v16, 1  ;;  %v220_v23 = vrot.slane %v219_v19, 4  ;;  %v227_v24 = vrot.slane %v226_v20, 4  ;;  %v213_v42 = vld [vmem:[#allocation3] sm:$0x3] }
  0x4e   : > { %v197_v25 = vadd.f32 %v196_v21, %v195_v15  ;;  %v204_v26 = vadd.f32 %v203_v22, %v202_v16  ;;  %v221_v27 = vmax.f32 %v219_v19, %v220_v23  ;;  %v228_v28 = vmax.f32 %v226_v20, %v227_v24 }
  0x50   : > { %v207_v30 = vrot.slane %v204_v26, 7  ;;  %v222_v31 = vrot.slane %v221_v27, 2  ;;  %v229_v32 = vrot.slane %v228_v28, 2 }
  0x52   : > { %v209_v33 = vsel %vm208_vm2, %v197_v25, %v207_v30  ;;  %v223_v34 = vmax.f32 %v221_v27, %v222_v31  ;;  %v230_v35 = vmax.f32 %v228_v28, %v229_v32 }
  0x53   : > { %v211_v36 = vadd.f32 %v209_v33, %v183_v29 }
  0x54   : > { %v224_v37 = vrot.slane %v223_v34, 1  ;;  %v231_v38 = vrot.slane %v230_v35, 1 }
  0x55   : > { %212 = vst.msk [vmem:[#allocation2] sm:$0x3] %vm3037_vm0, %v211_v36 }
  0x56   : > { %v225_v39 = vmax.f32 %v223_v34, %v224_v37  ;;  %v232_v40 = vmax.f32 %v230_v35, %v231_v38 }
  0x58   : > { %v235_v41 = vrot.slane %v232_v40, 7 }
  0x5a   : > { %v236_v43 = vsel %vm208_vm2, %v225_v39, %v235_v41 }
  0x5b   : > { %v238_v46 = vmax.f32 %v213_v42, %v236_v43 }
  0x5c   : > { %v263_v44 = vld [vmem:[#allocation2] sm:$0x1]  ;;  %v368_v62 = vld [vmem:[#allocation2 + $0x1] sm:$0x1] }
  0x5d   : > { %v246_v45 = vld [vmem:[#allocation2] sm:$0x1]  ;;  %v264_v47 = vmul.f32 0.25, %v263_v44  ;;  %239 = vst.msk [vmem:[#allocation3] sm:$0x3] %vm3037_vm0, %v238_v46  ;;  %v369_v2 = vmul.f32 0.25, %v368_v62 }
  0x5e   : > { %v247_v48 = vmul.f32 0.25, %v246_v45  ;;  %v323_v49 = vld [vmem:[#allocation2] sm:$0x1]  ;;  %v383_v17 = vld [vmem:[#allocation2 + $0x1] sm:$0x1] }
  0x5f   : > { %v293_v50 = vld [vmem:[#allocation2] sm:$0x1]  ;;  %v266_v51 = vperm.slane %v264_v47, 0  ;;  %v324_v55 = vmul.f32 0.25, %v323_v49  ;;  %v371_v6 = vperm.slane %v369_v2, 0  ;;  %v384_v19 = vmul.f32 0.25, %v383_v17 }
  0x60   : > { %v249_v52 = vperm.slane %v247_v48, 0  ;;  %v278_v53 = vld [vmem:[#allocation2] sm:$0x1]  ;;  %v294_v56 = vmul.f32 0.25, %v293_v50  ;;  %v398_v20 = vld [vmem:[#allocation2 + $0x1] sm:$0x1] }
  0x61   : > { %v279_v54 = vmul.f32 0.25, %v278_v53  ;;  %267 = vrot.lane.b32.xlu1 %v266_v51, %s2890_s15  ;;  %v308_v57 = vld [vmem:[#allocation2] sm:$0x1]  ;;  %v326_v60 = vperm.slane %v324_v55, 0  ;;  %v399_v21 = vmul.f32 0.25, %v398_v20  ;;  %v386_v23 = vperm.slane %v384_v19, 0 }
  0x62   : > { %250 = vrot.lane.b32.xlu0 %v249_v52, %s2891_s20  ;;  %v309_v59 = vmul.f32 0.25, %v308_v57  ;;  %v296_v61 = vperm.slane %v294_v56, 0  ;;  %v338_v63 = vld [vmem:[#allocation2] sm:$0x1]  ;;  %v413_v24 = vld [vmem:[#allocation2 + $0x1] sm:$0x1]  ;;  %v608_v55 = vstv %s3093_s17  ;;  %v595_v56 = vstv %s3095_s18 }
  0x63   : > { %v281_v58 = vperm.slane %v279_v54, 0  ;;  %v339_v3 = vmul.f32 0.25, %v338_v63  ;;  %v353_v4 = vld [vmem:[#allocation2] sm:$0x1]  ;;  %v401_v25 = vperm.slane %v399_v21, 0  ;;  %v414_v26 = vmul.f32 0.25, %v413_v24 }
  0x64   : > { %v311_v1 = vperm.slane %v309_v59, 0  ;;  %v354_v5 = vmul.f32 0.25, %v353_v4  ;;  %v2736_v9 = vld [vmem:[#allocation3] ss:$0 sm:$0xff]  ;;  %v2747_v18 = vld [vmem:[#allocation3 + $0x1] ss:$0 sm:$0xff]  ;;  %v621_v19 = vstv %s3126_s23  ;;  %v4298_v24 = vstv %s3131_s28 }
  0x65   : > { %282 = vrot.lane.b32.xlu2 %v281_v58, %s2892_s4  ;;  %v341_v7 = vperm.slane %v339_v3, 0  ;;  %v2737_v10 = vld [vmem:[#allocation3] ss:$0 sm:$0xff]  ;;  %v2742_v22 = vld [vmem:[#allocation3 + $0x1] ss:$0 sm:$0xff]  ;;  %v416_v27 = vperm.slane %v414_v26, 0  ;;  %v647_v26 = vstv %s3129_s24 }
  0x66   : > { %v356_v8 = vperm.slane %v354_v5, 0  ;;  %v2743_v11 = vld [vmem:[#allocation3] ss:$0 sm:$0xff]  ;;  %v2744_v28 = vld [vmem:[#allocation3 + $0x1] ss:$0 sm:$0xff]  ;;  %s2558_s17 = sld [smem:[#allocation6 + $0x9]] }
  0x67   : > { %v2738_v12 = vld [vmem:[#allocation3] ss:$0 sm:$0xff]  ;;  %v428_v29 = vld [vmem:[#allocation2 + $0x1] sm:$0x1]  ;;  %v2749_v30 = vld [vmem:[#allocation3 + $0x1] ss:$0 sm:$0xff] }
  0x68   : > { %v2739_v13 = vld [vmem:[#allocation3] ss:$0 sm:$0xff]  ;;  %v429_v31 = vmul.f32 0.25, %v428_v29  ;;  %v443_v32 = vld [vmem:[#allocation2 + $0x1] sm:$0x1]  ;;  %s4291_s18 = smov 122  }
  0x69   : > { %327 = vrot.lane.b32.xlu1 %v326_v60, %s2893_s5  ;;  %v2745_v14 = vld [vmem:[#allocation3] ss:$0 sm:$0xff]  ;;  %v444_v33 = vmul.f32 0.25, %v443_v32  ;;  %v2746_v34 = vld [vmem:[#allocation3 + $0x1] ss:$0 sm:$0xff]  ;;  %s3182_s23 = sld [smem:[#allocation6 + $0xa]] }
  0x6a   : > { %297 = vrot.lane.b32.xlu0 %v296_v61, %s2894_s6  ;;  %v2740_v15 = vld [vmem:[#allocation3] ss:$0 sm:$0xff]  ;;  %v431_v35 = vperm.slane %v429_v31, 0  ;;  %v458_v36 = vld [vmem:[#allocation2 + $0x1] sm:$0x1]  ;;  %s2619_s24 = sld [smem:[#allocation6 + $0x46]] }
  0x6b   : > { %v2741_v16 = vld [vmem:[#allocation3] ss:$0 sm:$0xff]  ;;  %v446_v37 = vperm.slane %v444_v33, 0  ;;  %v459_v38 = vmul.f32 0.25, %v458_v36  ;;  %v2748_v39 = vld [vmem:[#allocation3 + $0x1] ss:$0 sm:$0xff] }
  0x6c   : > { %v473_v41 = vld [vmem:[#allocation2 + $0x1] sm:$0x1]  ;;  %v2751_v42 = vld [vmem:[#allocation3 + $0x1] ss:$0 sm:$0xff] }
  0x6d   : > { %312 = vrot.lane.b32.xlu2 %v311_v1, %s2895_s7  ;;  %v461_v40 = vperm.slane %v459_v38, 0  ;;  %v474_v43 = vmul.f32 0.25, %v473_v41  ;;  %v2750_v45 = vld [vmem:[#allocation3 + $0x1] ss:$0 sm:$0xff] }
  0x6f   : > { %v476_v44 = vperm.slane %v474_v43, 0 }
  0x71   : > { %372 = vrot.lane.b32.xlu1 %v371_v6, %s2891_s20 }
  0x72   : > { %342 = vrot.lane.b32.xlu0 %v341_v7, %s2896_s8 }
  0x75   : > { %357 = vrot.lane.b32.xlu2 %v356_v8, %s2897_s14 }
  0x79   : > { %274 = vrot.lane.b32.xlu1 %v2736_v9, %s2890_s15 }
  0x7a   : > { %258 = vrot.lane.b32.xlu0 %v2737_v10, %s2891_s20 }
  0x7d   : > { %289 = vrot.lane.b32.xlu2 %v2743_v11, %s2892_s4 }
  0x81   : > { %304 = vrot.lane.b32.xlu1 %v2738_v12, %s2894_s6 }
  0x82   : > { %319 = vrot.lane.b32.xlu0 %v2739_v13, %s2895_s7 }
  0x85   : > { %334 = vrot.lane.b32.xlu2 %v2745_v14, %s2893_s5 }
  0x89   : > { %349 = vrot.lane.b32.xlu1 %v2740_v15, %s2896_s8 }
  0x8a   : > { %364 = vrot.lane.b32.xlu0 %v2741_v16, %s2897_s14 }
  0x8d   : > { %379 = vrot.lane.b32.xlu2 %v2747_v18, %s2891_s20  ;;  %s4285_s20 = smov 125  }
  0x91   : > { %394 = vrot.lane.b32.xlu1 %v2742_v22, %s2890_s15 }
  0x92   : > { %387 = vrot.lane.b32.xlu0 %v386_v23, %s2890_s15  ;;  %s3135_s15 = sld [smem:[#allocation6 + $0x31]] }
  0x95   : > { %402 = vrot.lane.b32.xlu2 %v401_v25, %s2892_s4 }
  0x99   : > { %417 = vrot.lane.b32.xlu1 %v416_v27, %s2894_s6  ;;  %v634_v27 = vstv %s3133_s30  ;;  %s3189_s30 = sld [smem:[#allocation6 + $0xb]] }
  0x9a   : > { %409 = vrot.lane.b32.xlu0 %v2744_v28, %s2892_s4  ;;  %v4297_v28 = vstv %s3135_s15  ;;  %s3159_s4 = sld [smem:[#allocation6 + $0x6]] }
  0x9d   : > { %424 = vrot.lane.b32.xlu2 %v2749_v30, %s2894_s6  ;;  %s4283_s6 = smov 124  }
  0xa1   : > { %439 = vrot.lane.b32.xlu1 %v2746_v34, %s2895_s7 }
  0xa2   : > { %432 = vrot.lane.b32.xlu0 %v431_v35, %s2895_s7  ;;  %s2605_s7 = sld [smem:[#allocation6 + $0x38]]  ;;  %v660_v35 = vstv %s3159_s4 }
  0xa3   : > { %s2626_s4 = sld [smem:[#allocation6 + $0x4d]] }
  0xa5   : > { %447 = vrot.lane.b32.xlu2 %v446_v37, %s2893_s5 }
  0xa8   : > { %v3187_v41 = vstv %s2605_s7  ;;  %s3207_s7 = sld [smem:[#allocation6 + $0x5c]] }
  0xa9   : > { %462 = vrot.lane.b32.xlu1 %v461_v40, %s2896_s8 }
  0xaa   : > { %454 = vrot.lane.b32.xlu0 %v2748_v39, %s2893_s5  ;;  %s4281_s5 = smov 123  }
  0xad   : > { %469 = vrot.lane.b32.xlu2 %v2751_v42, %s2896_s8  ;;  %s2557_s8 = sld [smem:[#allocation6 + $0x8]] }
  0xb1   : > { %484 = vrot.lane.b32.xlu1 %v2750_v45, %s2897_s14 }
  0xb2   : > { %477 = vrot.lane.b32.xlu0 %v476_v44, %s2897_s14  ;;  %s2612_s14 = sld [smem:[#allocation6 + $0x3f]] }
  0xb3   : > { %v760_v43 = vstv %s2557_s8  ;;  %s3210_s8 = sld [smem:[#allocation6 + $0x57]] }
  0xb8   : > { %v3198_v45 = vstv %s2612_s14  ;;  %s2642_s14 = sld [smem:[#allocation6 + $0x5d]] }
  0xbf   : > { %v283_v46 = vpop.permute.xlu2 %282 }
  0xc0   : > { %285 = vst.msk [vmem:[#allocation4 + $0x5] sm:$0x1] %vm253_vm3, %v283_v46 }
  0xc7   : > { %v313_v47 = vpop.permute.xlu2 %312 }
  0xc8   : > { %315 = vst.msk [vmem:[#allocation4 + $0x7] sm:$0x1] %vm253_vm3, %v313_v47 }
  0xcf   : > { %v358_v48 = vpop.permute.xlu2 %357 }
  0xd0   : > { %360 = vst.msk [vmem:[#allocation4 + $0xa] sm:$0x1] %vm253_vm3, %v358_v48 }
  0xd3   : > { %v268_v49 = vpop.permute.xlu1 %267 }
  0xd4   : > { %v251_v50 = vpop.permute.xlu0 %250  ;;  %270 = vst.msk [vmem:[#allocation4 + $0x4] sm:$0x1] %vm253_vm3, %v268_v49  ;;  %v3215_v49 = vstv %s2619_s24  ;;  %s3233_s24 = sld [smem:[#allocation6 + $0x5a]] }
  0xd5   : > { %254 = vst.msk [vmem:[#allocation4 + $0x3] sm:$0x1] %vm253_vm3, %v251_v50 }
  0xd7   : > { %v290_v51 = vpop.permute.xlu2 %289 }
  0xd8   : > { %292 = vst.msk [vmem:[#allocation4 + $0x1d] sm:$0x1] %vm253_vm3, %v290_v51  ;;  %v779_v51 = vstv %s2558_s17  ;;  %s3238_s17 = sld [smem:[#allocation6 + $0x60]] }
  0xdb   : > { %v328_v52 = vpop.permute.xlu1 %327 }
  0xdc   : > { %v298_v53 = vpop.permute.xlu0 %297  ;;  %330 = vst.msk [vmem:[#allocation4 + $0x8] sm:$0x1] %vm253_vm3, %v328_v52 }
  0xdd   : > { %300 = vst.msk [vmem:[#allocation4 + $0x6] sm:$0x1] %vm253_vm3, %v298_v53 }
  0xdf   : > { %v335_v54 = vpop.permute.xlu2 %334 }
  0xe0   : > { %337 = vst.msk [vmem:[#allocation4 + $0x20] sm:$0x1] %vm253_vm3, %v335_v54 }
  0xe3   : > { %v373_v57 = vpop.permute.xlu1 %372 }
  0xe4   : > { %v343_v58 = vpop.permute.xlu0 %342  ;;  %v3102_v59 = vld [vmem:[#allocation4] sm:$0xff]  ;;  %375 = vst.msk [vmem:[#allocation4 + $0xb] sm:$0x1] %vm253_vm3, %v373_v57  ;;  %v798_v57 = vstv %s3182_s23  ;;  %s2562_s23 = sld [smem:[#allocation6 + $0xd]] }
  0xe5   : > { %345 = vst.msk [vmem:[#allocation4 + $0x9] sm:$0x1] %vm253_vm3, %v343_v58  ;;  %v609_v60 = vmul.f32 %v608_v55, %v3102_v59  ;;  %v596_v61 = vmul.f32 %v595_v56, %v3102_v59  ;;  %v648_v32 = vmul.f32 %v647_v26, %v3102_v59  ;;  %v635_v33 = vmul.f32 %v634_v27, %v3102_v59 }
  0xe6   : > { %v622_v34 = vmul.f32 %v621_v19, %v3102_v59  ;;  %v761_v46 = vmul.f32 %v760_v43, %v3102_v59  ;;  %v661_v48 = vmul.f32 %v660_v35, %v3102_v59  ;;  %v780_v53 = vmul.f32 %v779_v51, %v3102_v59 }
  0xe7   : > { %v380_v62 = vpop.permute.xlu2 %379  ;;  %613 = vrot.lane.b32.xlu1 %v609_v60, %s4287_s19  ;;  %600 = vrot.lane.b32.xlu2 %v596_v61, %s4289_s22  ;;  %v3255_v58 = vstv %s3196_s29  ;;  %v3261_v61 = vstv %s3210_s8  ;;  %s4333_s29 = smov 125   ;;  %s2608_s8 = sld [smem:[#allocation6 + $0x3b]] }
  0xe8   : > { %382 = vst.msk [vmem:[#allocation4 + $0x23] sm:$0x1] %vm253_vm3, %v380_v62  ;;  %v3263_v62 = vstv %s2642_s14  ;;  %s2609_s14 = sld [smem:[#allocation6 + $0x3c]] }
  0xeb   : > { %v275_v63 = vpop.permute.xlu1 %274 }
  0xec   : > { %v259_v1 = vpop.permute.xlu0 %258  ;;  %277 = vst.msk [vmem:[#allocation4 + $0x1c] sm:$0x1] %vm253_vm3, %v275_v63 }
  0xed   : > { %262 = vst.msk [vmem:[#allocation4 + $0x1b] sm:$0x1] %vm253_vm3, %v259_v1 }
  0xef   : > { %v403_v2 = vpop.permute.xlu2 %402 }
  0xf0   : > { %405 = vst.msk [vmem:[#allocation4 + $0xd] sm:$0x1] %vm253_vm3, %v403_v2 }
  0xf3   : > { %v305_v3 = vpop.permute.xlu1 %304 }
  0xf4   : > { %v320_v4 = vpop.permute.xlu0 %319  ;;  %307 = vst.msk [vmem:[#allocation4 + $0x1e] sm:$0x1] %vm253_vm3, %v305_v3  ;;  %v799_v3 = vmul.f32 %v798_v57, %v3102_v59 }
  0xf5   : > { %322 = vst.msk [vmem:[#allocation4 + $0x1f] sm:$0x1] %vm253_vm3, %v320_v4  ;;  %v3279_v4 = vstv %s3189_s30  ;;  %s2606_s30 = sld [smem:[#allocation6 + $0x39]] }
  0xf7   : > { %v425_v5 = vpop.permute.xlu2 %424 }
  0xf8   : > { %427 = vst.msk [vmem:[#allocation4 + $0x26] sm:$0x1] %vm253_vm3, %v425_v5  ;;  %v3282_v5 = vstv %s3207_s7  ;;  %s2607_s7 = sld [smem:[#allocation6 + $0x3a]] }
  0xfb   : > { %v350_v6 = vpop.permute.xlu1 %349 }
  0xfc   : > { %v365_v7 = vpop.permute.xlu0 %364  ;;  %352 = vst.msk [vmem:[#allocation4 + $0x21] sm:$0x1] %vm253_vm3, %v350_v6 }
  0xfd   : > { %367 = vst.msk [vmem:[#allocation4 + $0x22] sm:$0x1] %vm253_vm3, %v365_v7 }
  0xff   : > { %v448_v8 = vpop.permute.xlu2 %447 }
 0x100   : > { %450 = vst.msk [vmem:[#allocation4 + $0x10] sm:$0x1] %vm253_vm3, %v448_v8 }
 0x103   : > { %v395_v9 = vpop.permute.xlu1 %394 }
 0x104   : > { %v388_v10 = vpop.permute.xlu0 %387  ;;  %397 = vst.msk [vmem:[#allocation4 + $0x24] sm:$0x1] %vm253_vm3, %v395_v9 }
 0x105   : > { %390 = vst.msk [vmem:[#allocation4 + $0xc] sm:$0x1] %vm253_vm3, %v388_v10 }
 0x107   : > { %v470_v13 = vpop.permute.xlu2 %469 }
 0x108   : > { %472 = vst.msk [vmem:[#allocation4 + $0x29] sm:$0x1] %vm253_vm3, %v470_v13 }
 0x10b   : > { %v418_v11 = vpop.permute.xlu1 %417 }
 0x10c   : > { %v410_v12 = vpop.permute.xlu0 %409  ;;  %420 = vst.msk [vmem:[#allocation4 + $0xe] sm:$0x1] %vm253_vm3, %v418_v11 }
 0x10d   : > { %412 = vst.msk [vmem:[#allocation4 + $0x25] sm:$0x1] %vm253_vm3, %v410_v12 }
 0x113   : > { %v440_v14 = vpop.permute.xlu1 %439 }
 0x114   : > { %v433_v15 = vpop.permute.xlu0 %432  ;;  %442 = vst.msk [vmem:[#allocation4 + $0x27] sm:$0x1] %vm253_vm3, %v440_v14  ;;  %v3306_v14 = vstv %s3233_s24  ;;  %s2610_s24 = sld [smem:[#allocation6 + $0x3d]] }
 0x115   : > { %435 = vst.msk [vmem:[#allocation4 + $0xf] sm:$0x1] %vm253_vm3, %v433_v15  ;;  %v3311_v15 = vstv %s3238_s17  ;;  %s2564_s17 = sld [smem:[#allocation6 + $0xf]] }
 0x116   : > { %4332 = vst [vmem:[#allocation23_spill] sm:$0xff] %v3306_v14 }
 0x117   : > { %4334 = vst [vmem:[#allocation24_spill] sm:$0xff] %v3311_v15 }
 0x11b   : > { %v463_v17 = vpop.permute.xlu1 %462  ;;  %v3147_v23 = vld [vmem:[#allocation4 + $0x20] sm:$0xff] }
 0x11c   : > { %v455_v16 = vpop.permute.xlu0 %454  ;;  %v3137_v18 = vld [vmem:[#allocation4 + $0x8] sm:$0xff]  ;;  %465 = vst.msk [vmem:[#allocation4 + $0x11] sm:$0x1] %vm253_vm3, %v463_v17  ;;  %v3164_v31 = vmul.f32 %v4297_v28, %v3147_v23 }
 0x11d   : > { %457 = vst.msk [vmem:[#allocation4 + $0x28] sm:$0x1] %vm253_vm3, %v455_v16  ;;  %v623_v20 = vmul.f32 %v621_v19, %v3137_v18  ;;  %v610_v21 = vmul.f32 %v608_v55, %v3137_v18  ;;  %v597_v22 = vmul.f32 %v595_v56, %v3137_v18  ;;  %v3154_v25 = vmul.f32 %v4298_v24, %v3137_v18 }
 0x11e   : > { %v662_v36 = vmul.f32 %v660_v35, %v3137_v18  ;;  %v649_v37 = vmul.f32 %v647_v26, %v3137_v18  ;;  %v636_v39 = vmul.f32 %v634_v27, %v3137_v18  ;;  %v762_v54 = vmul.f32 %v760_v43, %v3137_v18 }
 0x11f   : > { %628 = vrot.lane.b32.xlu1 %v623_v20, %s4285_s20  ;;  %615 = vrot.lane.b32.xlu2 %v610_v21, %s4287_s19  ;;  %s3225_s19 = sld [smem:[#allocation6 + $0x53]]  ;;  %v3236_v55 = vstv %s2626_s4  ;;  %v781_v11 = vmul.f32 %v779_v51, %v3137_v18  ;;  %v3313_v16 = vstv %s2646_s1 }
 0x120   : > { %602 = vrot.lane.b32.xlu0 %v597_v22, %s4289_s22  ;;  %s3250_s4 = sld [smem:[#allocation6 + $0x5b]]  ;;  %4335 = vst [vmem:[#allocation25_spill] sm:$0xff] %v3313_v16  ;;  %v3325_v20 = vstv %s3247_s11  ;;  %v938_v24 = vstv %s2609_s14 }
 0x121   : > { %4338 = vst [vmem:[#allocation28_spill] sm:$0xff] %v3325_v20  ;;  %s2599_s1 = sld [smem:[#allocation6 + $0x32]] }
 0x122   : > { %s2601_s11 = sld [smem:[#allocation6 + $0x34]] }
 0x123   : > { %v485_v30 = vpop.permute.xlu1 %484  ;;  %s2571_s14 = sld [smem:[#allocation6 + $0x16]] }
 0x124   : > { %v478_v29 = vpop.permute.xlu0 %477  ;;  %487 = vst.msk [vmem:[#allocation4 + $0x2a] sm:$0x1] %vm253_vm3, %v485_v30 }
 0x125   : > { %480 = vst.msk [vmem:[#allocation4 + $0x12] sm:$0x1] %vm253_vm3, %v478_v29  ;;  %v3296_v10 = vstv %s3225_s19  ;;  %s2603_s19 = sld [smem:[#allocation6 + $0x36]] }
 0x126   : > { %v3340_v27 = vstv %s3250_s4  ;;  %s2566_s4 = sld [smem:[#allocation6 + $0x11]] }
 0x127   : > { %652 = vrot.lane.b32.xlu1 %v648_v32, %s4281_s5  ;;  %639 = vrot.lane.b32.xlu2 %v635_v33, %s4283_s6  ;;  %4342 = vst [vmem:[#allocation32_spill] sm:$0xff] %v3340_v27  ;;  %v3354_v33 = vld [vmem:[#allocation4 + $0x18] sm:$0xff] }
 0x128   : > { %626 = vrot.lane.b32.xlu0 %v622_v34, %s4285_s20  ;;  %s3223_s20 = sld [smem:[#allocation6 + $0x5e]]  ;;  %v691_v34 = vstv %s3252_s10  ;;  %s4349_s10 = smov 124  }
 0x12b   : > { %v3177_v38 = vld [vmem:[#allocation4 + $0x28] sm:$0x3f] }
 0x12c   : > { %v3184_v40 = vld [vmem:[#allocation4 + $0x10] sm:$0x3f]  ;;  %v3193_v42 = vmul.f32 %v3187_v41, %v3177_v38  ;;  %v3205_v47 = vmul.f32 %v3198_v45, %v3177_v38  ;;  %v3221_v50 = vmul.f32 %v3215_v49, %v3177_v38  ;;  %v3244_v56 = vmul.f32 %v3236_v55, %v3177_v38 }
 0x12d   : > { %v763_v44 = vmul.f32 %v760_v43, %v3184_v40  ;;  %v782_v52 = vmul.f32 %v779_v51, %v3184_v40  ;;  %v3267_v63 = vmul.f32 %v3255_v58, %v3177_v38  ;;  %v3275_v2 = vmul.f32 %v3261_v61, %v3177_v38 }
 0x12e   : > { %v3286_v6 = vmul.f32 %v3263_v62, %v3177_v38  ;;  %v801_v7 = vmul.f32 %v798_v57, %v3184_v40  ;;  %v3293_v9 = vstv %s3223_s20  ;;  %v3321_v19 = vmul.f32 %v3282_v5, %v3177_v38  ;;  %s2604_s20 = sld [smem:[#allocation6 + $0x37]] }
 0x12f   : > { %667 = vrot.lane.b32.xlu1 %v662_v36, %s4291_s18  ;;  %654 = vrot.lane.b32.xlu2 %v649_v37, %s4281_s5  ;;  %s3200_s5 = sld [smem:[#allocation6 + $0x56]]  ;;  %4327 = vst [vmem:[#allocation18_spill] sm:$0xff] %v3267_v63  ;;  %v3317_v17 = vmul.f32 %v3293_v9, %v3177_v38  ;;  %v3329_v21 = vmul.f32 %v3296_v10, %v3177_v38 }
 0x130   : > { %641 = vrot.lane.b32.xlu0 %v636_v39, %s4283_s6  ;;  %s3217_s6 = sld [smem:[#allocation6 + $0x58]]  ;;  %4329 = vst [vmem:[#allocation20_spill] sm:$0xff] %v3275_v2  ;;  %v3344_v29 = vmul.f32 %v3306_v14, %v3177_v38  ;;  %v3348_v30 = vmul.f32 %v3313_v16, %v3177_v38  ;;  %v3359_v35 = vmul.f32 %v3311_v15, %v3177_v38 }
 0x131   : > { %4330 = vst [vmem:[#allocation21_spill] sm:$0xff] %v3286_v6  ;;  %v3363_v36 = vmul.f32 %v3325_v20, %v3177_v38  ;;  %v3367_v37 = vmul.f32 %v3340_v27, %v3177_v38  ;;  %v818_v39 = vmul.f32 %v3279_v4, %v3102_v59  ;;  %v692_v43 = vmul.f32 %v691_v34, %v3354_v33 }
 0x132   : > { %4336 = vst [vmem:[#allocation26_spill] sm:$0xff] %v3317_v17  ;;  %v875_v2 = vmul.f32 %v3187_v41, %v3354_v33 }
 0x133   : > { %4337 = vst [vmem:[#allocation27_spill] sm:$0xff] %v3321_v19 }
 0x134   : > { %4339 = vst [vmem:[#allocation29_spill] sm:$0xff] %v3329_v21 }
 0x135   : > { %v3258_v60 = vstv %s3200_s5  ;;  %4343 = vst [vmem:[#allocation33_spill] sm:$0xff] %v3344_v29  ;;  %s4350_s5 = smov 123  }
 0x136   : > { %v3271_v1 = vmul.f32 %v3258_v60, %v3177_v38  ;;  %v3290_v8 = vstv %s3217_s6  ;;  %4344 = vst [vmem:[#allocation34_spill] sm:$0xff] %v3348_v30  ;;  %s4351_s6 = smov 122  }
 0x137   : > { %767 = vrot.lane.b32.xlu2 %v761_v46, %s4289_s22  ;;  %771 = vrot.lane.b32.xlu1 %v763_v44, %s4289_s22  ;;  %s3228_s22 = sld [smem:[#allocation6 + $0x59]]  ;;  %v3337_v26 = vmul.f32 %v3290_v8, %v3177_v38  ;;  %4346 = vst [vmem:[#allocation36_spill] sm:$0xff] %v3359_v35  ;;  %v800_v44 = vmul.f32 %v798_v57, %v3137_v18  ;;  %v678_v46 = vstv %s2599_s1 }
 0x138   : > { %665 = vrot.lane.b32.xlu0 %v661_v48, %s4291_s18  ;;  %s3230_s18 = sld [smem:[#allocation6 + $0x5f]]  ;;  %4328 = vst [vmem:[#allocation19_spill] sm:$0xff] %v3271_v1  ;;  %v704_v48 = vstv %s2601_s11  ;;  %v679_v51 = vmul.f32 %v678_v46, %v3354_v33  ;;  %v693_v57 = vmul.f32 %v691_v34, %v3147_v23 }
 0x139   : > { %4341 = vst [vmem:[#allocation31_spill] sm:$0xff] %v3337_v26  ;;  %s2567_s1 = sld [smem:[#allocation6 + $0x12]] }
 0x13a   : > { %4347 = vst [vmem:[#allocation37_spill] sm:$0xff] %v3363_v36  ;;  %s2556_s11 = sld [smem:[#allocation6 + $0x7]] }
 0x13b   : > { %4348 = vst [vmem:[#allocation38_spill] sm:$0xff] %v3367_v37  ;;  %v4352_v37 = vstv %s3131_s28  ;;  %s2611_s28 = sld [smem:[#allocation6 + $0x3e]] }
 0x13c   : > { %v593_v36 = vmul.f32 %v4352_v37, %v3102_v59 }
 0x13d   : > { %v3300_v12 = vstv %s3228_s22  ;;  %s2602_s22 = sld [smem:[#allocation6 + $0x35]] }
 0x13e   : > { %v3303_v13 = vstv %s3230_s18  ;;  %v3352_v32 = vmul.f32 %v3300_v12, %v3177_v38  ;;  %s2561_s18 = sld [smem:[#allocation6 + $0xc]] }
 0x13f   : > { %786 = vrot.lane.b32.xlu2 %v780_v53, %s4325_s0  ;;  %790 = vrot.lane.b32.xlu1 %v782_v52, %s4325_s0  ;;  %4331 = vst [vmem:[#allocation22_spill] sm:$0xff] %v3303_v13  ;;  %v3333_v22 = vmul.f32 %v3303_v13, %v3177_v38  ;;  %v706_v52 = vmul.f32 %v704_v48, %v3147_v23 }
 0x140   : > { %769 = vrot.lane.b32.xlu0 %v762_v54, %s4326_s25  ;;  %4345 = vst [vmem:[#allocation35_spill] sm:$0xff] %v3352_v32  ;;  %v680_v53 = vmul.f32 %v678_v46, %v3147_v23  ;;  %v730_v54 = vstv %s2603_s19  ;;  %s2568_s19 = sld [smem:[#allocation6 + $0x13]] }
 0x141   : > { %4340 = vst [vmem:[#allocation30_spill] sm:$0xff] %v3333_v22  ;;  %v732_v34 = vmul.f32 %v730_v54, %v3147_v23 }
 0x146   : > { %v1088_v6 = vstv %s2568_s19  ;;  %s2621_s19 = sld [smem:[#allocation6 + $0x48]] }
 0x147   : > { %805 = vrot.lane.b32.xlu2 %v799_v3, %s4333_s29  ;;  %809 = vrot.lane.b32.xlu1 %v801_v7, %s4333_s29  ;;  %v731_v3 = vmul.f32 %v730_v54, %v3354_v33  ;;  %v705_v7 = vmul.f32 %v704_v48, %v3354_v33  ;;  %v820_v48 = vmul.f32 %v3279_v4, %v3184_v40 }
 0x148   : > { %788 = vrot.lane.b32.xlu0 %v781_v11, %s4325_s0  ;;  %v717_v11 = vstv %s2602_s22  ;;  %v819_v54 = vmul.f32 %v3279_v4, %v3137_v18  ;;  %s2569_s22 = sld [smem:[#allocation6 + $0x14]] }
 0x149   : > { %v719_v46 = vmul.f32 %v717_v11, %v3147_v23 }
 0x14f   : > { %824 = vrot.lane.b32.xlu2 %v818_v39, %s4349_s10  ;;  %696 = vrot.lane.b32.xlu1 %v692_v43, %s4325_s0  ;;  %v743_v39 = vstv %s2604_s20  ;;  %v718_v43 = vmul.f32 %v717_v11, %v3354_v33  ;;  %v855_v11 = vstv %s2562_s23  ;;  %s2613_s20 = sld [smem:[#allocation6 + $0x40]] }
 0x150   : > { %807 = vrot.lane.b32.xlu0 %v800_v44, %s4333_s29  ;;  %v745_v44 = vmul.f32 %v743_v39, %v3147_v23  ;;  %s2615_s23 = sld [smem:[#allocation6 + $0x42]] }
 0x156   : > { %v1171_v15 = vstv %s2615_s23  ;;  %s2625_s23 = sld [smem:[#allocation6 + $0x4c]] }
 0x157   : > { %683 = vrot.lane.b32.xlu2 %v679_v51, %s4326_s25  ;;  %711 = vrot.lane.b32.xlu1 %v706_v52, %s4333_s29  ;;  %v744_v51 = vmul.f32 %v743_v39, %v3354_v33  ;;  %v601_v52 = vpop.permute.xlu2 %600  ;;  %v856_v39 = vmul.f32 %v855_v11, %v3102_v59 }
 0x158   : > { %685 = vrot.lane.b32.xlu0 %v680_v53, %s4326_s25  ;;  %v836_v53 = vstv %s2561_s18  ;;  %v606_v35 = vadd.f32 %v601_v52, %v593_v36  ;;  %v957_v52 = vstv %s2610_s24  ;;  %s2614_s18 = sld [smem:[#allocation6 + $0x41]] }
 0x159   : > { %s2572_s24 = sld [smem:[#allocation6 + $0x17]] }
 0x15e   : > { %v1152_v63 = vstv %s2614_s18  ;;  %s2624_s18 = sld [smem:[#allocation6 + $0x4b]] }
 0x15f   : > { %698 = vrot.lane.b32.xlu2 %v693_v57, %s4325_s0  ;;  %735 = vrot.lane.b32.xlu1 %v731_v3, %s4350_s5  ;;  %v837_v57 = vmul.f32 %v836_v53, %v3102_v59  ;;  %v839_v3 = vmul.f32 %v836_v53, %v3184_v40 }
 0x160   : > { %709 = vrot.lane.b32.xlu0 %v705_v7, %s4333_s29 }
 0x167   : > { %722 = vrot.lane.b32.xlu2 %v718_v43, %s4349_s10  ;;  %750 = vrot.lane.b32.xlu1 %v745_v44, %s4351_s6  ;;  %v858_v43 = vmul.f32 %v855_v11, %v3184_v40  ;;  %v838_v44 = vmul.f32 %v836_v53, %v3137_v18  ;;  %v614_v53 = vpop.permute.xlu1 %613 }
 0x168   : > { %724 = vrot.lane.b32.xlu0 %v719_v46, %s4349_s10  ;;  %v881_v46 = vstv %s2606_s30  ;;  %s2616_s30 = sld [smem:[#allocation6 + $0x43]] }
 0x16f   : > { %737 = vrot.lane.b32.xlu2 %v732_v34, %s4350_s5  ;;  %828 = vrot.lane.b32.xlu1 %v820_v48, %s4349_s10  ;;  %v882_v34 = vmul.f32 %v881_v46, %v3354_v33  ;;  %v884_v48 = vmul.f32 %v881_v46, %v3177_v38 }
 0x170   : > { %748 = vrot.lane.b32.xlu0 %v744_v51, %s4351_s6  ;;  %v857_v51 = vmul.f32 %v855_v11, %v3137_v18 }
 0x177   : > { %843 = vrot.lane.b32.xlu2 %v837_v57, %s4350_s5  ;;  %847 = vrot.lane.b32.xlu1 %v839_v3, %s4350_s5  ;;  %v900_v3 = vstv %s2607_s7  ;;  %s2617_s7 = sld [smem:[#allocation6 + $0x44]] }
 0x178   : > { %826 = vrot.lane.b32.xlu0 %v819_v54, %s4349_s10  ;;  %v901_v54 = vmul.f32 %v900_v3, %v3354_v33  ;;  %v902_v28 = vmul.f32 %v900_v3, %v3147_v23 }
 0x179   : > { %v616_v7 = vpop.permute.xlu2 %615 }
 0x17f   : > { %862 = vrot.lane.b32.xlu2 %v856_v39, %s4351_s6  ;;  %866 = vrot.lane.b32.xlu1 %v858_v43, %s4351_s6  ;;  %v903_v39 = vmul.f32 %v900_v3, %v3177_v38  ;;  %v883_v43 = vmul.f32 %v881_v46, %v3147_v23  ;;  %v939_v3 = vmul.f32 %v938_v24, %v3354_v33 }
 0x180   : > { %845 = vrot.lane.b32.xlu0 %v838_v44, %s4350_s5 }
 0x181   : > { %v640_v4 = vpop.permute.xlu2 %639 }
 0x187   : > { %888 = vrot.lane.b32.xlu2 %v882_v34, %s4326_s25  ;;  %892 = vrot.lane.b32.xlu1 %v884_v48, %s4326_s25  ;;  %v919_v48 = vstv %s2608_s8  ;;  %s2618_s8 = sld [smem:[#allocation6 + $0x45]] }
 0x188   : > { %864 = vrot.lane.b32.xlu0 %v857_v51, %s4351_s6  ;;  %v920_v51 = vmul.f32 %v919_v48, %v3354_v33  ;;  %v922_v0 = vmul.f32 %v919_v48, %v3177_v38 }
 0x189   : > { %v655_v57 = vpop.permute.xlu2 %654 }
 0x18f   : > { %907 = vrot.lane.b32.xlu2 %v901_v54, %s4325_s0  ;;  %911 = vrot.lane.b32.xlu1 %v903_v39, %s4325_s0 }
 0x190   : > { %890 = vrot.lane.b32.xlu0 %v883_v43, %s4326_s25 }
 0x191   : > { %v629_v11 = vpop.permute.xlu1 %628  ;;  %v3426_v44 = vpop.permute.xlu2 %767 }
 0x192   : > { %v603_v34 = vpop.permute.xlu0 %602 }
 0x193   : > { %v607_v46 = vadd.f32 %v603_v34, %v3154_v25 }
 0x195   : > { %v620_v32 = vadd.f32 %v616_v7, %v607_v46 }
 0x197   : > { %926 = vrot.lane.b32.xlu2 %v920_v51, %s4333_s29  ;;  %930 = vrot.lane.b32.xlu1 %v922_v0, %s4333_s29  ;;  %v941_v51 = vmul.f32 %v938_v24, %v3177_v38  ;;  %v921_v0 = vmul.f32 %v919_v48, %v3147_v23  ;;  %v633_v37 = vadd.f32 %v629_v11, %v620_v32 }
 0x198   : > { %909 = vrot.lane.b32.xlu0 %v902_v28, %s4325_s0  ;;  %v619_v28 = vadd.f32 %v614_v53, %v606_v35  ;;  %v958_v35 = vmul.f32 %v957_v52, %v3354_v33  ;;  %v960_v53 = vmul.f32 %v957_v52, %v3177_v38  ;;  %v940_v48 = vmul.f32 %v938_v24, %v3147_v23 }
 0x199   : > { %v653_v54 = vpop.permute.xlu1 %652  ;;  %v3435_v39 = vpop.permute.xlu2 %786  ;;  %v4353_v24 = vstv %s3135_s15  ;;  %s2565_s15 = sld [smem:[#allocation6 + $0x10]] }
 0x19a   : > { %v627_v43 = vpop.permute.xlu0 %626 }
 0x19b   : > { %v632_v25 = vadd.f32 %v627_v43, %v619_v28  ;;  %v674_v28 = vmul.f32 %v4353_v24, %v3354_v33 }
 0x19d   : > { %v645_v46 = vadd.f32 %v640_v4, %v632_v25 }
 0x19f   : > { %945 = vrot.lane.b32.xlu2 %v939_v3, %s4349_s10  ;;  %949 = vrot.lane.b32.xlu1 %v941_v51, %s4349_s10  ;;  %v658_v4 = vadd.f32 %v653_v54, %v645_v46  ;;  %v976_v51 = vstv %s2611_s28  ;;  %s2573_s28 = sld [smem:[#allocation6 + $0x18]] }
 0x1a0   : > { %928 = vrot.lane.b32.xlu0 %v921_v0, %s4333_s29  ;;  %v977_v25 = vmul.f32 %v976_v51, %v3354_v33 }
 0x1a1   : > { %v668_v34 = vpop.permute.xlu1 %667  ;;  %v3446_v30 = vpop.permute.xlu2 %805 }
 0x1a2   : > { %v642_v36 = vpop.permute.xlu0 %641 }
 0x1a3   : > { %v646_v7 = vadd.f32 %v642_v36, %v633_v37  ;;  %v959_v37 = vmul.f32 %v957_v52, %v3147_v23  ;;  %v978_v52 = vmul.f32 %v976_v51, %v3147_v23 }
 0x1a5   : > { %v659_v29 = vadd.f32 %v655_v57, %v646_v7  ;;  %v1012_v7 = vstv %s2564_s17  ;;  %s2574_s17 = sld [smem:[#allocation6 + $0x19]] }
 0x1a6   : > { %v1013_v46 = vmul.f32 %v1012_v7, %v3102_v59 }
 0x1a7   : > { %964 = vrot.lane.b32.xlu2 %v958_v35, %s4350_s5  ;;  %968 = vrot.lane.b32.xlu1 %v960_v53, %s4350_s5  ;;  %v672_v43 = vadd.f32 %v668_v34, %v659_v29  ;;  %v979_v29 = vmul.f32 %v976_v51, %v3177_v38  ;;  %v1015_v35 = vmul.f32 %v1012_v7, %v3184_v40 }
 0x1a8   : > { %947 = vrot.lane.b32.xlu0 %v940_v48, %s4349_s10  ;;  %v1014_v51 = vmul.f32 %v1012_v7, %v3137_v18 }
 0x1a9   : > { %v3454_v32 = vpop.permute.xlu2 %824  ;;  %v3456_v11 = vpop.permute.xlu1 %771  ;;  %v3459_v57 = vadd.f32 %v3164_v31, %v672_v43 }
 0x1aa   : > { %v666_v3 = vpop.permute.xlu0 %665 }
 0x1ab   : > { %v671_v0 = vadd.f32 %v666_v3, %v658_v4  ;;  %v1031_v4 = vstv %s2565_s15  ;;  %s2563_s15 = sld [smem:[#allocation6 + $0xe]] }
 0x1ac   : > { %v1032_v3 = vmul.f32 %v1031_v4, %v3102_v59  ;;  %v1033_v7 = vmul.f32 %v1031_v4, %v3137_v18 }
 0x1ad   : > { %v3466_v34 = vadd.f32 %v674_v28, %v671_v0  ;;  %v1034_v0 = vmul.f32 %v1031_v4, %v3184_v40 }
 0x1af   : > { %983 = vrot.lane.b32.xlu2 %v977_v25, %s4351_s6  ;;  %987 = vrot.lane.b32.xlu1 %v979_v29, %s4351_s6  ;;  %v1050_v29 = vstv %s2566_s4  ;;  %s2575_s4 = sld [smem:[#allocation6 + $0x1a]] }
 0x1b0   : > { %966 = vrot.lane.b32.xlu0 %v959_v37, %s4350_s5  ;;  %v1051_v37 = vmul.f32 %v1050_v29, %v3102_v59 }
 0x1b1   : > { %v3472_v31 = vpop.permute.xlu2 %683  ;;  %v3474_v54 = vpop.permute.xlu1 %790 }
 0x1b2   : > { %v3476_v36 = vpop.permute.xlu0 %769 }
 0x1b7   : > { %1019 = vrot.lane.b32.xlu2 %v1013_v46, %s4326_s25  ;;  %1023 = vrot.lane.b32.xlu1 %v1015_v35, %s4326_s25  ;;  %v1053_v46 = vmul.f32 %v1050_v29, %v3184_v40 }
 0x1b8   : > { %985 = vrot.lane.b32.xlu0 %v978_v52, %s4351_s6 }
 0x1b9   : > { %v3484_v53 = vpop.permute.xlu2 %698  ;;  %v3486_v48 = vpop.permute.xlu1 %809 }
 0x1ba   : > { %v3488_v43 = vpop.permute.xlu0 %788 }
 0x1bf   : > { %1038 = vrot.lane.b32.xlu2 %v1032_v3, %s4325_s0  ;;  %1042 = vrot.lane.b32.xlu1 %v1034_v0, %s4325_s0  ;;  %v1069_v0 = vstv %s2567_s1  ;;  %s2576_s1 = sld [smem:[#allocation6 + $0x1b]] }
 0x1c0   : > { %1021 = vrot.lane.b32.xlu0 %v1014_v51, %s4326_s25  ;;  %v756_v51 = vstv %s2556_s11  ;;  %v1070_v26 = vmul.f32 %v1069_v0, %v3102_v59  ;;  %v1072_v22 = vmul.f32 %v1069_v0, %v3184_v40  ;;  %s2620_s11 = sld [smem:[#allocation6 + $0x47]] }
 0x1c1   : > { %v3496_v24 = vpop.permute.xlu2 %722  ;;  %v3498_v28 = vpop.permute.xlu1 %696  ;;  %v757_v4 = vmul.f32 %v756_v51, %v3102_v59 }
 0x1c2   : > { %v3500_v25 = vpop.permute.xlu0 %807 }
 0x1c7   : > { %1057 = vrot.lane.b32.xlu2 %v1051_v37, %s4333_s29  ;;  %1061 = vrot.lane.b32.xlu1 %v1053_v46, %s4333_s29  ;;  %v1052_v37 = vmul.f32 %v1050_v29, %v3137_v18  ;;  %v776_v46 = vadd.f32 %v3426_v44, %v757_v4  ;;  %v1089_v29 = vmul.f32 %v1088_v6, %v3102_v59 }
 0x1c8   : > { %1040 = vrot.lane.b32.xlu0 %v1033_v7, %s4325_s0  ;;  %v1071_v44 = vmul.f32 %v1069_v0, %v3137_v18 }
 0x1c9   : > { %v3508_v35 = vpop.permute.xlu2 %737  ;;  %v3510_v52 = vpop.permute.xlu1 %711  ;;  %v795_v19 = vadd.f32 %v3435_v39, %v776_v46 }
 0x1ca   : > { %v3512_v3 = vpop.permute.xlu0 %685 }
 0x1cb   : > { %v814_v27 = vadd.f32 %v3446_v30, %v795_v19  ;;  %v1107_v30 = vstv %s2569_s22  ;;  %s2622_s22 = sld [smem:[#allocation6 + $0x49]] }
 0x1cc   : > { %v1110_v0 = vmul.f32 %v1107_v30, %v3184_v40 }
 0x1cf   : > { %1076 = vrot.lane.b32.xlu2 %v1070_v26, %s4349_s10  ;;  %1080 = vrot.lane.b32.xlu1 %v1072_v22, %s4349_s10  ;;  %v1091_v26 = vmul.f32 %v1088_v6, %v3184_v40  ;;  %v833_v22 = vadd.f32 %v3454_v32, %v814_v27  ;;  %v1108_v32 = vmul.f32 %v1107_v30, %v3102_v59 }
 0x1d0   : > { %1059 = vrot.lane.b32.xlu0 %v1052_v37, %s4333_s29 }
 0x1d1   : > { %v844_v7 = vpop.permute.xlu2 %843  ;;  %v3522_v21 = vpop.permute.xlu1 %735 }
 0x1d2   : > { %v3525_v17 = vpop.permute.xlu0 %709  ;;  %v852_v4 = vadd.f32 %v844_v7, %v833_v22  ;;  %v1090_v7 = vmul.f32 %v1088_v6, %v3137_v18  ;;  %v1109_v6 = vmul.f32 %v1107_v30, %v3137_v18  ;;  %v1153_v30 = vmul.f32 %v1152_v63, %v3354_v33 }
 0x1d7   : > { %1095 = vrot.lane.b32.xlu2 %v1089_v29, %s4350_s5  ;;  %1099 = vrot.lane.b32.xlu1 %v1091_v26, %s4350_s5 }
 0x1d8   : > { %1078 = vrot.lane.b32.xlu0 %v1071_v44, %s4349_s10  ;;  %v1133_v44 = vstv %s2613_s20  ;;  %s2623_s20 = sld [smem:[#allocation6 + $0x4a]] }
 0x1d9   : > { %v863_v39 = vpop.permute.xlu2 %862  ;;  %v3535_v37 = vpop.permute.xlu1 %750 }
 0x1da   : > { %v871_v46 = vadd.f32 %v863_v39, %v852_v4  ;;  %v3537_v19 = vpop.permute.xlu0 %724  ;;  %v1136_v4 = vmul.f32 %v1133_v44, %v3177_v38  ;;  %v759_v39 = vmul.f32 %v756_v51, %v3184_v40 }
 0x1dc   : > { %v3541_v27 = vadd.f32 %v875_v2, %v871_v46  ;;  %v1134_v2 = vmul.f32 %v1133_v44, %v3354_v33  ;;  %v778_v46 = vadd.f32 %v3456_v11, %v759_v39  ;;  %v758_v11 = vmul.f32 %v756_v51, %v3137_v18 }
 0x1df   : > { %1114 = vrot.lane.b32.xlu2 %v1108_v32, %s4351_s6  ;;  %1118 = vrot.lane.b32.xlu1 %v1110_v0, %s4351_s6 }
 0x1e0   : > { %1097 = vrot.lane.b32.xlu0 %v1090_v7, %s4350_s5  ;;  %v797_v7 = vadd.f32 %v3474_v54, %v778_v46  ;;  %v777_v54 = vadd.f32 %v3476_v36, %v758_v11  ;;  %v1154_v36 = vmul.f32 %v1152_v63, %v3147_v23  ;;  %v876_v11 = vmul.f32 %v3187_v41, %v3147_v23 }
 0x1e1   : > { %v3549_v29 = vpop.permute.xlu2 %888  ;;  %v829_v26 = vpop.permute.xlu1 %828 }
 0x1e2   : > { %v3551_v22 = vpop.permute.xlu0 %748  ;;  %v816_v20 = vadd.f32 %v3486_v48, %v797_v7 }
 0x1e4   : > { %v835_v16 = vadd.f32 %v829_v26, %v816_v20  ;;  %v796_v20 = vadd.f32 %v3488_v43, %v777_v54  ;;  %v1173_v54 = vmul.f32 %v1171_v15, %v3147_v23 }
 0x1e6   : > { %v815_v26 = vadd.f32 %v3500_v25, %v796_v20  ;;  %v1209_v20 = vstv %s2617_s7  ;;  %s2579_s7 = sld [smem:[#allocation6 + $0x1e]] }
 0x1e7   : > { %1140 = vrot.lane.b32.xlu2 %v1134_v2, %s4326_s25  ;;  %1144 = vrot.lane.b32.xlu1 %v1136_v4, %s4326_s25  ;;  %v1155_v2 = vmul.f32 %v1152_v63, %v3177_v38  ;;  %v1135_v4 = vmul.f32 %v1133_v44, %v3147_v23  ;;  %v1174_v44 = vmul.f32 %v1171_v15, %v3177_v38 }
 0x1e8   : > { %1116 = vrot.lane.b32.xlu0 %v1109_v6, %s4351_s6  ;;  %v1210_v41 = vmul.f32 %v1209_v20, %v3354_v33 }
 0x1e9   : > { %v3561_v32 = vpop.permute.xlu2 %907  ;;  %v848_v0 = vpop.permute.xlu1 %847 }
 0x1ea   : > { %v827_v1 = vpop.permute.xlu0 %826  ;;  %v854_v39 = vadd.f32 %v848_v0, %v835_v16  ;;  %v1172_v16 = vmul.f32 %v1171_v15, %v3354_v33 }
 0x1eb   : > { %v834_v0 = vadd.f32 %v827_v1, %v815_v26  ;;  %v1212_v26 = vmul.f32 %v1209_v20, %v3177_v38 }
 0x1ef   : > { %1159 = vrot.lane.b32.xlu2 %v1153_v30, %s4325_s0  ;;  %1163 = vrot.lane.b32.xlu1 %v1155_v2, %s4325_s0 }
 0x1f0   : > { %1142 = vrot.lane.b32.xlu0 %v1135_v4, %s4326_s25  ;;  %v1190_v4 = vstv %s2616_s30  ;;  %s2578_s30 = sld [smem:[#allocation6 + $0x1d]] }
 0x1f1   : > { %v3573_v6 = vpop.permute.xlu2 %926  ;;  %v867_v48 = vpop.permute.xlu1 %866  ;;  %v1191_v63 = vmul.f32 %v1190_v4, %v3354_v33  ;;  %v1193_v1 = vmul.f32 %v1190_v4, %v3177_v38 }
 0x1f2   : > { %v873_v46 = vadd.f32 %v867_v48, %v854_v39  ;;  %v846_v7 = vpop.permute.xlu0 %845 }
 0x1f3   : > { %v853_v30 = vadd.f32 %v846_v7, %v834_v0  ;;  %v1228_v0 = vstv %s2618_s8  ;;  %s2580_s8 = sld [smem:[#allocation6 + $0x1f]] }
 0x1f4   : > { %v3577_v51 = vadd.f32 %v3193_v42, %v873_v46 }
 0x1f7   : > { %1178 = vrot.lane.b32.xlu2 %v1172_v16, %s4333_s29  ;;  %1182 = vrot.lane.b32.xlu1 %v1174_v44, %s4333_s29  ;;  %v1192_v16 = vmul.f32 %v1190_v4, %v3147_v23 }
 0x1f8   : > { %1161 = vrot.lane.b32.xlu0 %v1154_v36, %s4325_s0 }
 0x1f9   : > { %v3586_v43 = vpop.permute.xlu2 %945  ;;  %v893_v42 = vpop.permute.xlu1 %892 }
 0x1fa   : > { %v865_v2 = vpop.permute.xlu0 %864 }
 0x1fb   : > { %v872_v25 = vadd.f32 %v865_v2, %v853_v30  ;;  %v1229_v30 = vmul.f32 %v1228_v0, %v3354_v33  ;;  %v1231_v2 = vmul.f32 %v1228_v0, %v3177_v38 }
 0x1fd   : > { %v879_v39 = vadd.f32 %v876_v11, %v872_v25  ;;  %v1211_v25 = vmul.f32 %v1209_v20, %v3147_v23 }
 0x1ff   : > { %1197 = vrot.lane.b32.xlu2 %v1191_v63, %s4349_s10  ;;  %1201 = vrot.lane.b32.xlu1 %v1193_v1, %s4349_s10  ;;  %v1264_v1 = vstv %s2571_s14  ;;  %s2570_s14 = sld [smem:[#allocation6 + $0x15]] }
 0x200   : > { %1180 = vrot.lane.b32.xlu0 %v1173_v54, %s4333_s29  ;;  %v1265_v54 = vmul.f32 %v1264_v1, %v3102_v59 }
 0x201   : > { %v3596_v48 = vpop.permute.xlu2 %964  ;;  %v912_v46 = vpop.permute.xlu1 %911 }
 0x202   : > { %v891_v7 = vpop.permute.xlu0 %890 }
 0x207   : > { %1216 = vrot.lane.b32.xlu2 %v1210_v41, %s4350_s5  ;;  %1220 = vrot.lane.b32.xlu1 %v1212_v26, %s4350_s5  ;;  %v1267_v41 = vmul.f32 %v1264_v1, %v3184_v40  ;;  %v1230_v26 = vmul.f32 %v1228_v0, %v3147_v23  ;;  %v1266_v23 = vmul.f32 %v1264_v1, %v3137_v18 }
 0x208   : > { %1199 = vrot.lane.b32.xlu0 %v1192_v16, %s4349_s10  ;;  %v897_v0 = vadd.f32 %v3549_v29, %v3541_v27  ;;  %v898_v1 = vadd.f32 %v891_v7, %v879_v39  ;;  %v1302_v29 = vstv %s2573_s28  ;;  %s2582_s28 = sld [smem:[#allocation6 + $0x21]] }
 0x209   : > { %v3604_v15 = vpop.permute.xlu2 %983  ;;  %v931_v44 = vpop.permute.xlu1 %930 }
 0x20a   : > { %v910_v36 = vpop.permute.xlu0 %909 }
 0x20f   : > { %1235 = vrot.lane.b32.xlu2 %v1229_v30, %s4351_s6  ;;  %1239 = vrot.lane.b32.xlu1 %v1231_v2, %s4351_s6  ;;  %v1283_v2 = vstv %s2572_s24  ;;  %s2581_s24 = sld [smem:[#allocation6 + $0x20]] }
 0x210   : > { %1218 = vrot.lane.b32.xlu0 %v1211_v25, %s4350_s5  ;;  %v690_v25 = vadd.f32 %v3512_v3, %v3459_v57  ;;  %v1284_v14 = vmul.f32 %v1283_v2, %v3102_v59  ;;  %v1286_v13 = vmul.f32 %v1283_v2, %v3184_v40  ;;  %v916_v59 = vadd.f32 %v3561_v32, %v897_v0  ;;  %v3643_v32 = vld [vmem:[#allocation4] sm:$0xff] }
 0x211   : > { %v3612_v4 = vpop.permute.xlu2 %1019  ;;  %v950_v11 = vpop.permute.xlu1 %949  ;;  %v1303_v39 = vmul.f32 %v3643_v32, %v1302_v29 }
 0x212   : > { %v929_v63 = vpop.permute.xlu0 %928  ;;  %v703_v57 = vadd.f32 %v3484_v53, %v690_v25 }
 0x214   : > { %v716_v53 = vadd.f32 %v3510_v52, %v703_v57 }
 0x217   : > { %1271 = vrot.lane.b32.xlu2 %v1265_v54, %s4326_s25  ;;  %1275 = vrot.lane.b32.xlu1 %v1267_v41, %s4326_s25  ;;  %v899_v54 = vadd.f32 %v893_v42, %v3577_v51  ;;  %v689_v41 = vadd.f32 %v3472_v31, %v3466_v34  ;;  %v917_v34 = vadd.f32 %v910_v36, %v898_v1 }
 0x218   : > { %1237 = vrot.lane.b32.xlu0 %v1230_v26, %s4351_s6 }
 0x219   : > { %v3620_v20 = vpop.permute.xlu2 %1038  ;;  %v969_v16 = vpop.permute.xlu1 %968  ;;  %v918_v3 = vadd.f32 %v912_v46, %v899_v54  ;;  %v936_v25 = vadd.f32 %v929_v63, %v917_v34 }
 0x21a   : > { %v948_v30 = vpop.permute.xlu0 %947 }
 0x21b   : > { %v937_v42 = vadd.f32 %v931_v44, %v918_v3 }
 0x21d   : > { %v956_v7 = vadd.f32 %v950_v11, %v937_v42 }
 0x21f   : > { %1290 = vrot.lane.b32.xlu2 %v1284_v14, %s4325_s0  ;;  %1294 = vrot.lane.b32.xlu1 %v1286_v13, %s4325_s0  ;;  %v702_v14 = vadd.f32 %v3498_v28, %v689_v41  ;;  %v935_v13 = vadd.f32 %v3573_v6, %v916_v59  ;;  %v1305_v28 = vmul.f32 %v1302_v29, %v3184_v40 }
 0x220   : > { %1273 = vrot.lane.b32.xlu0 %v1266_v23, %s4326_s25  ;;  %v729_v23 = vadd.f32 %v3537_v19, %v716_v53  ;;  %v1285_v6 = vmul.f32 %v1283_v2, %v3137_v18  ;;  %v975_v36 = vadd.f32 %v969_v16, %v956_v7  ;;  %v1321_v2 = vstv %s2574_s17  ;;  %v3681_v7 = vld [vmem:[#allocation4 + $0x8] sm:$0xff]  ;;  %s2583_s17 = sld [smem:[#allocation6 + $0x22]] }
 0x221   : > { %v3637_v26 = vpop.permute.xlu2 %1057  ;;  %v988_v27 = vpop.permute.xlu1 %987  ;;  %v715_v31 = vadd.f32 %v3525_v17, %v702_v14  ;;  %v954_v46 = vadd.f32 %v3586_v43, %v935_v13  ;;  %v955_v17 = vadd.f32 %v948_v30, %v936_v25  ;;  %v3659_v30 = vstv %s2563_s15  ;;  %s2627_s15 = sld [smem:[#allocation6 + $0x4e]] }
 0x222   : > { %v967_v51 = vpop.permute.xlu0 %966  ;;  %v994_v11 = vadd.f32 %v988_v27, %v975_v36  ;;  %v1324_v3 = vmul.f32 %v1321_v2, %v3184_v40  ;;  %v1304_v14 = vmul.f32 %v1302_v29, %v3137_v18  ;;  %v1340_v18 = vstv %s2575_s4  ;;  %s2628_s4 = sld [smem:[#allocation6 + $0x4f]] }
 0x223   : > { %v973_v44 = vadd.f32 %v3596_v48, %v954_v46  ;;  %v728_v52 = vadd.f32 %v3496_v24, %v715_v31  ;;  %v974_v63 = vadd.f32 %v967_v51, %v955_v17  ;;  %v742_v48 = vadd.f32 %v3508_v35, %v729_v23 }
 0x224   : > { %v1322_v24 = vmul.f32 %v3643_v32, %v1321_v2  ;;  %v1009_v35 = vmul.f32 %v3643_v32, %v3659_v30  ;;  %v1343_v46 = vmul.f32 %v1340_v18, %v3184_v40  ;;  %v1323_v25 = vmul.f32 %v3681_v7, %v1321_v2 }
 0x225   : > { %v992_v43 = vadd.f32 %v3604_v15, %v973_v44  ;;  %v741_v41 = vadd.f32 %v3522_v21, %v728_v52  ;;  %v1002_v15 = vrot.slane %v994_v11, 1  ;;  %v755_v1 = vadd.f32 %v3535_v37, %v742_v48 }
 0x226   : > { %v1028_v21 = vadd.f32 %v3612_v4, %v1009_v35  ;;  %v1359_v44 = vstv %s2576_s1  ;;  %v1127_v36 = vmul.f32 %v3198_v45, %v3354_v33  ;;  %v1342_v11 = vmul.f32 %v3681_v7, %v1340_v18  ;;  %v3711_v35 = vld [vmem:[#allocation4 + $0x28] sm:$0x3f]  ;;  %s2629_s1 = sld [smem:[#allocation6 + $0x50]] }
 0x227   : > { %1309 = vrot.lane.b32.xlu2 %v1303_v39, %s4333_s29  ;;  %1313 = vrot.lane.b32.xlu1 %v1305_v28, %s4333_s29  ;;  %v999_v57 = vrot.slane %v992_v43, 1  ;;  %v754_v27 = vadd.f32 %v3551_v22, %v741_v41  ;;  %v1341_v39 = vmul.f32 %v3643_v32, %v1340_v18  ;;  %v1360_v52 = vmul.f32 %v3643_v32, %v1359_v44 }
 0x228   : > { %1292 = vrot.lane.b32.xlu0 %v1285_v6, %s4325_s0  ;;  %v1047_v31 = vadd.f32 %v3620_v20, %v1028_v21  ;;  %v1362_v43 = vmul.f32 %v1359_v44, %v3184_v40  ;;  %v1385_v48 = vstv %s2620_s11  ;;  %v1011_v41 = vmul.f32 %v3659_v30, %v3184_v40  ;;  %s2630_s11 = sld [smem:[#allocation6 + $0x51]] }
 0x229   : > { %v1077_v0 = vpop.permute.xlu2 %1076  ;;  %v3656_v19 = vpop.permute.xlu1 %1023  ;;  %v1010_v21 = vmul.f32 %v3681_v7, %v3659_v30 }
 0x22a   : > { %v986_v16 = vpop.permute.xlu0 %985  ;;  %v1066_v29 = vadd.f32 %v3637_v26, %v1047_v31 }
 0x22b   : > { %v993_v54 = vadd.f32 %v986_v16, %v974_v63  ;;  %v1386_v16 = vmul.f32 %v1385_v48, %v3354_v33 }
 0x22c   : > { %v1085_v4 = vadd.f32 %v1077_v0, %v1066_v29 }
 0x22d   : > { %v1000_v59 = vrot.slane %v993_v54, 1  ;;  %v1388_v54 = vmul.f32 %v1385_v48, %v3177_v38 }
 0x22f   : > { %v1001_v51 = vsel %vm998_vm4, %v999_v57, %v1000_v59  ;;  %v1003_v13 = vsel %vm998_vm4, %v1000_v59, %v1002_v15  ;;  %1328 = vrot.lane.b32.xlu2 %v1322_v24, %s4349_s10  ;;  %1332 = vrot.lane.b32.xlu1 %v1324_v3, %s4349_s10  ;;  %v1361_v24 = vmul.f32 %v3681_v7, %v1359_v44 }
 0x230   : > { %v3672_v42 = vadd.f32 %v1001_v51, %v754_v27  ;;  %v3674_v34 = vadd.f32 %v1003_v13, %v755_v1  ;;  %1311 = vrot.lane.b32.xlu0 %v1304_v14, %s4333_s29  ;;  %v1030_v57 = vadd.f32 %v3656_v19, %v1011_v41  ;;  %v1404_v27 = vstv %s2621_s19  ;;  %v3714_v13 = vld [vmem:[#allocation4 + $0x20] sm:$0xff]  ;;  %s2631_s19 = sld [smem:[#allocation6 + $0x52]] }
 0x231   : > { %v1096_v37 = vpop.permute.xlu2 %1095  ;;  %v1043_v22 = vpop.permute.xlu1 %1042  ;;  %v1405_v40 = vmul.f32 %v1404_v27, %v3354_v33  ;;  %v1407_v14 = vmul.f32 %v3711_v35, %v1404_v27  ;;  %v1387_v19 = vmul.f32 %v3714_v13, %v1385_v48 }
 0x232   : > { %v1022_v53 = vpop.permute.xlu0 %1021  ;;  %v1104_v28 = vadd.f32 %v1096_v37, %v1085_v4  ;;  %v1049_v3 = vadd.f32 %v1043_v22, %v1030_v57 }
 0x233   : > { %v1029_v22 = vadd.f32 %v1022_v53, %v1010_v21 }
 0x237   : > { %1347 = vrot.lane.b32.xlu2 %v1341_v39, %s4350_s5  ;;  %1351 = vrot.lane.b32.xlu1 %v1343_v46, %s4350_s5  ;;  %v1423_v46 = vstv %s2622_s22  ;;  %s2585_s22 = sld [smem:[#allocation6 + $0x24]] }
 0x238   : > { %1330 = vrot.lane.b32.xlu0 %v1323_v25, %s4349_s10  ;;  %v1425_v48 = vmul.f32 %v3714_v13, %v1423_v46 }
 0x239   : > { %v1115_v20 = vpop.permute.xlu2 %1114  ;;  %v1062_v23 = vpop.permute.xlu1 %1061 }
 0x23a   : > { %v1123_v6 = vadd.f32 %v1115_v20, %v1104_v28  ;;  %v1041_v26 = vpop.permute.xlu0 %1040  ;;  %v1068_v38 = vadd.f32 %v1062_v23, %v1049_v3  ;;  %v1424_v28 = vmul.f32 %v1423_v46, %v3354_v33  ;;  %v1426_v20 = vmul.f32 %v3711_v35, %v1423_v46 }
 0x23b   : > { %v1048_v4 = vadd.f32 %v1041_v26, %v1029_v22  ;;  %v1406_v23 = vmul.f32 %v3714_v13, %v1404_v27  ;;  %v1516_v22 = vstv %s2578_s30  ;;  %s2587_s30 = sld [smem:[#allocation6 + $0x26]] }
 0x23c   : > { %v3689_v17 = vadd.f32 %v1127_v36, %v1123_v6  ;;  %v1442_v36 = vstv %s2623_s20  ;;  %s2586_s20 = sld [smem:[#allocation6 + $0x25]] }
 0x23f   : > { %1366 = vrot.lane.b32.xlu2 %v1360_v52, %s4351_s6  ;;  %1370 = vrot.lane.b32.xlu1 %v1362_v43, %s4351_s6  ;;  %v1128_v43 = vmul.f32 %v3714_v13, %v3198_v45 }
 0x240   : > { %1349 = vrot.lane.b32.xlu0 %v1342_v11, %s4350_s5  ;;  %v1443_v11 = vmul.f32 %v1442_v36, %v3354_v33 }
 0x241   : > { %v3697_v63 = vpop.permute.xlu2 %1140  ;;  %v1081_v0 = vpop.permute.xlu1 %1080 }
 0x242   : > { %v1060_v2 = vpop.permute.xlu0 %1059  ;;  %v1087_v51 = vadd.f32 %v1081_v0, %v1068_v38  ;;  %v1445_v0 = vmul.f32 %v3711_v35, %v1442_v36  ;;  %v1480_v38 = vstv %s2625_s23  ;;  %s2592_s23 = sld [smem:[#allocation6 + $0x2b]] }
 0x243   : > { %v1067_v30 = vadd.f32 %v1060_v2, %v1048_v4 }
 0x247   : > { %1392 = vrot.lane.b32.xlu2 %v1386_v16, %s4326_s25  ;;  %1396 = vrot.lane.b32.xlu1 %v1388_v54, %s4326_s25 }
 0x248   : > { %1368 = vrot.lane.b32.xlu0 %v1361_v24, %s4351_s6  ;;  %v1461_v24 = vstv %s2624_s18  ;;  %s2577_s18 = sld [smem:[#allocation6 + $0x1c]] }
 0x249   : > { %v3708_v15 = vpop.permute.xlu2 %1159  ;;  %v1100_v59 = vpop.permute.xlu1 %1099  ;;  %v1462_v45 = vmul.f32 %v1461_v24, %v3354_v33  ;;  %v1464_v57 = vmul.f32 %v3711_v35, %v1461_v24 }
 0x24a   : > { %v1079_v1 = vpop.permute.xlu0 %1078  ;;  %v1106_v37 = vadd.f32 %v1100_v59, %v1087_v51  ;;  %v1444_v59 = vmul.f32 %v3714_v13, %v1442_v36  ;;  %v1463_v51 = vmul.f32 %v3714_v13, %v1461_v24 }
 0x24b   : > { %v1086_v6 = vadd.f32 %v1079_v1, %v1067_v30 }
 0x24f   : > { %1411 = vrot.lane.b32.xlu2 %v1405_v40, %s4325_s0  ;;  %1415 = vrot.lane.b32.xlu1 %v1407_v14, %s4325_s0  ;;  %v1481_v40 = vmul.f32 %v1480_v38, %v3354_v33  ;;  %v1483_v14 = vmul.f32 %v3711_v35, %v1480_v38 }
 0x250   : > { %1394 = vrot.lane.b32.xlu0 %v1387_v19, %s4326_s25 }
 0x251   : > { %v3722_v31 = vpop.permute.xlu2 %1178  ;;  %v1119_v18 = vpop.permute.xlu1 %1118 }
 0x252   : > { %v1125_v29 = vadd.f32 %v1119_v18, %v1106_v37  ;;  %v1098_v39 = vpop.permute.xlu0 %1097  ;;  %v1517_v18 = vmul.f32 %v3643_v32, %v1516_v22 }
 0x253   : > { %v1105_v53 = vadd.f32 %v1098_v39, %v1086_v6  ;;  %v1482_v39 = vmul.f32 %v3714_v13, %v1480_v38  ;;  %v1518_v6 = vmul.f32 %v3681_v7, %v1516_v22 }
 0x254   : > { %v3725_v25 = vadd.f32 %v3205_v47, %v1125_v29  ;;  %v3758_v29 = vld [vmem:[#allocation4 + $0x10] sm:$0x3f] }
 0x255   : > { %v1519_v33 = vmul.f32 %v3758_v29, %v1516_v22 }
 0x257   : > { %1430 = vrot.lane.b32.xlu2 %v1424_v28, %s4333_s29  ;;  %1434 = vrot.lane.b32.xlu1 %v1426_v20, %s4333_s29  ;;  %v1535_v28 = vstv %s2579_s7  ;;  %s2593_s7 = sld [smem:[#allocation6 + $0x2c]] }
 0x258   : > { %1413 = vrot.lane.b32.xlu0 %v1406_v23, %s4325_s0  ;;  %v1536_v20 = vmul.f32 %v3643_v32, %v1535_v28  ;;  %v1538_v23 = vmul.f32 %v3758_v29, %v1535_v28 }
 0x259   : > { %v3733_v44 = vpop.permute.xlu2 %1197  ;;  %v1145_v26 = vpop.permute.xlu1 %1144 }
 0x25a   : > { %v1117_v47 = vpop.permute.xlu0 %1116 }
 0x25b   : > { %v1124_v52 = vadd.f32 %v1117_v47, %v1105_v53  ;;  %v1149_v53 = vadd.f32 %v3697_v63, %v3689_v17  ;;  %v1151_v47 = vadd.f32 %v1145_v26, %v3725_v25  ;;  %v3776_v25 = vstv %s2570_s14  ;;  %s2594_s14 = sld [smem:[#allocation6 + $0x2d]] }
 0x25d   : > { %v1131_v2 = vadd.f32 %v1128_v43, %v1124_v52  ;;  %v1168_v36 = vadd.f32 %v3708_v15, %v1149_v53 }
 0x25f   : > { %1449 = vrot.lane.b32.xlu2 %v1443_v11, %s4349_s10  ;;  %1453 = vrot.lane.b32.xlu1 %v1445_v0, %s4349_s10 }
 0x260   : > { %1432 = vrot.lane.b32.xlu0 %v1425_v48, %s4333_s29  ;;  %v1554_v48 = vstv %s2580_s8  ;;  %s2588_s8 = sld [smem:[#allocation6 + $0x27]] }
 0x261   : > { %v3743_v16 = vpop.permute.xlu2 %1216  ;;  %v1164_v54 = vpop.permute.xlu1 %1163  ;;  %v1555_v26 = vmul.f32 %v3643_v32, %v1554_v48  ;;  %v1557_v15 = vmul.f32 %v3758_v29, %v1554_v48 }
 0x262   : > { %v1143_v41 = vpop.permute.xlu0 %1142  ;;  %v1170_v52 = vadd.f32 %v1164_v54, %v1151_v47 }
 0x263   : > { %v1150_v43 = vadd.f32 %v1143_v41, %v1131_v2  ;;  %v1537_v2 = vmul.f32 %v3681_v7, %v1535_v28 }
 0x267   : > { %1468 = vrot.lane.b32.xlu2 %v1462_v45, %s4350_s5  ;;  %1472 = vrot.lane.b32.xlu1 %v1464_v57, %s4350_s5  ;;  %v1187_v45 = vadd.f32 %v3722_v31, %v1168_v36  ;;  %v1261_v31 = vmul.f32 %v3643_v32, %v3776_v25 }
 0x268   : > { %1451 = vrot.lane.b32.xlu0 %v1444_v59, %s4349_s10 }
 0x269   : > { %v1236_v3 = vpop.permute.xlu2 %1235  ;;  %v1183_v1 = vpop.permute.xlu1 %1182  ;;  %v1206_v57 = vadd.f32 %v3733_v44, %v1187_v45  ;;  %v1263_v45 = vmul.f32 %v3758_v29, %v3776_v25 }
 0x26a   : > { %v1162_v27 = vpop.permute.xlu0 %1161  ;;  %v1189_v17 = vadd.f32 %v1183_v1, %v1170_v52 }
 0x26b   : > { %v1169_v63 = vadd.f32 %v1162_v27, %v1150_v43  ;;  %v1225_v54 = vadd.f32 %v3743_v16, %v1206_v57  ;;  %v3808_v57 = vld [vmem:[#allocation4 + $0x18] sm:$0xff] }
 0x26d   : > { %v1244_v44 = vadd.f32 %v1236_v3, %v1225_v54  ;;  %v1556_v3 = vmul.f32 %v3681_v7, %v1554_v48 }
 0x26f   : > { %1487 = vrot.lane.b32.xlu2 %v1481_v40, %s4351_s6  ;;  %1491 = vrot.lane.b32.xlu1 %v1483_v14, %s4351_s6 }
 0x270   : > { %1470 = vrot.lane.b32.xlu0 %v1463_v51, %s4350_s5 }
 0x271   : > { %v1272_v19 = vpop.permute.xlu2 %1271  ;;  %v1202_v21 = vpop.permute.xlu1 %1201 }
 0x272   : > { %v1181_v37 = vpop.permute.xlu0 %1180  ;;  %v1208_v59 = vadd.f32 %v1202_v21, %v1189_v17  ;;  %v1573_v21 = vstv %s2581_s24  ;;  %s2589_s24 = sld [smem:[#allocation6 + $0x28]] }
 0x273   : > { %v1188_v38 = vadd.f32 %v1181_v37, %v1169_v63  ;;  %v1280_v37 = vadd.f32 %v1272_v19, %v1261_v31  ;;  %v1576_v28 = vmul.f32 %v3758_v29, %v1573_v21 }
 0x277   : > { %1523 = vrot.lane.b32.xlu2 %v1517_v18, %s4326_s25  ;;  %1527 = vrot.lane.b32.xlu1 %v1519_v33, %s4326_s25  ;;  %v1574_v33 = vmul.f32 %v3643_v32, %v1573_v21 }
 0x278   : > { %1489 = vrot.lane.b32.xlu0 %v1482_v39, %s4351_s6  ;;  %v1251_v39 = vrot.slane %v1244_v44, 2 }
 0x279   : > { %v1291_v46 = vpop.permute.xlu2 %1290  ;;  %v1221_v4 = vpop.permute.xlu1 %1220 }
 0x27a   : > { %v1200_v30 = vpop.permute.xlu0 %1199  ;;  %v1227_v41 = vadd.f32 %v1221_v4, %v1208_v59  ;;  %v1299_v18 = vadd.f32 %v1291_v46, %v1280_v37  ;;  %v1379_v59 = vmul.f32 %v3808_v57, %v3215_v49 }
 0x27b   : > { %v1207_v40 = vadd.f32 %v1200_v30, %v1188_v38 }
 0x27f   : > { %1542 = vrot.lane.b32.xlu2 %v1536_v20, %s4325_s0  ;;  %1546 = vrot.lane.b32.xlu1 %v1538_v23, %s4325_s0 }
 0x280   : > { %1525 = vrot.lane.b32.xlu0 %v1518_v6, %s4326_s25 }
 0x281   : > { %v1310_v11 = vpop.permute.xlu2 %1309  ;;  %v1240_v0 = vpop.permute.xlu1 %1239 }
 0x282   : > { %v1219_v24 = vpop.permute.xlu0 %1218  ;;  %v1246_v1 = vadd.f32 %v1240_v0, %v1227_v41  ;;  %v1318_v20 = vadd.f32 %v1310_v11, %v1299_v18  ;;  %v1592_v11 = vstv %s2582_s28  ;;  %v1262_v18 = vmul.f32 %v3681_v7, %v3776_v25  ;;  %s2595_s28 = sld [smem:[#allocation6 + $0x2e]] }
 0x283   : > { %v1226_v27 = vadd.f32 %v1219_v24, %v1207_v40  ;;  %v1593_v0 = vmul.f32 %v3643_v32, %v1592_v11  ;;  %v1595_v48 = vmul.f32 %v3758_v29, %v1592_v11  ;;  %v1575_v24 = vmul.f32 %v3681_v7, %v1573_v21 }
 0x284   : > { %v1254_v4 = vrot.slane %v1246_v1, 2  ;;  %v1594_v40 = vmul.f32 %v3681_v7, %v1592_v11  ;;  %v1637_v21 = vstv %s2627_s15  ;;  %s2596_s15 = sld [smem:[#allocation6 + $0x2f]] }
 0x285   : > { %v1638_v37 = vmul.f32 %v3808_v57, %v1637_v21 }
 0x287   : > { %1561 = vrot.lane.b32.xlu2 %v1555_v26, %s4333_s29  ;;  %1565 = vrot.lane.b32.xlu1 %v1557_v15, %s4333_s29  ;;  %v1611_v26 = vstv %s2583_s17  ;;  %s2590_s17 = sld [smem:[#allocation6 + $0x29]] }
 0x288   : > { %1544 = vrot.lane.b32.xlu0 %v1537_v2, %s4325_s0  ;;  %v1612_v2 = vmul.f32 %v3643_v32, %v1611_v26  ;;  %v1614_v54 = vmul.f32 %v3758_v29, %v1611_v26 }
 0x289   : > { %v1329_v14 = vpop.permute.xlu2 %1328  ;;  %v1276_v51 = vpop.permute.xlu1 %1275 }
 0x28a   : > { %v1238_v22 = vpop.permute.xlu0 %1237  ;;  %v1337_v19 = vadd.f32 %v1329_v14, %v1318_v20  ;;  %v1282_v38 = vadd.f32 %v1276_v51, %v1263_v45  ;;  %v1656_v20 = vstv %s2628_s4  ;;  %s2597_s4 = sld [smem:[#allocation6 + $0x30]] }
 0x28b   : > { %v1245_v16 = vadd.f32 %v1238_v22, %v1226_v27  ;;  %v1640_v22 = vmul.f32 %v3711_v35, %v1637_v21 }
 0x28d   : > { %v1252_v30 = vrot.slane %v1245_v16, 2  ;;  %v1613_v16 = vmul.f32 %v3681_v7, %v1611_v26 }
 0x28f   : > { %v1253_v23 = vsel %vm1250_vm5, %v1251_v39, %v1252_v30  ;;  %v1255_v6 = vsel %vm1250_vm5, %v1252_v30, %v1254_v4  ;;  %1580 = vrot.lane.b32.xlu2 %v1574_v33, %s4349_s10  ;;  %1584 = vrot.lane.b32.xlu1 %v1576_v28, %s4349_s10 }
 0x290   : > { %v3794_v46 = vadd.f32 %v1253_v23, %v3672_v42  ;;  %v3797_v53 = vadd.f32 %v1255_v6, %v3674_v34  ;;  %1563 = vrot.lane.b32.xlu0 %v1556_v3, %s4333_s29  ;;  %v1657_v6 = vmul.f32 %v3808_v57, %v1656_v20 }
 0x291   : > { %v1348_v47 = vpop.permute.xlu2 %1347  ;;  %v1295_v36 = vpop.permute.xlu1 %1294 }
 0x292   : > { %v1356_v52 = vadd.f32 %v1348_v47, %v1337_v19  ;;  %v1274_v43 = vpop.permute.xlu0 %1273  ;;  %v1301_v41 = vadd.f32 %v1295_v36, %v1282_v38  ;;  %v1659_v19 = vmul.f32 %v3711_v35, %v1656_v20  ;;  %v1639_v47 = vmul.f32 %v3714_v13, %v1637_v21 }
 0x293   : > { %v1281_v3 = vadd.f32 %v1274_v43, %v1262_v18 }
 0x297   : > { %1599 = vrot.lane.b32.xlu2 %v1593_v0, %s4350_s5  ;;  %1603 = vrot.lane.b32.xlu1 %v1595_v48, %s4350_s5 }
 0x298   : > { %1582 = vrot.lane.b32.xlu0 %v1575_v24, %s4349_s10  ;;  %v1675_v24 = vstv %s2629_s1  ;;  %s2584_s1 = sld [smem:[#allocation6 + $0x23]] }
 0x299   : > { %v1367_v42 = vpop.permute.xlu2 %1366  ;;  %v1314_v34 = vpop.permute.xlu1 %1313  ;;  %v1676_v45 = vmul.f32 %v3808_v57, %v1675_v24 }
 0x29a   : > { %v1375_v17 = vadd.f32 %v1367_v42, %v1356_v52  ;;  %v1293_v63 = vpop.permute.xlu0 %1292  ;;  %v1320_v31 = vadd.f32 %v1314_v34, %v1301_v41  ;;  %v1380_v41 = vmul.f32 %v3714_v13, %v3215_v49  ;;  %v1713_v49 = vstv %s2631_s19  ;;  %s2910_s19 = smov 112  }
 0x29b   : > { %v1300_v23 = vadd.f32 %v1293_v63, %v1281_v3  ;;  %v1658_v63 = vmul.f32 %v3714_v13, %v1656_v20  ;;  %v1716_v18 = vmul.f32 %v3711_v35, %v1713_v49  ;;  %v3855_v3 = vstv %s2585_s22  ;;  %s2655_s22 = sshll.u32 %s2947_s13, 3  ;;  %s2441_s13 = scalar_lea.sflag [#allocation8], %s3023_s27 }
 0x29c   : > { %v1382_v15 = vadd.f32 %v1379_v59, %v1375_v17  ;;  %v1678_v17 = vmul.f32 %v3711_v35, %v1675_v24 }
 0x29f   : > { %1618 = vrot.lane.b32.xlu2 %v1612_v2, %s4351_s6  ;;  %1622 = vrot.lane.b32.xlu1 %v1614_v54, %s4351_s6  ;;  %v1694_v54 = vstv %s2630_s11  ;;  %s2591_s11 = sld [smem:[#allocation6 + $0x2a]] }
 0x2a0   : > { %1601 = vrot.lane.b32.xlu0 %v1594_v40, %s4350_s5  ;;  %v1695_v40 = vmul.f32 %v3808_v57, %v1694_v54 }
 0x2a1   : > { %v1393_v44 = vpop.permute.xlu2 %1392  ;;  %v1333_v1 = vpop.permute.xlu1 %1332 }
 0x2a2   : > { %v1401_v27 = vadd.f32 %v1393_v44, %v1382_v15  ;;  %v1339_v14 = vadd.f32 %v1333_v1, %v1320_v31  ;;  %v1312_v51 = vpop.permute.xlu0 %1311  ;;  %v1697_v31 = vmul.f32 %v3711_v35, %v1694_v54  ;;  %v1677_v1 = vmul.f32 %v3714_v13, %v1675_v24 }
 0x2a3   : > { %v1319_v36 = vadd.f32 %v1312_v51, %v1300_v23  ;;  %v3857_v23 = vstv %s2586_s20 }
 0x2a7   : > { %1644 = vrot.lane.b32.xlu2 %v1638_v37, %s4326_s25  ;;  %1648 = vrot.lane.b32.xlu1 %v1640_v22, %s4326_s25 }
 0x2a8   : > { %1620 = vrot.lane.b32.xlu0 %v1613_v16, %s4351_s6  ;;  %v1714_v16 = vmul.f32 %v3808_v57, %v1713_v49 }
 0x2a9   : > { %v1412_v33 = vpop.permute.xlu2 %1411  ;;  %v1352_v39 = vpop.permute.xlu1 %1351 }
 0x2aa   : > { %v1420_v4 = vadd.f32 %v1412_v33, %v1401_v27  ;;  %v1358_v30 = vadd.f32 %v1352_v39, %v1339_v14  ;;  %v1331_v28 = vpop.permute.xlu0 %1330  ;;  %v1696_v33 = vmul.f32 %v3714_v13, %v1694_v54  ;;  %v3884_v54 = vstv %s2593_s7 }
 0x2ab   : > { %v1338_v25 = vadd.f32 %v1331_v28, %v1319_v36  ;;  %v1715_v36 = vmul.f32 %v3714_v13, %v1713_v49  ;;  %v2040_v49 = vmul.f32 %v3681_v7, %v3884_v54 }
 0x2af   : > { %1663 = vrot.lane.b32.xlu2 %v1657_v6, %s4325_s0  ;;  %1667 = vrot.lane.b32.xlu1 %v1659_v19, %s4325_s0  ;;  %v1768_v6 = vmul.f32 %v3643_v32, %v3855_v3  ;;  %v1787_v19 = vmul.f32 %v3643_v32, %v3857_v23 }
 0x2b0   : > { %1646 = vrot.lane.b32.xlu0 %v1639_v47, %s4326_s25  ;;  %v3863_v47 = vstv %s2577_s18 }
 0x2b1   : > { %v1431_v52 = vpop.permute.xlu2 %1430  ;;  %v1371_v11 = vpop.permute.xlu1 %1370 }
 0x2b2   : > { %v1439_v0 = vadd.f32 %v1431_v52, %v1420_v4  ;;  %v1377_v48 = vadd.f32 %v1371_v11, %v1358_v30  ;;  %v1350_v43 = vpop.permute.xlu0 %1349 }
 0x2b3   : > { %v1357_v42 = vadd.f32 %v1350_v43, %v1338_v25  ;;  %v1513_v25 = vmul.f32 %v3643_v32, %v3863_v47 }
 0x2b4   : > { %v1384_v34 = vadd.f32 %v3221_v50, %v1377_v48 }
 0x2b7   : > { %1682 = vrot.lane.b32.xlu2 %v1676_v45, %s4333_s29  ;;  %1686 = vrot.lane.b32.xlu1 %v1678_v17, %s4333_s29  ;;  %v1769_v17 = vmul.f32 %v3681_v7, %v3855_v3 }
 0x2b8   : > { %1665 = vrot.lane.b32.xlu0 %v1658_v63, %s4325_s0 }
 0x2b9   : > { %v1450_v26 = vpop.permute.xlu2 %1449  ;;  %v1397_v59 = vpop.permute.xlu1 %1396 }
 0x2ba   : > { %v1458_v38 = vadd.f32 %v1450_v26, %v1439_v0  ;;  %v1403_v15 = vadd.f32 %v1397_v59, %v1384_v34  ;;  %v1369_v2 = vpop.permute.xlu0 %1368  ;;  %v1788_v34 = vmul.f32 %v3681_v7, %v3857_v23 }
 0x2bb   : > { %v1376_v50 = vadd.f32 %v1369_v2, %v1357_v42  ;;  %v3871_v42 = vstv %s2592_s23  ;;  %v3882_v2 = vstv %s2587_s30  ;;  %s2452_s23 = scalar_lea.hbm %s4279_s2, %s2655_s22  ;;  %s4386_s30 = sshll.u32 %s3023_s27, 3 }
 0x2bc   : > { %v2021_v45 = vmul.f32 %v3681_v7, %v3871_v42  ;;  %s175_s7 = scalar_lea.vmem [#allocation11], %s4386_s30 }
 0x2bd   : > { %v1383_v44 = vadd.f32 %v1380_v41, %v1376_v50  ;;  %v1806_v41 = vmul.f32 %v3643_v32, %v3882_v2 }
 0x2bf   : > { %1701 = vrot.lane.b32.xlu2 %v1695_v40, %s4349_s10  ;;  %1705 = vrot.lane.b32.xlu1 %v1697_v31, %s4349_s10  ;;  %v2039_v40 = vmul.f32 %v3643_v32, %v3884_v54  ;;  %v2020_v31 = vmul.f32 %v3643_v32, %v3871_v42 }
 0x2c0   : > { %1684 = vrot.lane.b32.xlu0 %v1677_v1, %s4333_s29 }
 0x2c1   : > { %v1469_v27 = vpop.permute.xlu2 %1468  ;;  %v1416_v14 = vpop.permute.xlu1 %1415 }
 0x2c2   : > { %v1477_v51 = vadd.f32 %v1469_v27, %v1458_v38  ;;  %v1422_v21 = vadd.f32 %v1416_v14, %v1403_v15  ;;  %v1395_v37 = vpop.permute.xlu0 %1394 }
 0x2c3   : > { %v1402_v22 = vadd.f32 %v1395_v37, %v1383_v44  ;;  %v3895_v37 = vstv %s2588_s8  ;;  %s2454_s8 = sshll.u32 %s175_s7, 4  ;;  %s2455_s8 = int_to_ptr.vmem [resolvable:$true] %s2454_s8 }
 0x2c7   : > { %1720 = vrot.lane.b32.xlu2 %v1714_v16, %s4350_s5  ;;  %1724 = vrot.lane.b32.xlu1 %v1716_v18, %s4350_s5  ;;  %v1807_v16 = vmul.f32 %v3681_v7, %v3882_v2  ;;  %v1515_v18 = vmul.f32 %v3758_v29, %v3863_v47 }
 0x2c8   : > { %1703 = vrot.lane.b32.xlu0 %v1696_v33, %s4349_s10 }
 0x2c9   : > { %v1488_v39 = vpop.permute.xlu2 %1487  ;;  %v1435_v4 = vpop.permute.xlu1 %1434 }
 0x2ca   : > { %v3853_v30 = vadd.f32 %v1488_v39, %v1477_v51  ;;  %v1441_v28 = vadd.f32 %v1435_v4, %v1422_v21  ;;  %v1414_v20 = vpop.permute.xlu0 %1413  ;;  %v3908_v4 = vstv %s2594_s14  ;;  %s2456_s14 = sshll.u32 %s2452_s23, 4  ;;  %s2457_s14 = int_to_ptr.hbm [resolvable:$true] %s2456_s14 }
 0x2cb   : > { %v1421_v35 = vadd.f32 %v1414_v20, %v1402_v22  ;;  %v1826_v22 = vmul.f32 %v3681_v7, %v3895_v37 }
 0x2cf   : > { %1774 = vrot.lane.b32.xlu2 %v1768_v6, %s4326_s25  ;;  %1793 = vrot.lane.b32.xlu1 %v1787_v19, %s4325_s0  ;;  %v3910_v6 = vstv %s2589_s24  ;;  %s2829_s24 = sshra.s32 %s2457_s14, 4  ;;  %s2830_s24 = int_to_ptr.hbm [resolvable:$true] %s2829_s24 }
 0x2d0   : > { %1722 = vrot.lane.b32.xlu0 %v1715_v36, %s4350_s5  ;;  %v2058_v36 = vmul.f32 %v3643_v32, %v3908_v4  ;;  %p2836_p9 = scmp.lt.s32.totalorder %s2830_s24, %s4279_s2 }
 0x2d1   : > { %v1524_v52 = vpop.permute.xlu2 %1523  ;;  %v1454_v11 = vpop.permute.xlu1 %1453 }
 0x2d2   : > { %v1532_v0 = vadd.f32 %v1524_v52, %v1513_v25  ;;  %v1460_v48 = vadd.f32 %v1454_v11, %v1441_v28  ;;  %v1433_v43 = vpop.permute.xlu0 %1432  ;;  %v1503_v25 = vrot.slane %v3853_v30, 3 }
 0x2d3   : > { %v1440_v24 = vadd.f32 %v1433_v43, %v1421_v35 }
 0x2d7   : > { %1795 = vrot.lane.b32.xlu2 %v1788_v34, %s4325_s0  ;;  %2028 = vrot.lane.b32.xlu1 %v2021_v45, %s4326_s25 }
 0x2d8   : > { %1776 = vrot.lane.b32.xlu0 %v1769_v17, %s4326_s25 }
 0x2d9   : > { %v1543_v63 = vpop.permute.xlu2 %1542  ;;  %v1473_v26 = vpop.permute.xlu1 %1472 }
 0x2da   : > { %v1551_v59 = vadd.f32 %v1543_v63, %v1532_v0  ;;  %v1479_v38 = vadd.f32 %v1473_v26, %v1460_v48  ;;  %v1452_v15 = vpop.permute.xlu0 %1451  ;;  %v1844_v0 = vmul.f32 %v3643_v32, %v3910_v6  ;;  %v1825_v48 = vmul.f32 %v3643_v32, %v3895_v37 }
 0x2db   : > { %v1459_v50 = vadd.f32 %v1452_v15, %v1440_v24  ;;  %v1514_v63 = vmul.f32 %v3681_v7, %v3863_v47 }
 0x2df   : > { %1812 = vrot.lane.b32.xlu2 %v1806_v41, %s4333_s29  ;;  %2045 = vrot.lane.b32.xlu1 %v2039_v40, %s4325_s0  ;;  %v2059_v41 = vmul.f32 %v3681_v7, %v3908_v4 }
 0x2e0   : > { %2026 = vrot.lane.b32.xlu0 %v2020_v31, %s4326_s25  ;;  %v3941_v31 = vstv %s2590_s17 }
 0x2e1   : > { %v1562_v44 = vpop.permute.xlu2 %1561  ;;  %v1492_v1 = vpop.permute.xlu1 %1491 }
 0x2e2   : > { %v1570_v27 = vadd.f32 %v1562_v44, %v1551_v59  ;;  %v1498_v14 = vadd.f32 %v1492_v1, %v1479_v38  ;;  %v1471_v51 = vpop.permute.xlu0 %1470 }
 0x2e3   : > { %v1478_v21 = vadd.f32 %v1471_v51, %v1459_v50  ;;  %v3930_v50 = vstv %s2595_s28  ;;  %v1631_v51 = vmul.f32 %v3808_v57, %v3236_v55  ;;  %s2831_s28 = scalar_lea.hbm %s2830_s24, 8 }
 0x2e4   : > { %v1506_v52 = vrot.slane %v1498_v14, 3  ;;  %v3943_v14 = vstv %s2596_s15  ;;  %p2832_p1 = scmp.ne.s32.totalorder %s2830_s24, %s2831_s28  ;;  %s2835_s15 = scalar_lea.hbm %s4279_s2, 16 }
 0x2e5   : > { %p2837_p10 = scmp.lt.s32.totalorder %s2835_s15, %s2831_s28 }
 0x2e6   : > { %p2833_p4 = pnand %p2832_p1, %p2992_p3 }
 0x2e7   : > { %2047 = vrot.lane.b32.xlu2 %v2040_v49, %s4325_s0  ;;  %1833 = vrot.lane.b32.xlu1 %v1826_v22, %s4349_s10  ;;  %v1863_v22 = vmul.f32 %v3643_v32, %v3941_v31  ;;  %p2838_p2 = por %p2837_p10, %p2836_p9 }
 0x2e8   : > { %1814 = vrot.lane.b32.xlu0 %v1807_v16, %s4333_s29  ;;  %v2096_v16 = vmul.f32 %v3643_v32, %v3943_v14  ;;  %p2834_p8 = pneg %p2833_p4 }
 0x2e9   : > { %v1581_v33 = vpop.permute.xlu2 %1580  ;;  %v1528_v39 = vpop.permute.xlu1 %1527 }
 0x2ea   : > { %v1589_v28 = vadd.f32 %v1581_v33, %v1570_v27  ;;  %v1534_v20 = vadd.f32 %v1528_v39, %v1515_v18  ;;  %v1490_v35 = vpop.permute.xlu0 %1489  ;;  %v2077_v18 = vmul.f32 %v3643_v32, %v3930_v50  ;;  %p2839_p11 = pnand %p2838_p2, %p2834_p8 }
 0x2eb   : > { %v1497_v19 = vadd.f32 %v1490_v35, %v1478_v21 }
 0x2ed   : > { %v1504_v11 = vrot.slane %v1497_v19, 3 }
 0x2ef   : > { %v1505_v43 = vsel %vm1502_vm6, %v1503_v25, %v1504_v11  ;;  %v1507_v24 = vsel %vm1502_vm6, %v1504_v11, %v1506_v52  ;;  %2064 = vrot.lane.b32.xlu2 %v2058_v36, %s4333_s29  ;;  %1850 = vrot.lane.b32.xlu1 %v1844_v0, %s4350_s5  ;;  %v3956_v36 = vstv %s2597_s4  ;;  %v2097_v25 = vmul.f32 %v3681_v7, %v3943_v14 }
 0x2f0   : > { %v3922_v34 = vadd.f32 %v1505_v43, %v3794_v46  ;;  %v3925_v45 = vadd.f32 %v1507_v24, %v3797_v53  ;;  %1831 = vrot.lane.b32.xlu0 %v1825_v48, %s4349_s10  ;;  %v1845_v46 = vmul.f32 %v3681_v7, %v3910_v6  ;;  %v2078_v53 = vmul.f32 %v3681_v7, %v3930_v50 }
 0x2f1   : > { %v1600_v30 = vpop.permute.xlu2 %1599  ;;  %v1547_v17 = vpop.permute.xlu1 %1546  ;;  %v2116_v52 = vmul.f32 %v3681_v7, %v3956_v36  ;;  %v1864_v11 = vmul.f32 %v3681_v7, %v3941_v31  ;;  %v2115_v7 = vmul.f32 %v3643_v32, %v3956_v36  ;;  %v2142_v32 = vmul.f32 %v3714_v13, %v3282_v5 }
 0x2f2   : > { %v1608_v26 = vadd.f32 %v1600_v30, %v1589_v28  ;;  %v1553_v59 = vadd.f32 %v1547_v17, %v1534_v20  ;;  %v1526_v38 = vpop.permute.xlu0 %1525 }
 0x2f3   : > { %v1533_v15 = vadd.f32 %v1526_v38, %v1514_v63  ;;  %v1889_v63 = vmul.f32 %v3808_v57, %v3255_v58 }
 0x2f7   : > { %1852 = vrot.lane.b32.xlu2 %v1845_v46, %s4350_s5  ;;  %2085 = vrot.lane.b32.xlu1 %v2078_v53, %s4349_s10 }
 0x2f8   : > { %2066 = vrot.lane.b32.xlu0 %v2059_v41, %s4333_s29 }
 0x2f9   : > { %v1619_v47 = vpop.permute.xlu2 %1618  ;;  %v1566_v40 = vpop.permute.xlu1 %1565 }
 0x2fa   : > { %v1627_v44 = vadd.f32 %v1619_v47, %v1608_v26  ;;  %v1572_v1 = vadd.f32 %v1566_v40, %v1553_v59  ;;  %v1545_v27 = vpop.permute.xlu0 %1544  ;;  %v1908_v26 = vmul.f32 %v3808_v57, %v3258_v60  ;;  %v1909_v40 = vmul.f32 %v3714_v13, %v3258_v60 }
 0x2fb   : > { %v1552_v21 = vadd.f32 %v1545_v27, %v1533_v15  ;;  %v1632_v60 = vmul.f32 %v3714_v13, %v3236_v55 }
 0x2fc   : > { %v1634_v49 = vadd.f32 %v1631_v51, %v1627_v44  ;;  %v1890_v44 = vmul.f32 %v3714_v13, %v3255_v58  ;;  %v2160_v58 = vmul.f32 %v3808_v57, %v3263_v62 }
 0x2ff   : > { %1869 = vrot.lane.b32.xlu2 %v1863_v22, %s4351_s6  ;;  %2102 = vrot.lane.b32.xlu1 %v2096_v16, %s4350_s5  ;;  %v1927_v22 = vmul.f32 %v3808_v57, %v3261_v61 }
 0x300   : > { %2083 = vrot.lane.b32.xlu0 %v2077_v18, %s4349_s10  ;;  %v2141_v18 = vmul.f32 %v3808_v57, %v3282_v5  ;;  %v4003_v5 = vstv %s2584_s1 }
 0x301   : > { %v1645_v33 = vpop.permute.xlu2 %1644  ;;  %v1585_v39 = vpop.permute.xlu1 %1584 }
 0x302   : > { %v1653_v28 = vadd.f32 %v1645_v33, %v1634_v49  ;;  %v1591_v20 = vadd.f32 %v1585_v39, %v1572_v1  ;;  %v1564_v35 = vpop.permute.xlu0 %1563 }
 0x303   : > { %v1571_v19 = vadd.f32 %v1564_v35, %v1552_v21 }
 0x307   : > { %2104 = vrot.lane.b32.xlu2 %v2097_v25, %s4350_s5  ;;  %2123 = vrot.lane.b32.xlu1 %v2116_v52, %s4351_s6  ;;  %v1947_v25 = vmul.f32 %v3714_v13, %v3290_v8  ;;  %v1928_v52 = vmul.f32 %v3714_v13, %v3261_v61  ;;  %v2179_v61 = vmul.f32 %v3808_v57, %v3293_v9 }
 0x308   : > { %1871 = vrot.lane.b32.xlu0 %v1864_v11, %s4351_s6  ;;  %v4010_v11 = vld [vmem:[#allocation4] sm:$0xff] }
 0x309   : > { %v1664_v0 = vpop.permute.xlu2 %1663  ;;  %v1604_v48 = vpop.permute.xlu1 %1603 }
 0x30a   : > { %v1672_v43 = vadd.f32 %v1664_v0, %v1653_v28  ;;  %v1610_v24 = vadd.f32 %v1604_v48, %v1591_v20  ;;  %v1583_v30 = vpop.permute.xlu0 %1582  ;;  %v1764_v0 = vmul.f32 %v4010_v11, %v4003_v5 }
 0x30b   : > { %v1590_v17 = vadd.f32 %v1583_v30, %v1571_v19  ;;  %v2161_v19 = vmul.f32 %v3714_v13, %v3263_v62 }
 0x30f   : > { %1895 = vrot.lane.b32.xlu2 %v1889_v63, %s4326_s25  ;;  %1914 = vrot.lane.b32.xlu1 %v1908_v26, %s4325_s0  ;;  %v1733_v63 = vmul.f32 %v3808_v57, %v3296_v10  ;;  %v1946_v26 = vmul.f32 %v3808_v57, %v3290_v8  ;;  %v2180_v8 = vmul.f32 %v3714_v13, %v3293_v9 }
 0x310   : > { %2121 = vrot.lane.b32.xlu0 %v2115_v7, %s4351_s6  ;;  %v1965_v9 = vmul.f32 %v3808_v57, %v3300_v12 }
 0x311   : > { %v1683_v59 = vpop.permute.xlu2 %1682  ;;  %v1623_v38 = vpop.permute.xlu1 %1622 }
 0x312   : > { %v1691_v15 = vadd.f32 %v1683_v59, %v1672_v43  ;;  %v1629_v46 = vadd.f32 %v1623_v38, %v1610_v24  ;;  %v1602_v53 = vpop.permute.xlu0 %1601 }
 0x313   : > { %v1609_v41 = vadd.f32 %v1602_v53, %v1590_v17  ;;  %v1734_v53 = vmul.f32 %v3714_v13, %v3296_v10 }
 0x314   : > { %v1636_v47 = vadd.f32 %v3244_v56, %v1629_v46 }
 0x317   : > { %1916 = vrot.lane.b32.xlu2 %v1909_v40, %s4325_s0  ;;  %2149 = vrot.lane.b32.xlu1 %v2142_v32, %s4326_s25 }
 0x318   : > { %1897 = vrot.lane.b32.xlu0 %v1890_v44, %s4326_s25 }
 0x319   : > { %v1702_v1 = vpop.permute.xlu2 %1701  ;;  %v1649_v27 = vpop.permute.xlu1 %1648 }
 0x31a   : > { %v1710_v51 = vadd.f32 %v1702_v1, %v1691_v15  ;;  %v1655_v21 = vadd.f32 %v1649_v27, %v1636_v47  ;;  %v1621_v56 = vpop.permute.xlu0 %1620  ;;  %v4354_v27 = vld [vmem:[#allocation22_spill] sm:$0xff] }
 0x31b   : > { %v1628_v49 = vadd.f32 %v1621_v56, %v1609_v41  ;;  %v1966_v41 = vmul.f32 %v3714_v13, %v3300_v12  ;;  %v2198_v10 = vmul.f32 %v3808_v57, %v4354_v27 }
 0x31d   : > { %v1635_v16 = vadd.f32 %v1632_v60, %v1628_v49 }
 0x31f   : > { %1933 = vrot.lane.b32.xlu2 %v1927_v22, %s4333_s29  ;;  %2166 = vrot.lane.b32.xlu1 %v2160_v58, %s4325_s0 }
 0x320   : > { %2147 = vrot.lane.b32.xlu0 %v2141_v18, %s4326_s25 }
 0x321   : > { %v1721_v33 = vpop.permute.xlu2 %1720  ;;  %v1668_v39 = vpop.permute.xlu1 %1667 }
 0x322   : > { %v3997_v55 = vadd.f32 %v1721_v33, %v1710_v51  ;;  %v1674_v28 = vadd.f32 %v1668_v39, %v1655_v21  ;;  %v1647_v20 = vpop.permute.xlu0 %1646  ;;  %v4355_v51 = vld [vmem:[#allocation23_spill] sm:$0xff]  ;;  %v4356_v33 = vld [vmem:[#allocation24_spill] sm:$0xff]  ;;  %v2199_v39 = vmul.f32 %v3714_v13, %v4354_v27 }
 0x323   : > { %v1654_v35 = vadd.f32 %v1647_v20, %v1635_v16  ;;  %v1984_v21 = vmul.f32 %v3808_v57, %v4355_v51  ;;  %v1985_v18 = vmul.f32 %v3714_v13, %v4355_v51  ;;  %v2218_v12 = vmul.f32 %v3714_v13, %v4356_v33  ;;  %v2767_v20 = vld [vmem:[#allocation4 + $0x8] sm:$0xff] }
 0x327   : > { %2168 = vrot.lane.b32.xlu2 %v2161_v19, %s4325_s0  ;;  %1954 = vrot.lane.b32.xlu1 %v1947_v25, %s4349_s10 }
 0x328   : > { %1935 = vrot.lane.b32.xlu0 %v1928_v52, %s4333_s29  ;;  %v1765_v52 = vmul.f32 %v2767_v20, %v4003_v5 }
 0x329   : > { %v1775_v62 = vpop.permute.xlu2 %1774  ;;  %v1687_v48 = vpop.permute.xlu1 %1686 }
 0x32a   : > { %v1783_v43 = vadd.f32 %v1775_v62, %v1764_v0  ;;  %v1693_v24 = vadd.f32 %v1687_v48, %v1674_v28  ;;  %v1666_v30 = vpop.permute.xlu0 %1665  ;;  %v4053_v28 = vstv %s2591_s11 }
 0x32b   : > { %v1673_v17 = vadd.f32 %v1666_v30, %v1654_v35  ;;  %v2017_v35 = vmul.f32 %v2767_v20, %v4053_v28  ;;  %v4359_v20 = vld [vmem:[#allocation18_spill] sm:$0xff] }
 0x32f   : > { %2185 = vrot.lane.b32.xlu2 %v2179_v61, %s4333_s29  ;;  %1739 = vrot.lane.b32.xlu1 %v1733_v63, %s4351_s6  ;;  %v2217_v63 = vmul.f32 %v3808_v57, %v4356_v33 }
 0x330   : > { %1952 = vrot.lane.b32.xlu0 %v1946_v26, %s4349_s10 }
 0x331   : > { %v1796_v7 = vpop.permute.xlu2 %1795  ;;  %v1706_v59 = vpop.permute.xlu1 %1705 }
 0x332   : > { %v1712_v38 = vadd.f32 %v1706_v59, %v1693_v24  ;;  %v1685_v15 = vpop.permute.xlu0 %1684  ;;  %v4357_v24 = vld [vmem:[#allocation25_spill] sm:$0xff] }
 0x333   : > { %v1692_v46 = vadd.f32 %v1685_v15, %v1673_v17  ;;  %v2236_v30 = vmul.f32 %v3808_v57, %v4357_v24  ;;  %v1770_v17 = vmul.f32 %v3758_v29, %v3855_v3  ;;  %v1789_v3 = vmul.f32 %v3758_v29, %v3857_v23 }
 0x334   : > { %v2041_v23 = vmul.f32 %v3758_v29, %v3884_v54  ;;  %v1846_v54 = vmul.f32 %v3758_v29, %v3910_v6 }
 0x337   : > { %1741 = vrot.lane.b32.xlu2 %v1734_v53, %s4351_s6  ;;  %1973 = vrot.lane.b32.xlu1 %v1966_v41, %s4350_s5  ;;  %v2237_v41 = vmul.f32 %v3714_v13, %v4357_v24  ;;  %v2022_v13 = vmul.f32 %v3758_v29, %v3871_v42  ;;  %v1827_v42 = vmul.f32 %v3758_v29, %v3895_v37 }
 0x338   : > { %2187 = vrot.lane.b32.xlu0 %v2180_v8, %s4333_s29  ;;  %v2098_v37 = vmul.f32 %v3758_v29, %v3943_v14  ;;  %v4361_v14 = vld [vmem:[#allocation20_spill] sm:$0xff] }
 0x339   : > { %v1813_v47 = vpop.permute.xlu2 %1812  ;;  %v1725_v40 = vpop.permute.xlu1 %1724 }
 0x33a   : > { %v4032_v32 = vadd.f32 %v1725_v40, %v1712_v38  ;;  %v1704_v44 = vpop.permute.xlu0 %1703  ;;  %v2016_v38 = vmul.f32 %v4010_v11, %v4053_v28 }
 0x33b   : > { %v1711_v1 = vadd.f32 %v1704_v44, %v1692_v46 }
 0x33f   : > { %2204 = vrot.lane.b32.xlu2 %v2198_v10, %s4349_s10  ;;  %1990 = vrot.lane.b32.xlu1 %v1984_v21, %s4351_s6 }
 0x340   : > { %1971 = vrot.lane.b32.xlu0 %v1965_v9, %s4350_s5 }
 0x341   : > { %v2048_v56 = vpop.permute.xlu2 %2047  ;;  %v1794_v49 = vpop.permute.xlu1 %1793 }
 0x342   : > { %v1802_v60 = vadd.f32 %v1794_v49, %v1783_v43  ;;  %v1723_v22 = vpop.permute.xlu0 %1722  ;;  %v4358_v49 = vld [vmem:[#allocation28_spill] sm:$0xff] }
 0x343   : > { %v4043_v58 = vadd.f32 %v1723_v22, %v1711_v1 }
 0x344   : > { %v1821_v16 = vadd.f32 %v1813_v47, %v1802_v60  ;;  %v1882_v60 = vmul.f32 %v3808_v57, %v4358_v49 }
 0x347   : > { %1992 = vrot.lane.b32.xlu2 %v1985_v18, %s4351_s6  ;;  %2225 = vrot.lane.b32.xlu1 %v2218_v12, %s4350_s5 }
 0x348   : > { %2206 = vrot.lane.b32.xlu0 %v2199_v39, %s4349_s10  ;;  %v2079_v39 = vmul.f32 %v3758_v29, %v3930_v50 }
 0x349   : > { %v2065_v19 = vpop.permute.xlu2 %2064  ;;  %v2029_v25 = vpop.permute.xlu1 %2028 }
 0x34a   : > { %v2036_v0 = vadd.f32 %v2029_v25, %v2017_v35  ;;  %v1777_v62 = vpop.permute.xlu0 %1776 }
 0x34b   : > { %v1784_v48 = vadd.f32 %v1777_v62, %v1765_v52  ;;  %v4360_v62 = vld [vmem:[#allocation19_spill] sm:$0xff] }
 0x34c   : > { %v2055_v43 = vadd.f32 %v2048_v56, %v2036_v0  ;;  %v2117_v0 = vmul.f32 %v3758_v29, %v3956_v36 }
 0x34d   : > { %v1803_v61 = vadd.f32 %v1796_v7, %v1784_v48  ;;  %v1808_v7 = vmul.f32 %v3758_v29, %v3882_v2  ;;  %v2060_v2 = vmul.f32 %v3758_v29, %v3908_v4  ;;  %v1865_v4 = vmul.f32 %v3758_v29, %v3941_v31 }
 0x34f   : > { %2242 = vrot.lane.b32.xlu2 %v2236_v30, %s4351_s6  ;;  %1778 = vrot.lane.b32.xlu1 %v1770_v17, %s4326_s25  ;;  %v2768_v17 = vld [vmem:[#allocation4 + $0x20] sm:$0xff] }
 0x350   : > { %2223 = vrot.lane.b32.xlu0 %v2217_v63, %s4350_s5 }
 0x351   : > { %v1853_v26 = vpop.permute.xlu2 %1852  ;;  %v2046_v59 = vpop.permute.xlu1 %2045 }
 0x352   : > { %v2027_v15 = vpop.permute.xlu0 %2026 }
 0x353   : > { %v2035_v46 = vadd.f32 %v2027_v15, %v2016_v38  ;;  %v4363_v38 = vld [vmem:[#allocation21_spill] sm:$0xff]  ;;  %v4364_v15 = vld [vmem:[#allocation26_spill] sm:$0xff] }
 0x355   : > { %v2054_v53 = vadd.f32 %v2046_v59, %v2035_v46  ;;  %v1883_v59 = vmul.f32 %v2768_v17, %v4358_v49  ;;  %v4365_v46 = vld [vmem:[#allocation27_spill] sm:$0xff] }
 0x357   : > { %1797 = vrot.lane.b32.xlu2 %v1789_v3, %s4325_s0  ;;  %1816 = vrot.lane.b32.xlu1 %v1808_v7, %s4333_s29  ;;  %v2073_v8 = vadd.f32 %v2065_v19, %v2054_v53 }
 0x358   : > { %2244 = vrot.lane.b32.xlu0 %v2237_v41, %s4351_s6 }
 0x359   : > { %v1870_v11 = vpop.permute.xlu2 %1869  ;;  %v1834_v47 = vpop.permute.xlu1 %1833 }
 0x35a   : > { %v1815_v40 = vpop.permute.xlu0 %1814 }
 0x35b   : > { %v1822_v44 = vadd.f32 %v1815_v40, %v1803_v61  ;;  %v4362_v61 = vld [vmem:[#allocation32_spill] sm:$0xff]  ;;  %v4366_v40 = vld [vmem:[#allocation29_spill] sm:$0xff] }
 0x35c   : > { %v2135_v63 = vmul.f32 %v2768_v17, %v4362_v61 }
 0x35d   : > { %v1841_v1 = vadd.f32 %v1834_v47, %v1822_v44  ;;  %v4367_v44 = vld [vmem:[#allocation30_spill] sm:$0xff] }
 0x35f   : > { %2049 = vrot.lane.b32.xlu2 %v2041_v23, %s4325_s0  ;;  %2068 = vrot.lane.b32.xlu1 %v2060_v2, %s4333_s29  ;;  %v1860_v27 = vadd.f32 %v1853_v26, %v1841_v1  ;;  %v4368_v1 = vld [vmem:[#allocation31_spill] sm:$0xff] }
 0x360   : > { %2030 = vrot.lane.b32.xlu0 %v2022_v13, %s4326_s25 }
 0x361   : > { %v2105_v10 = vpop.permute.xlu2 %2104  ;;  %v1851_v51 = vpop.permute.xlu1 %1850 }
 0x362   : > { %v1832_v21 = vpop.permute.xlu0 %1831 }
 0x363   : > { %v1840_v9 = vadd.f32 %v1832_v21, %v1821_v16 }
 0x365   : > { %v1859_v56 = vadd.f32 %v1851_v51, %v1840_v9 }
 0x367   : > { %1854 = vrot.lane.b32.xlu2 %v1846_v54, %s4350_s5  ;;  %1873 = vrot.lane.b32.xlu1 %v1865_v4, %s4351_s6  ;;  %v1878_v22 = vadd.f32 %v1870_v11, %v1859_v56  ;;  %v2134_v11 = vmul.f32 %v3808_v57, %v4362_v61  ;;  %v4371_v57 = vld [vmem:[#allocation35_spill] sm:$0xff]  ;;  %v4372_v56 = vld [vmem:[#allocation36_spill] sm:$0xff] }
 0x368   : > { %1835 = vrot.lane.b32.xlu0 %v1827_v42, %s4349_s10 }
 0x369   : > { %v4098_v16 = vpop.permute.xlu2 %1895  ;;  %v4100_v18 = vadd.f32 %v1882_v60, %v1878_v22  ;;  %v2086_v6 = vpop.permute.xlu1 %2085 }
 0x36a   : > { %v2067_v33 = vpop.permute.xlu0 %2066 }
 0x36b   : > { %v2074_v31 = vadd.f32 %v2067_v33, %v2055_v43 }
 0x36d   : > { %v2093_v12 = vadd.f32 %v2086_v6, %v2074_v31 }
 0x36f   : > { %2106 = vrot.lane.b32.xlu2 %v2098_v37, %s4350_s5  ;;  %1899 = vrot.lane.b32.xlu1 %v4359_v20, %s4326_s25  ;;  %v2112_v50 = vadd.f32 %v2105_v10, %v2093_v12  ;;  %v4370_v10 = vld [vmem:[#allocation34_spill] sm:$0xff] }
 0x370   : > { %2087 = vrot.lane.b32.xlu0 %v2079_v39, %s4349_s10 }
 0x371   : > { %v1917_v35 = vpop.permute.xlu2 %1916  ;;  %v2103_v19 = vpop.permute.xlu1 %2102 }
 0x372   : > { %v2084_v25 = vpop.permute.xlu0 %2083 }
 0x373   : > { %v2092_v52 = vadd.f32 %v2084_v25, %v2073_v8 }
 0x375   : > { %v2111_v7 = vadd.f32 %v2103_v19, %v2092_v52 }
 0x377   : > { %1918 = vrot.lane.b32.xlu2 %v4360_v62, %s4325_s0  ;;  %1937 = vrot.lane.b32.xlu1 %v4361_v14, %s4333_s29 }
 0x378   : > { %2125 = vrot.lane.b32.xlu0 %v2117_v0, %s4351_s6 }
 0x379   : > { %v1934_v48 = vpop.permute.xlu2 %1933  ;;  %v2124_v43 = vpop.permute.xlu1 %2123 }
 0x37a   : > { %v2131_v24 = vadd.f32 %v2124_v43, %v2112_v50  ;;  %v1872_v30 = vpop.permute.xlu0 %1871 }
 0x37b   : > { %v1879_v26 = vadd.f32 %v1872_v30, %v1860_v27  ;;  %v4369_v27 = vld [vmem:[#allocation33_spill] sm:$0xff] }
 0x37c   : > { %v2138_v29 = vadd.f32 %v2135_v63, %v2131_v24 }
 0x37d   : > { %v1886_v36 = vadd.f32 %v1883_v59, %v1879_v26 }
 0x37f   : > { %2170 = vrot.lane.b32.xlu2 %v4363_v38, %s4325_s0  ;;  %2189 = vrot.lane.b32.xlu1 %v4364_v15, %s4333_s29  ;;  %s2904_s0 = smov 16   ;;  %s2906_s29 = smov 48  }
 0x380   : > { %2151 = vrot.lane.b32.xlu0 %v4365_v46, %s4326_s25  ;;  %s2905_s25 = smov 32  }
 0x381   : > { %v2169_v53 = vpop.permute.xlu2 %2168  ;;  %v1915_v3 = vpop.permute.xlu1 %1914 }
 0x382   : > { %v2122_v41 = vpop.permute.xlu0 %2121 }
 0x383   : > { %v2130_v8 = vadd.f32 %v2122_v41, %v2111_v7 }
 0x385   : > { %v2137_v47 = vadd.f32 %v2134_v11, %v2130_v8 }
 0x387   : > { %1743 = vrot.lane.b32.xlu2 %v4366_v40, %s4351_s6  ;;  %2208 = vrot.lane.b32.xlu1 %v4367_v44, %s4349_s10 }
 0x388   : > { %1956 = vrot.lane.b32.xlu0 %v4368_v1, %s4349_s10  ;;  %s2907_s10 = smov 64  }
 0x389   : > { %v2186_v23 = vpop.permute.xlu2 %2185  ;;  %v2150_v2 = vpop.permute.xlu1 %2149 }
 0x38a   : > { %v1898_v13 = vpop.permute.xlu0 %1897  ;;  %v2157_v38 = vadd.f32 %v2150_v2, %v2138_v29 }
 0x38b   : > { %v1905_v31 = vadd.f32 %v1898_v13, %v1886_v36 }
 0x38c   : > { %v2176_v41 = vadd.f32 %v2169_v53, %v2157_v38 }
 0x38d   : > { %v1924_v20 = vadd.f32 %v1917_v35, %v1905_v31 }
 0x38f   : > { %1994 = vrot.lane.b32.xlu2 %v4369_v27, %s4351_s6  ;;  %2246 = vrot.lane.b32.xlu1 %v4370_v10, %s4351_s6  ;;  %s2909_s6 = smov 96  }
 0x390   : > { %1975 = vrot.lane.b32.xlu0 %v4371_v57, %s4350_s5 }
 0x391   : > { %v1742_v51 = vpop.permute.xlu2 %1741  ;;  %v2167_v21 = vpop.permute.xlu1 %2166 }
 0x392   : > { %v2148_v9 = vpop.permute.xlu0 %2147  ;;  %v4142_v49 = vadd.f32 %v1742_v51, %v4043_v58  ;;  %v1904_v58 = vadd.f32 %v4098_v16, %v4100_v18 }
 0x393   : > { %v2156_v18 = vadd.f32 %v2148_v9, %v2137_v47 }
 0x394   : > { %v1755_v12 = vrot.slane %v4142_v49, 4  ;;  %v1923_v62 = vadd.f32 %v1915_v3, %v1904_v58 }
 0x395   : > { %v2175_v15 = vadd.f32 %v2167_v21, %v2156_v18  ;;  %v4373_v18 = vld [vmem:[#allocation37_spill] sm:$0xff] }
 0x396   : > { %v1942_v50 = vadd.f32 %v1934_v48, %v1923_v62 }
 0x397   : > { %v2194_v7 = vadd.f32 %v2186_v23, %v2175_v15 }
 0x398   : > { %2227 = vrot.lane.b32.xlu0 %v4372_v56, %s4350_s5  ;;  %s2908_s5 = smov 80  }
 0x399   : > { %v2205_v54 = vpop.permute.xlu2 %2204  ;;  %v1955_v4 = vpop.permute.xlu1 %1954 }
 0x39a   : > { %v1936_v42 = vpop.permute.xlu0 %1935  ;;  %v2213_v11 = vadd.f32 %v2205_v54, %v2194_v7 }
 0x39b   : > { %v1943_v25 = vadd.f32 %v1936_v42, %v1924_v20  ;;  %v2769_v42 = vld [vmem:[#allocation4 + $0x10] sm:$0x3f] }
 0x39c   : > { %v2018_v58 = vmul.f32 %v2769_v42, %v4053_v28 }
 0x39d   : > { %v1962_v14 = vadd.f32 %v1955_v4, %v1943_v25 }
 0x3a1   : > { %v1993_v60 = vpop.permute.xlu2 %1992  ;;  %v1740_v22 = vpop.permute.xlu1 %1739 }
 0x3a2   : > { %v1748_v6 = vadd.f32 %v1740_v22, %v3997_v55  ;;  %v1953_v33 = vpop.permute.xlu0 %1952 }
 0x3a3   : > { %v1961_v24 = vadd.f32 %v1953_v33, %v1942_v50 }
 0x3a4   : > { %v1754_v37 = vrot.slane %v1748_v6, 4 }
 0x3a6   : > { %v1756_v39 = vsel %vm190_vm1, %v1754_v37, %v1755_v12 }
 0x3a7   : > { %v1761_v19 = vadd.f32 %v1756_v39, %v3922_v34 }
 0x3a9   : > { %v1974_v52 = vpop.permute.xlu1 %1973  ;;  %v2243_v55 = vpop.permute.xlu2 %2242 }
 0x3aa   : > { %v2188_v0 = vpop.permute.xlu0 %2187  ;;  %v1981_v43 = vadd.f32 %v1974_v52, %v1962_v14 }
 0x3ab   : > { %v2195_v40 = vadd.f32 %v2188_v0, %v2176_v41 }
 0x3ac   : > { %v4152_v17 = vadd.f32 %v1993_v60, %v1981_v43  ;;  %v1766_v60 = vmul.f32 %v2769_v42, %v4003_v5 }
 0x3ae   : > { %v2007_v34 = vrot.slane %v4152_v17, 5 }
 0x3b1   : > { %v1991_v63 = vpop.permute.xlu1 %1990  ;;  %v1798_v35 = vpop.permute.xlu2 %1797 }
 0x3b2   : > { %v1972_v30 = vpop.permute.xlu0 %1971 }
 0x3b3   : > { %v1980_v61 = vadd.f32 %v1972_v30, %v1961_v24 }
 0x3b5   : > { %v1999_v26 = vadd.f32 %v1991_v63, %v1980_v61 }
 0x3b7   : > { %v2006_v16 = vrot.slane %v1999_v26, 5 }
 0x3b9   : > { %v2008_v59 = vsel %vm2005_vm7, %v2006_v16, %v2007_v34  ;;  %v2050_v46 = vpop.permute.xlu2 %2049  ;;  %v2226_v3 = vpop.permute.xlu1 %2225 }
 0x3ba   : > { %v2207_v36 = vpop.permute.xlu0 %2206  ;;  %v2013_v48 = vadd.f32 %v2008_v59, %v1761_v19 }
 0x3bb   : > { %v2214_v44 = vadd.f32 %v2207_v36, %v2195_v40 }
 0x3bd   : > { %v2233_v10 = vadd.f32 %v2226_v3, %v2214_v44 }
 0x3c1   : > { %v1855_v13 = vpop.permute.xlu2 %1854  ;;  %v1779_v27 = vpop.permute.xlu1 %1778 }
 0x3c2   : > { %v2224_v8 = vpop.permute.xlu0 %2223  ;;  %v1785_v31 = vadd.f32 %v1779_v27, %v1766_v60 }
 0x3c3   : > { %v2232_v1 = vadd.f32 %v2224_v8, %v2213_v11 }
 0x3c4   : > { %v1804_v39 = vadd.f32 %v1798_v35, %v1785_v31 }
 0x3c5   : > { %v2251_v47 = vadd.f32 %v2243_v55, %v2232_v1 }
 0x3c7   : > { %v2258_v9 = vrot.slane %v2251_v47, 6 }
 0x3c9   : > { %v2107_v21 = vpop.permute.xlu2 %2106  ;;  %v1817_v56 = vpop.permute.xlu1 %1816 }
 0x3ca   : > { %v2245_v57 = vpop.permute.xlu0 %2244  ;;  %v1823_v19 = vadd.f32 %v1817_v56, %v1804_v39 }
 0x3cb   : > { %v4158_v51 = vadd.f32 %v2245_v57, %v2233_v10 }
 0x3cd   : > { %v2259_v29 = vrot.slane %v4158_v51, 6 }
 0x3cf   : > { %v2260_v53 = vsel %vm2257_vm8, %v2258_v9, %v2259_v29 }
 0x3d0   : > { %v2265_v23 = vadd.f32 %v2260_v53, %v2013_v48 }
 0x3d1   : > { %v1919_v22 = vpop.permute.xlu2 %1918  ;;  %v2069_v6 = vpop.permute.xlu1 %2068 }
 0x3d2   : > { %v2647_v2 = vmul.f32 -1.442695, %v2265_v23  ;;  %v2031_v33 = vpop.permute.xlu0 %2030 }
 0x3d3   : > { %v2037_v14 = vadd.f32 %v2031_v33, %v2018_v58 }
 0x3d4   : > { %2752 = vpow2.f32 %v2647_v2 }
 0x3d5   : > { %v2056_v63 = vadd.f32 %v2050_v46, %v2037_v14 }
 0x3d7   : > { %v2075_v38 = vadd.f32 %v2069_v6, %v2056_v63 }
 0x3d9   : > { %v2171_v25 = vpop.permute.xlu2 %2170  ;;  %v1874_v0 = vpop.permute.xlu1 %1873 }
 0x3da   : > { %v2753_v54 = vpop.eup %2752  ;;  %v1836_v62 = vpop.permute.xlu0 %1835 }
 0x3db   : > { %v2273_v4 = vadd.f32 1.0, %v2753_v54  ;;  %v1842_v50 = vadd.f32 %v1836_v62, %v1823_v19 }
 0x3dd   : > { %2754 = vrcp.f32 %v2273_v4  ;;  %v2286_v55 = vand.u32 2147483648, %v2273_v4  ;;  %v2284_v5 = vand.u32 2147483647, %v2273_v4  ;;  %v1861_v24 = vadd.f32 %v1855_v13, %v1842_v50  ;;  %v4377_v13 = vld [vmem:[#allocation38_spill] sm:$0xff] }
 0x3de   : > { %vm2280_vm10 = vweird.f32 %v2273_v4 }
 0x3df   : > { %v2287_v61 = vor.u32 1.1754944e-38, %v2286_v55  ;;  %v1880_v35 = vadd.f32 %v1874_v0, %v1861_v24  ;;  %vm2285_vm12 = vcmp.eq.f32.partialorder %v2284_v5, 8.507059e+37 }
 0x3e1   : > { %v1744_v16 = vpop.permute.xlu2 %1743  ;;  %v1887_v59 = vadd.f32 %v4373_v18, %v1880_v35  ;;  %v1900_v3 = vpop.permute.xlu1 %1899 }
 0x3e2   : > { %v1750_v36 = vadd.f32 %v1744_v16, %v4032_v32  ;;  %v2088_v48 = vpop.permute.xlu0 %2087  ;;  %v4374_v32 = vlaneseq }
 0x3e3   : > { %v2755_v37 = vpop.eup %2754  ;;  %v2094_v7 = vadd.f32 %v2088_v48, %v2075_v38  ;;  %v1906_v57 = vadd.f32 %v1900_v3, %v1887_v59 }
 0x3e4   : > { %v2276_v20 = vmul.f32 %v2755_v37, %v2273_v4  ;;  %vm2281_vm9 = vweird.f32 %v2755_v37  ;;  %v1757_v15 = vrot.slane %v1750_v36, 4  ;;  %vm4174_vm13 = vcmp.lt.s32.totalorder %v4374_v32, 16 }
 0x3e5   : > { %vm2282_vm11 = vmor %vm2280_vm10, %vm2281_vm9  ;;  %v2113_v11 = vadd.f32 %v2107_v21, %v2094_v7  ;;  %v1925_v53 = vadd.f32 %v1919_v22, %v1906_v57  ;;  %vm4192_vm3 = vcmp.ge.s32.totalorder %v4374_v32, 16  ;;  %vm4197_vm4 = vcmp.lt.s32.totalorder %v4374_v32, 32 }
 0x3e6   : > { %v2277_v52 = vsub.f32 1.0, %v2276_v20  ;;  %v1758_v41 = vsel %vm190_vm1, %v1755_v12, %v1757_v15  ;;  %vm2317_vm5 = vmand %vm4192_vm3, %vm4197_vm4  ;;  %vm2325_vm6 = vcmp.ge.s32.totalorder %v4374_v32, 32  ;;  %vm2335_vm9 = vcmp.ge.s32.totalorder %v4374_v32, 48 }
 0x3e7   : > { %v1762_v46 = vadd.f32 %v1758_v41, %v3925_v45  ;;  %vm2336_vm10 = vcmp.lt.s32.totalorder %v4374_v32, 64  ;;  %vm2365_vm3 = vcmp.ge.s32.totalorder %v4374_v32, 96  ;;  %vm2366_vm4 = vcmp.lt.s32.totalorder %v4374_v32, 112 }
 0x3e8   : > { %v2278_v43 = vmul.f32 %v2755_v37, %v2277_v52 }
 0x3e9   : > { %v1938_v49 = vpop.permute.xlu1 %1937  ;;  %v1995_v6 = vpop.permute.xlu2 %1994 }
 0x3ea   : > { %v2279_v30 = vadd.f32 %v2755_v37, %v2278_v43  ;;  %v2126_v40 = vpop.permute.xlu0 %2125  ;;  %v1944_v23 = vadd.f32 %v1938_v49, %v1925_v53 }
 0x3eb   : > { %v2132_v44 = vadd.f32 %v2126_v40, %v2113_v11 }
 0x3ec   : > { %v2283_v26 = vsel %vm2282_vm11, %v2755_v37, %v2279_v30  ;;  %vm4221_vm11 = vcmp.ge.s32.totalorder %v4374_v32, 64 }
 0x3ed   : > { %v2288_v28 = vsel %vm2285_vm12, %v2287_v61, %v2283_v26  ;;  %v2139_v27 = vadd.f32 %v4377_v13, %v2132_v44  ;;  %vm4226_vm12 = vcmp.lt.s32.totalorder %v4374_v32, 80 }
 0x3ee   : > { %2309 = vst [vmem:[#allocation1] sm:$0xff] %v2288_v28 }
 0x3ef   : > { %2307 = vst.msk [vmem:[#allocation5] sm:$0x1] %vm4174_vm13, %v2288_v28 }
 0x3f1   : > { %v2190_v47 = vpop.permute.xlu1 %2189 }
 0x3f2   : > { %v2152_v12 = vpop.permute.xlu0 %2151 }
 0x3f3   : > { %v2158_v2 = vadd.f32 %v2152_v12, %v2139_v27 }
 0x3f5   : > { %v2311_v8 = vld [vmem:[#allocation1 + $0x1] ss:$9 sm:$0xff]  ;;  %v2177_v42 = vadd.f32 %v2171_v25, %v2158_v2 }
 0x3f6   : > { %2319 = vst [vmem:[#allocation1] sm:$0xff] %v2288_v28  ;;  %2312 = vrot.lane.b32.xlu2 %v2311_v8, %s2904_s0 }
 0x3f7   : > { %v2196_v31 = vadd.f32 %v2190_v47, %v2177_v42 }
 0x3f9   : > { %v2209_v54 = vpop.permute.xlu1 %2208 }
 0x3fa   : > { %v1957_v9 = vpop.permute.xlu0 %1956  ;;  %v2215_v20 = vadd.f32 %v2209_v54, %v2196_v31 }
 0x3fb   : > { %v1963_v56 = vadd.f32 %v1957_v9, %v1944_v23 }
 0x3fd   : > { %v2321_v45 = vld [vmem:[#allocation1 + $0x2] ss:$9 sm:$0xff] }
 0x3fe   : > { %2329 = vst [vmem:[#allocation1] sm:$0xff] %v2288_v28  ;;  %2322 = vrot.lane.b32.xlu1 %v2321_v45, %s2905_s25 }
 0x401   : > { %v2247_v0 = vpop.permute.xlu1 %2246 }
 0x402   : > { %v1976_v4 = vpop.permute.xlu0 %1975 }
 0x403   : > { %v1982_v60 = vadd.f32 %v1976_v4, %v1963_v56 }
 0x405   : > { %v2331_v10 = vld [vmem:[#allocation1 + $0x3] ss:$9 sm:$0xff]  ;;  %v2001_v33 = vadd.f32 %v1995_v6, %v1982_v60 }
 0x406   : > { %2339 = vst [vmem:[#allocation1] sm:$0xff] %v2288_v28 }
 0x407   : > { %v2009_v37 = vrot.slane %v2001_v33, 5 }
 0x409   : > { %v2010_v19 = vsel %vm2005_vm7, %v2007_v34, %v2009_v37  ;;  %vm2326_vm7 = vcmp.lt.s32.totalorder %v4374_v32, 48 }
 0x40a   : > { %v2014_v22 = vadd.f32 %v2010_v19, %v1762_v46  ;;  %v2228_v58 = vpop.permute.xlu0 %2227 }
 0x40b   : > { %v2234_v52 = vadd.f32 %v2228_v58, %v2215_v20 }
 0x40d   : > { %v2341_v21 = vld [vmem:[#allocation1 + $0x4] ss:$9 sm:$0xff]  ;;  %v2253_v62 = vadd.f32 %v2247_v0, %v2234_v52 }
 0x40e   : > { %2349 = vst [vmem:[#allocation1] sm:$0xff] %v2288_v28 }
 0x40f   : > { %v2261_v55 = vrot.slane %v2253_v62, 6 }
 0x411   : > { %v2262_v25 = vsel %vm2257_vm8, %v2259_v29, %v2261_v55  ;;  %vm2327_vm8 = vmand %vm2325_vm6, %vm2326_vm7  ;;  %vm2376_vm6 = vcmp.lt.s32.totalorder %v4374_v32, 128 }
 0x412   : > { %v2266_v50 = vadd.f32 %v2262_v25, %v2014_v22  ;;  %vm2367_vm7 = vmand %vm2365_vm3, %vm2366_vm4 }
 0x414   : > { %v2648_v43 = vmul.f32 -1.442695, %v2266_v50 }
 0x415   : > { %v2351_v39 = vld [vmem:[#allocation1 + $0x5] ss:$9 sm:$0xff] }
 0x416   : > { %2359 = vst [vmem:[#allocation1] sm:$0xff] %v2288_v28  ;;  %2756 = vpow2.f32 %v2648_v43 }
 0x41c   : > { %v2757_v5 = vpop.eup %2756 }
 0x41d   : > { %v2361_v14 = vld [vmem:[#allocation1 + $0x6] ss:$9 sm:$0xff]  ;;  %v2274_v17 = vadd.f32 1.0, %v2757_v5 }
 0x41e   : > { %2369 = vst [vmem:[#allocation1] sm:$0xff] %v2288_v28 }
 0x41f   : > { %2758 = vrcp.f32 %v2274_v17  ;;  %v2301_v61 = vand.u32 2147483648, %v2274_v17  ;;  %v2299_v35 = vand.u32 2147483647, %v2274_v17  ;;  %vm2295_vm15 = vweird.f32 %v2274_v17 }
 0x421   : > { %v2302_v51 = vor.u32 1.1754944e-38, %v2301_v61  ;;  %vm2300_vm2 = vcmp.eq.f32.partialorder %v2299_v35, 8.507059e+37 }
 0x425   : > { %v2759_v34 = vpop.eup %2758  ;;  %v2371_v28 = vld [vmem:[#allocation1 + $0x7] ss:$9 sm:$0xff] }
 0x426   : > { %v2291_v24 = vmul.f32 %v2759_v34, %v2274_v17  ;;  %vm2296_vm14 = vweird.f32 %v2759_v34 }
 0x427   : > { %vm2297_vm0 = vmor %vm2295_vm15, %vm2296_vm14  ;;  %vm2355_vm15 = vcmp.ge.s32.totalorder %v4374_v32, 80 }
 0x428   : > { %v2292_v30 = vsub.f32 1.0, %v2291_v24  ;;  %vm2347_vm14 = vmand %vm4221_vm11, %vm4226_vm12 }
 0x42a   : > { %v2293_v63 = vmul.f32 %v2759_v34, %v2292_v30 }
 0x42c   : > { %v2294_v26 = vadd.f32 %v2759_v34, %v2293_v63 }
 0x42e   : > { %v2298_v16 = vsel %vm2297_vm0, %v2759_v34, %v2294_v26  ;;  %vm2356_vm0 = vcmp.lt.s32.totalorder %v4374_v32, 96 }
 0x42f   : > { %v2303_v29 = vsel %vm2300_vm2, %v2302_v51, %v2298_v16  ;;  %vm2357_vm2 = vmand %vm2355_vm15, %vm2356_vm0 }
 0x430   : > { %2381 = vst [vmem:[#allocation1] sm:$0xff] %v2303_v29 }
 0x431   : > { %2379 = vst.msk [vmem:[#allocation5 + $0x1] sm:$0x1] %vm4174_vm13, %v2303_v29  ;;  %vm2337_vm13 = vmand %vm2335_vm9, %vm2336_vm10 }
 0x437   : > { %v2383_v18 = vld [vmem:[#allocation1 + $0x1] ss:$9 sm:$0xff] }
 0x438   : > { %2384 = vrot.lane.b32.xlu0 %v2383_v18, %s2904_s0  ;;  %2388 = vst [vmem:[#allocation1] sm:$0xff] %v2303_v29 }
 0x43f   : > { %v2390_v59 = vld [vmem:[#allocation1 + $0x2] ss:$9 sm:$0xff] }
 0x440   : > { %2332 = vrot.lane.b32.xlu0 %v2331_v10, %s2906_s29  ;;  %2391 = vrot.lane.b32.xlu2 %v2390_v59, %s2905_s25  ;;  %2395 = vst [vmem:[#allocation1] sm:$0xff] %v2303_v29 }
 0x447   : > { %v2397_v15 = vld [vmem:[#allocation1 + $0x3] ss:$9 sm:$0xff] }
 0x448   : > { %2342 = vrot.lane.b32.xlu2 %v2341_v21, %s2907_s10  ;;  %2398 = vrot.lane.b32.xlu1 %v2397_v15, %s2906_s29  ;;  %2402 = vst [vmem:[#allocation1] sm:$0xff] %v2303_v29 }
 0x44f   : > { %v2404_v3 = vld [vmem:[#allocation1 + $0x4] ss:$9 sm:$0xff] }
 0x450   : > { %v2313_v38 = vpop.permute.xlu2 %2312  ;;  %2352 = vrot.lane.b32.xlu1 %v2351_v39, %s2908_s5  ;;  %2405 = vrot.lane.b32.xlu0 %v2404_v3, %s2907_s10  ;;  %2409 = vst [vmem:[#allocation1] sm:$0xff] %v2303_v29 }
 0x451   : > { %2318 = vst.msk [vmem:[#allocation5] sm:$0x1] %vm2317_vm5, %v2313_v38 }
 0x457   : > { %v2411_v7 = vld [vmem:[#allocation1 + $0x5] ss:$9 sm:$0xff] }
 0x458   : > { %2362 = vrot.lane.b32.xlu0 %v2361_v14, %s2909_s6  ;;  %2412 = vrot.lane.b32.xlu2 %v2411_v7, %s2908_s5  ;;  %2416 = vst [vmem:[#allocation1] sm:$0xff] %v2303_v29 }
 0x45f   : > { %v2418_v41 = vld [vmem:[#allocation1 + $0x6] ss:$9 sm:$0xff] }
 0x460   : > { %2372 = vrot.lane.b32.xlu2 %v2371_v28, %s2910_s19  ;;  %2419 = vrot.lane.b32.xlu1 %v2418_v41, %s2909_s6  ;;  %2423 = vst [vmem:[#allocation1] sm:$0xff] %v2303_v29 }
 0x467   : > { %v2425_v8 = vld [vmem:[#allocation1 + $0x7] ss:$9 sm:$0xff] }
 0x468   : > { %2426 = vrot.lane.b32.xlu0 %v2425_v8, %s2910_s19 }
 0x470   : > { %v2323_v46 = vpop.permute.xlu1 %2322 }
 0x471   : > { %2328 = vst.msk [vmem:[#allocation5] sm:$0x1] %vm2327_vm8, %v2323_v46 }
 0x49a   : > { %v2392_v11 = vpop.permute.xlu2 %2391 }
 0x4a2   : > { %v2343_v27 = vpop.permute.xlu2 %2342 }
 0x4aa   : > { %v2385_v40 = vpop.permute.xlu0 %2384 }
 0x4ab   : > { %2387 = vst.msk [vmem:[#allocation5 + $0x1] sm:$0x1] %vm2317_vm5, %v2385_v40  ;;  %vm2375_vm5 = vcmp.ge.s32.totalorder %v4374_v32, 112  ;;  %v2431_v32 = vld [vmem:[%s3029_s3] sm:$0xff] }
 0x4ac   : > { %2394 = vst.msk [vmem:[#allocation5 + $0x1] sm:$0x1] %vm2327_vm8, %v2392_v11  ;;  %vm2377_vm8 = vmand %vm2375_vm5, %vm2376_vm6 }
 0x4b2   : > { %v2333_v13 = vpop.permute.xlu0 %2332  ;;  %v2413_v45 = vpop.permute.xlu2 %2412 }
 0x4b3   : > { %2338 = vst.msk [vmem:[#allocation5] sm:$0x1] %vm2337_vm13, %v2333_v13 }
 0x4b4   : > { %2348 = vst.msk [vmem:[#allocation5] sm:$0x1] %vm2347_vm14, %v2343_v27 }
 0x4ba   : > { %v2399_v49 = vpop.permute.xlu1 %2398  ;;  %v2373_v57 = vpop.permute.xlu2 %2372 }
 0x4bb   : > { %2401 = vst.msk [vmem:[#allocation5 + $0x1] sm:$0x1] %vm2337_vm13, %v2399_v49 }
 0x4c2   : > { %v2353_v12 = vpop.permute.xlu1 %2352  ;;  %v2406_v47 = vpop.permute.xlu0 %2405 }
 0x4c3   : > { %2358 = vst.msk [vmem:[#allocation5] sm:$0x1] %vm2357_vm2, %v2353_v12 }
 0x4c4   : > { %2408 = vst.msk [vmem:[#allocation5 + $0x1] sm:$0x1] %vm2347_vm14, %v2406_v47 }
 0x4c5   : > { %2415 = vst.msk [vmem:[#allocation5 + $0x1] sm:$0x1] %vm2357_vm2, %v2413_v45 }
 0x4ca   : > { %v2363_v10 = vpop.permute.xlu0 %2362 }
 0x4cb   : > { %2368 = vst.msk [vmem:[#allocation5] sm:$0x1] %vm2367_vm7, %v2363_v10 }
 0x4cc   : > { %2378 = vst.msk [vmem:[#allocation5] sm:$0x1] %vm2377_vm8, %v2373_v57 }
 0x4d2   : > { %v2420_v9 = vpop.permute.xlu1 %2419 }
 0x4d3   : > { %2422 = vst.msk [vmem:[#allocation5 + $0x1] sm:$0x1] %vm2367_vm7, %v2420_v9 }
 0x4da   : > { %v2427_v53 = vpop.permute.xlu0 %2426 }
 0x4db   : > { %2429 = vst.msk [vmem:[#allocation5 + $0x1] sm:$0x1] %vm2377_vm8, %v2427_v53 }
 0x4e2   : > { %v2430_v23 = vld [vmem:[#allocation5] sm:$0x3] }
 0x4e3   : > { %v2434_v2 = vperm.slane %v2430_v23, 1  ;;  %v2433_v21 = vperm.slane %v2430_v23, 0 }
 0x4e5   : > { %v2435_v56 = vrot.slane %v2434_v2, 4 }
 0x4e7   : > { %v2436_v54 = vsel %vm190_vm1, %v2433_v21, %v2435_v56 }
 0x4e8   : > { %v2438_v4 = vmul.f32 %v2436_v54, %v2431_v32 }
 0x4ea   : > { %2439 = vst [vmem:[%s175_s7] sm:$0xff] %v2438_v4 }
 0x4eb   : > { %2842 = shalt.err (!%p2839_p11)
}
 0x4ec   : > { %2662 = dma.vmem_to_hbm [thread:$0]  (%p2992_p3), %s2455_s8, 128, %s2457_s14, %s2441_s13  }
 0x4ed PF: > { %s2468_s27 = sand.u32 1, %s2873_s9   ;;  %p4387_p12 = scmp.ge.s32.totalorder %s2885_s12, 2 }
 0x4ee   : > { %s2469_s11 = scalar_lea.sflag [#allocation8], %s2468_s27 }
 0x4ef   : > { %p2673_p13 = pnand %p4387_p12, %p2961_p6 }
 0x4f1   : > { %p2674_p0 = pneg %p2673_p13 }
 0x4f3   : > { %2868 = dma.done.wait (%p2674_p0), %s2469_s11, 128  }
 0x4f4   : > { %2870 = vsyncadd (%p2674_p0), %s2469_s11, 4294967168  ;;  %s4388_s9 = sld [smem:[#allocation15_spill]]  ;;  %p16_p5 = scmp.ge.s32.totalorder %s2977_s21, 4  }
 0x4f5   : > { %s4389_s10 = sld [smem:[#allocation16_spill]]  ;;  %s4391_s12 = smov %s2977_s21 }
 0x4f6   : > { %s4390_s11 = sld [smem:[#allocation17_spill]]  ;;  %18 = sbr.rel (!%p16_p5) target bundleno = 9 (0x9), region = 93 }
 0x4fb   :  { %2475 = vsyncpa [#allocation7], 1 }
 0x4fc   :  { %2477 = vsyncpa [#allocation7 + $0x1], 1 }
 0x4fd   :  { %2478 = vsyncpa [#allocation8], 1 }
 0x4fe   :  { %2480 = vsyncpa [#allocation8 + $0x1], 1 }
 0x4ff   :  { %2481 = vsyncpa [#allocation9], 1 }
 0x500   :  { %2483 = vsyncpa [#allocation9 + $0x1], 1 }

</bundles_post_ra>
